<compile_context>
chip_gen: v5e
topology: v5e:2x2
jax: 0.10.0
libtpu: 0.0.40
codegen_flags: <defaults>
</compile_context>

<pallas_src>
import jax
import jax.numpy as jnp
from jax.experimental import pallas as pl
from jax.experimental.pallas import tpu as pltpu

K = 9      # conv kernel size
PAD = 4    # "same" padding for k=9
POOL = 4   # MaxPool1d(4)
EPS = 1e-5


# ----------------------------- fused Pallas kernel --------------------------

def _make_kernel(BB, L0, C1, C2, C3):
    """Kernel closure over the static geometry of one grid step (BB examples)."""
    L1, L2 = L0 // POOL, L0 // (POOL * POOL)
    S0, S1, S2 = L0 + 2 * PAD, L1 + 2 * PAD, L2 + 2 * PAD     # per-example strides
    N0, N1, N2 = BB * S0 - 2 * PAD, BB * S1 - 2 * PAD, BB * S2 - 2 * PAD
    f32 = jnp.float32

    def kernel(x_ref, w1_ref, w2_ref, w3_ref, sb_ref, fc_ref, o_ref,
               xpad_ref, p1pad_ref, p2pad_ref):
        # Folded BatchNorm scale/shift columns (C, 1) from the packed table.
        sc1, sh1 = sb_ref[0:C1, 0:1], sb_ref[0:C1, 1:2]
        sc2, sh2 = sb_ref[C1:C1 + C2, 0:1], sb_ref[C1:C1 + C2, 1:2]
        sc3, sh3 = sb_ref[C1 + C2:C1 + C2 + C3, 0:1], sb_ref[C1 + C2:C1 + C2 + C3, 1:2]

        # ---- pack BB examples into the padded layer-1 slab (halo-only zeroing) ----
        zrow = jnp.zeros((1, PAD), f32)
        for e in range(BB):
            base = e * S0
            xpad_ref[:, base:base + PAD] = zrow
            xpad_ref[:, base + PAD + L0:base + S0] = zrow
            xpad_ref[:, base + PAD:base + PAD + L0] = x_ref[e]          # (1, L0)

        # ---- layer 1: Conv1d(1 -> C1) on the MXU via a (K, N0) shifted-row slab ----
        slab1 = jnp.concatenate([xpad_ref[:, k:k + N0] for k in range(K)], axis=0)
        y1 = jnp.dot(w1_ref[...], slab1, preferred_element_type=f32)    # (C1, N0)
        y1 = jnp.maximum(y1 * sc1 + sh1, 0.0)                           # BN + ReLU
        p1 = jnp.max(y1.reshape(C1, N0 // POOL, POOL), axis=-1)         # MaxPool1d(4)

        # ---- repack valid pooled columns with zero halos (per example) ----
        zc1 = jnp.zeros((C1, PAD), f32)
        for e in range(BB):
            base, src = e * S1, e * (S0 // POOL)
            p1pad_ref[:, base:base + PAD] = zc1
            p1pad_ref[:, base + PAD + L1:base + S1] = zc1
            p1pad_ref[:, base + PAD:base + PAD + L1] = p1[:, src:src + L1]

        # ---- layer 2: Conv1d(C1 -> C2) as 9 accumulated per-tap MXU matmuls ----
        acc2 = jnp.zeros((C2, N1), f32)
        for k in range(K):
            acc2 = acc2 + jnp.dot(w2_ref[k], p1pad_ref[:, k:k + N1],
                                  preferred_element_type=f32)
        y2 = jnp.maximum(acc2 * sc2 + sh2, 0.0)
        p2 = jnp.max(y2.reshape(C2, N1 // POOL, POOL), axis=-1)

        zc2 = jnp.zeros((C2, PAD), f32)
        for e in range(BB):
            base, src = e * S2, e * (S1 // POOL)
            p2pad_ref[:, base:base + PAD] = zc2
            p2pad_ref[:, base + PAD + L2:base + S2] = zc2
            p2pad_ref[:, base + PAD:base + PAD + L2] = p2[:, src:src + L2]

        # ---- layer 3: Conv1d(C2 -> C3), global max per example, FC ----
        acc3 = jnp.zeros((C3, N2), f32)
        for k in range(K):
            acc3 = acc3 + jnp.dot(w3_ref[k], p2pad_ref[:, k:k + N2],
                                  preferred_element_type=f32)
        y3 = jnp.maximum(acc3 * sc3 + sh3, 0.0)                         # (C3, N2)

        fcw = fc_ref[0:C3, :]                                           # (C3, NC)
        fcb = fc_ref[C3:C3 + 1, :]                                      # (1, NC)
        for e in range(BB):
            # AdaptiveMaxPool1d(1) over the valid columns of example e only.
            feat = jnp.max(y3[:, e * S2:e * S2 + L2], axis=1, keepdims=True)  # (C3, 1)
            o_ref[e] = jnp.sum(fcw * feat, axis=0, keepdims=True) + fcb       # (1, NC)

    return kernel


# ------------------------------ JAX wrapper ----------------------------------

def _fold_bn(gamma, beta, mean, var, conv_b):
    scale = gamma * jax.lax.rsqrt(var + EPS)
    shift = (conv_b - mean) * scale + beta
    return scale, shift


def _vmem_capacity_bytes():
    try:
        return int(pltpu.get_tpu_info().vmem_capacity_bytes)
    except Exception:
        return 64 * 1024 * 1024          # conservative fallback: v7x per-core VMEM


def _vmem_estimate_bytes(bb, L0, C1, C2, C3):
    """Rough per-step VMEM working set of the fused kernel (f32)."""
    L1, L2 = L0 // POOL, L0 // (POOL * POOL)
    n0 = bb * (L0 + 2 * PAD)
    n1 = bb * (L1 + 2 * PAD)
    n2 = bb * (L2 + 2 * PAD)
    words = (2 * bb * L0                               # double-buffered input block
             + (1 + K + 2 * C1 + C1 // 4) * n0         # xpad, layer-1 slab, y1, pool1
             + (C1 + 2 * C2 + C2 // 4) * n1            # p1pad, y2, pool2
             + (C2 + 2 * C3) * n2                      # p2pad, y3
             + 64 * 1024)                              # weights / tables / slack
    return 4 * words


@jax.jit
def cnn1d_forward(x_ncl, p):
    """x_ncl: (B, 1, L) float32 -- same layout as the PyTorch module input."""
    B, cin, L0 = x_ncl.shape
    if cin != 1:
        raise ValueError("CNN1DRawAudio expects a single input channel")
    if L0 % (POOL * POOL) != 0:
        raise ValueError("sequence length must be a multiple of 16 "
                         "(two MaxPool1d(4) stages)")

    C1 = p['c1_w'].shape[0]
    C2 = p['c2_w'].shape[0]
    C3 = p['c3_w'].shape[0]
    NC = p['fc_w'].shape[0]
    L1, L2 = L0 // POOL, L0 // (POOL * POOL)
    S0, S1, S2 = L0 + 2 * PAD, L1 + 2 * PAD, L2 + 2 * PAD

    # BatchNorm (eval) + conv bias folded into one packed (C1+C2+C3, 2) table:
    # column 0 = scale, column 1 = shift (channels-on-sublanes layout).
    sc1, sh1 = _fold_bn(p['bn1_g'], p['bn1_b'], p['bn1_m'], p['bn1_v'], p['c1_b'])
    sc2, sh2 = _fold_bn(p['bn2_g'], p['bn2_b'], p['bn2_m'], p['bn2_v'], p['c2_b'])
    sc3, sh3 = _fold_bn(p['bn3_g'], p['bn3_b'], p['bn3_m'], p['bn3_v'], p['c3_b'])
    sb = jnp.stack([jnp.concatenate([sc1, sc2, sc3]),
                    jnp.concatenate([sh1, sh2, sh3])], axis=1)            # (C1+C2+C3, 2)

    # Conv weights laid out per tap: w[k] is the (Cout, Cin) matrix of tap k.
    w1 = p['c1_w'][:, 0, :]                                               # (C1, K)
    w2t = jnp.transpose(p['c2_w'], (2, 0, 1))                             # (K, C2, C1)
    w3t = jnp.transpose(p['c3_w'], (2, 0, 1))                             # (K, C3, C2)
    fc = jnp.concatenate([jnp.transpose(p['fc_w']), p['fc_b'][None, :]],
                         axis=0)                                          # (C3+1, NC)

    # Examples per grid step: largest divisor of B (<= 8) whose working set fits
    # ~half the per-core VMEM of the current TPU generation.
    cap = _vmem_capacity_bytes()
    budget = cap // 2
    bb = 1
    for cand in range(1, min(B, 8) + 1):
        if B % cand == 0 and _vmem_estimate_bytes(cand, L0, C1, C2, C3) <= budget:
            bb = cand
    est = _vmem_estimate_bytes(bb, L0, C1, C2, C3)
    if est > budget:
        # TODO(synk): length-tiled grid axis with 84-sample halos for very long clips.
        raise ValueError("clip too long for the fully-fused single-tile kernel")
    vmem_limit = int(min(int(0.75 * cap), max(32 * 1024 * 1024, 2 * est)))

    def rep(arr):
        nd = arr.ndim
        return pl.BlockSpec(arr.shape, lambda g, _nd=nd: (0,) * _nd)

    out = pl.pallas_call(
        _make_kernel(bb, L0, C1, C2, C3),
        out_shape=jax.ShapeDtypeStruct((B, 1, NC), jnp.float32),
        grid=(B // bb,),
        in_specs=[
            pl.BlockSpec((bb, 1, L0), lambda g: (g, 0, 0)),   # bb examples per step
            rep(w1), rep(w2t), rep(w3t), rep(sb), rep(fc),
        ],
        out_specs=pl.BlockSpec((bb, 1, NC), lambda g: (g, 0, 0)),
        scratch_shapes=[
            pltpu.VMEM((1, bb * S0), jnp.float32),    # packed, padded raw audio
            pltpu.VMEM((C1, bb * S1), jnp.float32),   # packed, padded pool1 output
            pltpu.VMEM((C2, bb * S2), jnp.float32),   # packed, padded pool2 output
        ],
        compiler_params=pltpu.CompilerParams(
            dimension_semantics=("parallel",),        # v7x: shard batch grid over TCs
            vmem_limit_bytes=vmem_limit),
    )(x_ncl, w1, w2t, w3t, sb, fc)
    return out[:, 0, :]


# --------------------------- reference (plain JAX) ---------------------------

def reference_forward(x_ncl, p):
    def conv1d(x, w, b):
        out = jax.lax.conv_general_dilated(
            x, w, window_strides=(1,), padding=[(PAD, PAD)],
            dimension_numbers=('NCH', 'OIH', 'NCH'))
        return out + b[None, :, None]

    def bn(x, g, be, m, v):
        return (x - m[None, :, None]) / jnp.sqrt(v[None, :, None] + EPS) \
            * g[None, :, None] + be[None, :, None]

    def maxpool(x, k):
        B, C, L = x.shape
        return jnp.max(x.reshape(B, C, L // k, k), axis=-1)

    x = maxpool(jax.nn.relu(bn(conv1d(x_ncl, p['c1_w'], p['c1_b']),
                               p['bn1_g'], p['bn1_b'], p['bn1_m'], p['bn1_v'])), 4)
    x = maxpool(jax.nn.relu(bn(conv1d(x, p['c2_w'], p['c2_b']),
                               p['bn2_g'], p['bn2_b'], p['bn2_m'], p['bn2_v'])), 4)
    x = jax.nn.relu(bn(conv1d(x, p['c3_w'], p['c3_b']),
                       p['bn3_g'], p['bn3_b'], p['bn3_m'], p['bn3_v']))
    feat = jnp.max(x, axis=-1)                                # (B, 64)
    return feat @ jnp.transpose(p['fc_w']) + p['fc_b'][None, :]


# ----------------------------------- main ------------------------------------

def _make_params(key, num_classes=5):
    ks = jax.random.split(key, 20)
    f32 = jnp.float32

    def bn_params(kg, kb, km, kv, c):
        return (1.0 + 0.1 * jax.random.normal(kg, (c,), f32),     # gamma
                0.1 * jax.random.normal(kb, (c,), f32),           # beta
                0.1 * jax.random.normal(km, (c,), f32),           # running_mean
                0.5 + jnp.abs(jax.random.normal(kv, (c,), f32)))  # running_var

    g1, b1, m1, v1 = bn_params(ks[2], ks[3], ks[4], ks[5], 16)
    g2, b2, m2, v2 = bn_params(ks[8], ks[9], ks[10], ks[11], 32)
    g3, b3, m3, v3 = bn_params(ks[14], ks[15], ks[16], ks[17], 64)
    return {
        'c1_w': 0.2 * jax.random.normal(ks[0], (16, 1, K), f32),
        'c1_b': 0.1 * jax.random.normal(ks[1], (16,), f32),
        'bn1_g': g1, 'bn1_b': b1, 'bn1_m': m1, 'bn1_v': v1,
        'c2_w': 0.1 * jax.random.normal(ks[6], (32, 16, K), f32),
        'c2_b': 0.1 * jax.random.normal(ks[7], (32,), f32),
        'bn2_g': g2, 'bn2_b': b2, 'bn2_m': m2, 'bn2_v': v2,
        'c3_w': 0.1 * jax.random.normal(ks[12], (64, 32, K), f32),
        'c3_b': 0.1 * jax.random.normal(ks[13], (64,), f32),
        'bn3_g': g3, 'bn3_b': b3, 'bn3_m': m3, 'bn3_v': v3,
        'fc_w': 0.1 * jax.random.normal(ks[18], (num_classes, 64), f32),
        'fc_b': 0.1 * jax.random.normal(ks[19], (num_classes,), f32),
    }


if __name__ == "__main__":
    key = jax.random.PRNGKey(0)
    k_x, k_p = jax.random.split(key)

    B, L = 2, 64                                  # raw-audio length; /16 after pools
    x = jax.random.normal(k_x, (B, 1, L), jnp.float32)
    params = _make_params(k_p, num_classes=5)

    out = jax.block_until_ready(cnn1d_forward(x, params))
    ref = reference_forward(x, params)

    assert out.shape == (B, 5), out.shape
    assert jnp.allclose(out, ref, rtol=1e-3, atol=1e-3), (out, ref)

    print("KERNEL_OK")
</pallas_src>

<mosaic_0001>
module attributes {stable_mosaic.version = 11 : i64} {
  func.func @kernel(%arg0: i32, %arg1: memref<2x1x64xf32, #tpu.memory_space<vmem>>, %arg2: memref<16x9xf32, #tpu.memory_space<vmem>>, %arg3: memref<9x32x16xf32, #tpu.memory_space<vmem>>, %arg4: memref<9x64x32xf32, #tpu.memory_space<vmem>>, %arg5: memref<112x2xf32, #tpu.memory_space<vmem>>, %arg6: memref<65x5xf32, #tpu.memory_space<vmem>>, %arg7: memref<2x1x5xf32, #tpu.memory_space<vmem>>, %arg8: memref<1x144xf32, #tpu.memory_space<vmem>>, %arg9: memref<16x48xf32, #tpu.memory_space<vmem>>, %arg10: memref<32x24xf32, #tpu.memory_space<vmem>>) attributes {dimension_semantics = [#tpu.dimension_semantics<parallel>], iteration_bounds = array<i64: 1>, scalar_prefetch = 0 : i64, scratch_operands = 3 : i64, tpu.core_type = #tpu.core_type<tc>, window_params = [{transform_indices = @transform_0, window_bounds = array<i64: 2, 1, 64>}, {pipeline_mode = #tpu.pipeline_mode<synchronous>, transform_indices = @transform_1, window_bounds = array<i64: 16, 9>}, {pipeline_mode = #tpu.pipeline_mode<synchronous>, transform_indices = @transform_2, window_bounds = array<i64: 9, 32, 16>}, {pipeline_mode = #tpu.pipeline_mode<synchronous>, transform_indices = @transform_3, window_bounds = array<i64: 9, 64, 32>}, {pipeline_mode = #tpu.pipeline_mode<synchronous>, transform_indices = @transform_4, window_bounds = array<i64: 112, 2>}, {pipeline_mode = #tpu.pipeline_mode<synchronous>, transform_indices = @transform_5, window_bounds = array<i64: 65, 5>}, {transform_indices = @transform_6, window_bounds = array<i64: 2, 1, 5>}]} {
    %c0 = arith.constant 0 : index
    %c0_0 = arith.constant 0 : index
    %0 = vector.load %arg5[%c0, %c0_0] : memref<112x2xf32, #tpu.memory_space<vmem>>, vector<16x1xf32>
    %c0_1 = arith.constant 0 : index
    %c1 = arith.constant 1 : index
    %1 = vector.load %arg5[%c0_1, %c1] : memref<112x2xf32, #tpu.memory_space<vmem>>, vector<16x1xf32>
    %c16 = arith.constant 16 : index
    %c0_2 = arith.constant 0 : index
    %2 = vector.load %arg5[%c16, %c0_2] : memref<112x2xf32, #tpu.memory_space<vmem>>, vector<32x1xf32>
    %c16_3 = arith.constant 16 : index
    %c1_4 = arith.constant 1 : index
    %3 = vector.load %arg5[%c16_3, %c1_4] : memref<112x2xf32, #tpu.memory_space<vmem>>, vector<32x1xf32>
    %c48 = arith.constant 48 : index
    %c0_5 = arith.constant 0 : index
    %4 = vector.load %arg5[%c48, %c0_5] : memref<112x2xf32, #tpu.memory_space<vmem>>, vector<64x1xf32>
    %c48_6 = arith.constant 48 : index
    %c1_7 = arith.constant 1 : index
    %5 = vector.load %arg5[%c48_6, %c1_7] : memref<112x2xf32, #tpu.memory_space<vmem>>, vector<64x1xf32>
    %cst = arith.constant 0.000000e+00 : f32
    %6 = vector.broadcast %cst : f32 to vector<1x4xf32>
    %c0_8 = arith.constant 0 : index
    %c0_9 = arith.constant 0 : index
    %7 = vector.load %arg8[%c0_8, %c0_9] : memref<1x144xf32, #tpu.memory_space<vmem>>, vector<1x4xf32>
    tpu.vector_store %arg8[%c0_8, %c0_9], %6 {strides = array<i32>} : memref<1x144xf32, #tpu.memory_space<vmem>>, vector<1x4xf32>,
    %c0_10 = arith.constant 0 : index
    %c68 = arith.constant 68 : index
    %8 = vector.load %arg8[%c0_10, %c68] : memref<1x144xf32, #tpu.memory_space<vmem>>, vector<1x4xf32>
    tpu.vector_store %arg8[%c0_10, %c68], %6 {strides = array<i32>} : memref<1x144xf32, #tpu.memory_space<vmem>>, vector<1x4xf32>,
    %c0_11 = arith.constant 0 : index
    %c0_12 = arith.constant 0 : index
    %c0_13 = arith.constant 0 : index
    %9 = vector.load %arg1[%c0_11, %c0_12, %c0_13] : memref<2x1x64xf32, #tpu.memory_space<vmem>>, vector<1x1x64xf32>
    %10 = vector.shape_cast %9 : vector<1x1x64xf32> to vector<1x64xf32>
    %c0_14 = arith.constant 0 : index
    %c4 = arith.constant 4 : index
    %11 = vector.load %arg8[%c0_14, %c4] : memref<1x144xf32, #tpu.memory_space<vmem>>, vector<1x64xf32>
    tpu.vector_store %arg8[%c0_14, %c4], %10 {strides = array<i32>} : memref<1x144xf32, #tpu.memory_space<vmem>>, vector<1x64xf32>,
    %c0_15 = arith.constant 0 : index
    %c72 = arith.constant 72 : index
    %12 = vector.load %arg8[%c0_15, %c72] : memref<1x144xf32, #tpu.memory_space<vmem>>, vector<1x4xf32>
    tpu.vector_store %arg8[%c0_15, %c72], %6 {strides = array<i32>} : memref<1x144xf32, #tpu.memory_space<vmem>>, vector<1x4xf32>,
    %c0_16 = arith.constant 0 : index
    %c140 = arith.constant 140 : index
    %13 = vector.load %arg8[%c0_16, %c140] : memref<1x144xf32, #tpu.memory_space<vmem>>, vector<1x4xf32>
    tpu.vector_store %arg8[%c0_16, %c140], %6 {strides = array<i32>} : memref<1x144xf32, #tpu.memory_space<vmem>>, vector<1x4xf32>,
    %c1_17 = arith.constant 1 : index
    %c0_18 = arith.constant 0 : index
    %c0_19 = arith.constant 0 : index
    %14 = vector.load %arg1[%c1_17, %c0_18, %c0_19] : memref<2x1x64xf32, #tpu.memory_space<vmem>>, vector<1x1x64xf32>
    %15 = vector.shape_cast %14 : vector<1x1x64xf32> to vector<1x64xf32>
    %c0_20 = arith.constant 0 : index
    %c76 = arith.constant 76 : index
    %16 = vector.load %arg8[%c0_20, %c76] : memref<1x144xf32, #tpu.memory_space<vmem>>, vector<1x64xf32>
    tpu.vector_store %arg8[%c0_20, %c76], %15 {strides = array<i32>} : memref<1x144xf32, #tpu.memory_space<vmem>>, vector<1x64xf32>,
    %c0_21 = arith.constant 0 : index
    %c0_22 = arith.constant 0 : index
    %17 = vector.load %arg8[%c0_21, %c0_22] : memref<1x144xf32, #tpu.memory_space<vmem>>, vector<1x136xf32>
    %c0_23 = arith.constant 0 : index
    %c1_24 = arith.constant 1 : index
    %18 = vector.load %arg8[%c0_23, %c1_24] : memref<1x144xf32, #tpu.memory_space<vmem>>, vector<1x136xf32>
    %c0_25 = arith.constant 0 : index
    %c2 = arith.constant 2 : index
    %19 = vector.load %arg8[%c0_25, %c2] : memref<1x144xf32, #tpu.memory_space<vmem>>, vector<1x136xf32>
    %c0_26 = arith.constant 0 : index
    %c3 = arith.constant 3 : index
    %20 = vector.load %arg8[%c0_26, %c3] : memref<1x144xf32, #tpu.memory_space<vmem>>, vector<1x136xf32>
    %c0_27 = arith.constant 0 : index
    %c4_28 = arith.constant 4 : index
    %21 = vector.load %arg8[%c0_27, %c4_28] : memref<1x144xf32, #tpu.memory_space<vmem>>, vector<1x136xf32>
    %c0_29 = arith.constant 0 : index
    %c5 = arith.constant 5 : index
    %22 = vector.load %arg8[%c0_29, %c5] : memref<1x144xf32, #tpu.memory_space<vmem>>, vector<1x136xf32>
    %c0_30 = arith.constant 0 : index
    %c6 = arith.constant 6 : index
    %23 = vector.load %arg8[%c0_30, %c6] : memref<1x144xf32, #tpu.memory_space<vmem>>, vector<1x136xf32>
    %c0_31 = arith.constant 0 : index
    %c7 = arith.constant 7 : index
    %24 = vector.load %arg8[%c0_31, %c7] : memref<1x144xf32, #tpu.memory_space<vmem>>, vector<1x136xf32>
    %c0_32 = arith.constant 0 : index
    %c8 = arith.constant 8 : index
    %25 = vector.load %arg8[%c0_32, %c8] : memref<1x144xf32, #tpu.memory_space<vmem>>, vector<1x136xf32>
    %26 = tpu.concatenate %17, %18, %19, %20, %21, %22, %23, %24, %25 in 0 : vector<1x136xf32>, vector<1x136xf32>, vector<1x136xf32>, vector<1x136xf32>, vector<1x136xf32>, vector<1x136xf32>, vector<1x136xf32>, vector<1x136xf32>, vector<1x136xf32> -> vector<9x136xf32>
    %c0_33 = arith.constant 0 : index
    %c0_34 = arith.constant 0 : index
    %27 = vector.load %arg2[%c0_33, %c0_34] : memref<16x9xf32, #tpu.memory_space<vmem>>, vector<16x9xf32>
    %cst_35 = arith.constant dense<0.000000e+00> : vector<16x136xf32>
    %28 = tpu.matmul %27, %26, %cst_35 {dimension_numbers = #tpu.dot_dimension_numbers<[1], [0], [0], [1], [0, 0, 1, 1], [], []>} : vector<16x9xf32>, vector<9x136xf32>, vector<16x136xf32> -> vector<16x136xf32>
    %29 = vector.broadcast %0 : vector<16x1xf32> to vector<16x136xf32>
    %30 = arith.mulf %28, %29 : vector<16x136xf32>
    %31 = vector.broadcast %1 : vector<16x1xf32> to vector<16x136xf32>
    %32 = arith.addf %30, %31 : vector<16x136xf32>
    %cst_36 = arith.constant 0.000000e+00 : f32
    %33 = vector.broadcast %cst_36 : f32 to vector<16x136xf32>
    %34 = arith.maximumf %32, %33 : vector<16x136xf32>
    %35 = vector.shape_cast %34 : vector<16x136xf32> to vector<16x34x4xf32>
    %cst_37 = arith.constant dense<0xFF800000> : vector<16x34xf32>
    %36 = vector.multi_reduction <maximumf>, %35, %cst_37 [2] : vector<16x34x4xf32> to vector<16x34xf32>
    %cst_38 = arith.constant 0.000000e+00 : f32
    %37 = vector.broadcast %cst_38 : f32 to vector<16x4xf32>
    %c0_39 = arith.constant 0 : index
    %c0_40 = arith.constant 0 : index
    %38 = vector.load %arg9[%c0_39, %c0_40] : memref<16x48xf32, #tpu.memory_space<vmem>>, vector<16x4xf32>
    tpu.vector_store %arg9[%c0_39, %c0_40], %37 {strides = array<i32>} : memref<16x48xf32, #tpu.memory_space<vmem>>, vector<16x4xf32>,
    %c0_41 = arith.constant 0 : index
    %c20 = arith.constant 20 : index
    %39 = vector.load %arg9[%c0_41, %c20] : memref<16x48xf32, #tpu.memory_space<vmem>>, vector<16x4xf32>
    tpu.vector_store %arg9[%c0_41, %c20], %37 {strides = array<i32>} : memref<16x48xf32, #tpu.memory_space<vmem>>, vector<16x4xf32>,
    %40 = vector.extract_strided_slice %36 {offsets = [0, 0], sizes = [16, 16], strides = [1, 1]} : vector<16x34xf32> to vector<16x16xf32>
    %c0_42 = arith.constant 0 : index
    %c4_43 = arith.constant 4 : index
    %41 = vector.load %arg9[%c0_42, %c4_43] : memref<16x48xf32, #tpu.memory_space<vmem>>, vector<16x16xf32>
    tpu.vector_store %arg9[%c0_42, %c4_43], %40 {strides = array<i32>} : memref<16x48xf32, #tpu.memory_space<vmem>>, vector<16x16xf32>,
    %c0_44 = arith.constant 0 : index
    %c24 = arith.constant 24 : index
    %42 = vector.load %arg9[%c0_44, %c24] : memref<16x48xf32, #tpu.memory_space<vmem>>, vector<16x4xf32>
    tpu.vector_store %arg9[%c0_44, %c24], %37 {strides = array<i32>} : memref<16x48xf32, #tpu.memory_space<vmem>>, vector<16x4xf32>,
    %c0_45 = arith.constant 0 : index
    %c44 = arith.constant 44 : index
    %43 = vector.load %arg9[%c0_45, %c44] : memref<16x48xf32, #tpu.memory_space<vmem>>, vector<16x4xf32>
    tpu.vector_store %arg9[%c0_45, %c44], %37 {strides = array<i32>} : memref<16x48xf32, #tpu.memory_space<vmem>>, vector<16x4xf32>,
    %44 = vector.extract_strided_slice %36 {offsets = [0, 18], sizes = [16, 16], strides = [1, 1]} : vector<16x34xf32> to vector<16x16xf32>
    %c0_46 = arith.constant 0 : index
    %c28 = arith.constant 28 : index
    %45 = vector.load %arg9[%c0_46, %c28] : memref<16x48xf32, #tpu.memory_space<vmem>>, vector<16x16xf32>
    tpu.vector_store %arg9[%c0_46, %c28], %44 {strides = array<i32>} : memref<16x48xf32, #tpu.memory_space<vmem>>, vector<16x16xf32>,
    %cst_47 = arith.constant 0.000000e+00 : f32
    %46 = vector.broadcast %cst_47 : f32 to vector<32x40xf32>
    %c0_48 = arith.constant 0 : index
    %c0_49 = arith.constant 0 : index
    %c0_50 = arith.constant 0 : index
    %47 = vector.load %arg3[%c0_48, %c0_49, %c0_50] : memref<9x32x16xf32, #tpu.memory_space<vmem>>, vector<1x32x16xf32>
    %48 = vector.shape_cast %47 : vector<1x32x16xf32> to vector<32x16xf32>
    %c0_51 = arith.constant 0 : index
    %c0_52 = arith.constant 0 : index
    %49 = vector.load %arg9[%c0_51, %c0_52] : memref<16x48xf32, #tpu.memory_space<vmem>>, vector<16x40xf32>
    %cst_53 = arith.constant dense<0.000000e+00> : vector<32x40xf32>
    %50 = tpu.matmul %48, %49, %cst_53 {dimension_numbers = #tpu.dot_dimension_numbers<[1], [0], [0], [1], [0, 0, 1, 1], [], []>} : vector<32x16xf32>, vector<16x40xf32>, vector<32x40xf32> -> vector<32x40xf32>
    %51 = arith.addf %46, %50 : vector<32x40xf32>
    %c1_54 = arith.constant 1 : index
    %c0_55 = arith.constant 0 : index
    %c0_56 = arith.constant 0 : index
    %52 = vector.load %arg3[%c1_54, %c0_55, %c0_56] : memref<9x32x16xf32, #tpu.memory_space<vmem>>, vector<1x32x16xf32>
    %53 = vector.shape_cast %52 : vector<1x32x16xf32> to vector<32x16xf32>
    %c0_57 = arith.constant 0 : index
    %c1_58 = arith.constant 1 : index
    %54 = vector.load %arg9[%c0_57, %c1_58] : memref<16x48xf32, #tpu.memory_space<vmem>>, vector<16x40xf32>
    %cst_59 = arith.constant dense<0.000000e+00> : vector<32x40xf32>
    %55 = tpu.matmul %53, %54, %cst_59 {dimension_numbers = #tpu.dot_dimension_numbers<[1], [0], [0], [1], [0, 0, 1, 1], [], []>} : vector<32x16xf32>, vector<16x40xf32>, vector<32x40xf32> -> vector<32x40xf32>
    %56 = arith.addf %51, %55 : vector<32x40xf32>
    %c2_60 = arith.constant 2 : index
    %c0_61 = arith.constant 0 : index
    %c0_62 = arith.constant 0 : index
    %57 = vector.load %arg3[%c2_60, %c0_61, %c0_62] : memref<9x32x16xf32, #tpu.memory_space<vmem>>, vector<1x32x16xf32>
    %58 = vector.shape_cast %57 : vector<1x32x16xf32> to vector<32x16xf32>
    %c0_63 = arith.constant 0 : index
    %c2_64 = arith.constant 2 : index
    %59 = vector.load %arg9[%c0_63, %c2_64] : memref<16x48xf32, #tpu.memory_space<vmem>>, vector<16x40xf32>
    %cst_65 = arith.constant dense<0.000000e+00> : vector<32x40xf32>
    %60 = tpu.matmul %58, %59, %cst_65 {dimension_numbers = #tpu.dot_dimension_numbers<[1], [0], [0], [1], [0, 0, 1, 1], [], []>} : vector<32x16xf32>, vector<16x40xf32>, vector<32x40xf32> -> vector<32x40xf32>
    %61 = arith.addf %56, %60 : vector<32x40xf32>
    %c3_66 = arith.constant 3 : index
    %c0_67 = arith.constant 0 : index
    %c0_68 = arith.constant 0 : index
    %62 = vector.load %arg3[%c3_66, %c0_67, %c0_68] : memref<9x32x16xf32, #tpu.memory_space<vmem>>, vector<1x32x16xf32>
    %63 = vector.shape_cast %62 : vector<1x32x16xf32> to vector<32x16xf32>
    %c0_69 = arith.constant 0 : index
    %c3_70 = arith.constant 3 : index
    %64 = vector.load %arg9[%c0_69, %c3_70] : memref<16x48xf32, #tpu.memory_space<vmem>>, vector<16x40xf32>
    %cst_71 = arith.constant dense<0.000000e+00> : vector<32x40xf32>
    %65 = tpu.matmul %63, %64, %cst_71 {dimension_numbers = #tpu.dot_dimension_numbers<[1], [0], [0], [1], [0, 0, 1, 1], [], []>} : vector<32x16xf32>, vector<16x40xf32>, vector<32x40xf32> -> vector<32x40xf32>
    %66 = arith.addf %61, %65 : vector<32x40xf32>
    %c4_72 = arith.constant 4 : index
    %c0_73 = arith.constant 0 : index
    %c0_74 = arith.constant 0 : index
    %67 = vector.load %arg3[%c4_72, %c0_73, %c0_74] : memref<9x32x16xf32, #tpu.memory_space<vmem>>, vector<1x32x16xf32>
    %68 = vector.shape_cast %67 : vector<1x32x16xf32> to vector<32x16xf32>
    %c0_75 = arith.constant 0 : index
    %c4_76 = arith.constant 4 : index
    %69 = vector.load %arg9[%c0_75, %c4_76] : memref<16x48xf32, #tpu.memory_space<vmem>>, vector<16x40xf32>
    %cst_77 = arith.constant dense<0.000000e+00> : vector<32x40xf32>
    %70 = tpu.matmul %68, %69, %cst_77 {dimension_numbers = #tpu.dot_dimension_numbers<[1], [0], [0], [1], [0, 0, 1, 1], [], []>} : vector<32x16xf32>, vector<16x40xf32>, vector<32x40xf32> -> vector<32x40xf32>
    %71 = arith.addf %66, %70 : vector<32x40xf32>
    %c5_78 = arith.constant 5 : index
    %c0_79 = arith.constant 0 : index
    %c0_80 = arith.constant 0 : index
    %72 = vector.load %arg3[%c5_78, %c0_79, %c0_80] : memref<9x32x16xf32, #tpu.memory_space<vmem>>, vector<1x32x16xf32>
    %73 = vector.shape_cast %72 : vector<1x32x16xf32> to vector<32x16xf32>
    %c0_81 = arith.constant 0 : index
    %c5_82 = arith.constant 5 : index
    %74 = vector.load %arg9[%c0_81, %c5_82] : memref<16x48xf32, #tpu.memory_space<vmem>>, vector<16x40xf32>
    %cst_83 = arith.constant dense<0.000000e+00> : vector<32x40xf32>
    %75 = tpu.matmul %73, %74, %cst_83 {dimension_numbers = #tpu.dot_dimension_numbers<[1], [0], [0], [1], [0, 0, 1, 1], [], []>} : vector<32x16xf32>, vector<16x40xf32>, vector<32x40xf32> -> vector<32x40xf32>
    %76 = arith.addf %71, %75 : vector<32x40xf32>
    %c6_84 = arith.constant 6 : index
    %c0_85 = arith.constant 0 : index
    %c0_86 = arith.constant 0 : index
    %77 = vector.load %arg3[%c6_84, %c0_85, %c0_86] : memref<9x32x16xf32, #tpu.memory_space<vmem>>, vector<1x32x16xf32>
    %78 = vector.shape_cast %77 : vector<1x32x16xf32> to vector<32x16xf32>
    %c0_87 = arith.constant 0 : index
    %c6_88 = arith.constant 6 : index
    %79 = vector.load %arg9[%c0_87, %c6_88] : memref<16x48xf32, #tpu.memory_space<vmem>>, vector<16x40xf32>
    %cst_89 = arith.constant dense<0.000000e+00> : vector<32x40xf32>
    %80 = tpu.matmul %78, %79, %cst_89 {dimension_numbers = #tpu.dot_dimension_numbers<[1], [0], [0], [1], [0, 0, 1, 1], [], []>} : vector<32x16xf32>, vector<16x40xf32>, vector<32x40xf32> -> vector<32x40xf32>
    %81 = arith.addf %76, %80 : vector<32x40xf32>
    %c7_90 = arith.constant 7 : index
    %c0_91 = arith.constant 0 : index
    %c0_92 = arith.constant 0 : index
    %82 = vector.load %arg3[%c7_90, %c0_91, %c0_92] : memref<9x32x16xf32, #tpu.memory_space<vmem>>, vector<1x32x16xf32>
    %83 = vector.shape_cast %82 : vector<1x32x16xf32> to vector<32x16xf32>
    %c0_93 = arith.constant 0 : index
    %c7_94 = arith.constant 7 : index
    %84 = vector.load %arg9[%c0_93, %c7_94] : memref<16x48xf32, #tpu.memory_space<vmem>>, vector<16x40xf32>
    %cst_95 = arith.constant dense<0.000000e+00> : vector<32x40xf32>
    %85 = tpu.matmul %83, %84, %cst_95 {dimension_numbers = #tpu.dot_dimension_numbers<[1], [0], [0], [1], [0, 0, 1, 1], [], []>} : vector<32x16xf32>, vector<16x40xf32>, vector<32x40xf32> -> vector<32x40xf32>
    %86 = arith.addf %81, %85 : vector<32x40xf32>
    %c8_96 = arith.constant 8 : index
    %c0_97 = arith.constant 0 : index
    %c0_98 = arith.constant 0 : index
    %87 = vector.load %arg3[%c8_96, %c0_97, %c0_98] : memref<9x32x16xf32, #tpu.memory_space<vmem>>, vector<1x32x16xf32>
    %88 = vector.shape_cast %87 : vector<1x32x16xf32> to vector<32x16xf32>
    %c0_99 = arith.constant 0 : index
    %c8_100 = arith.constant 8 : index
    %89 = vector.load %arg9[%c0_99, %c8_100] : memref<16x48xf32, #tpu.memory_space<vmem>>, vector<16x40xf32>
    %cst_101 = arith.constant dense<0.000000e+00> : vector<32x40xf32>
    %90 = tpu.matmul %88, %89, %cst_101 {dimension_numbers = #tpu.dot_dimension_numbers<[1], [0], [0], [1], [0, 0, 1, 1], [], []>} : vector<32x16xf32>, vector<16x40xf32>, vector<32x40xf32> -> vector<32x40xf32>
    %91 = arith.addf %86, %90 : vector<32x40xf32>
    %92 = vector.broadcast %2 : vector<32x1xf32> to vector<32x40xf32>
    %93 = arith.mulf %91, %92 : vector<32x40xf32>
    %94 = vector.broadcast %3 : vector<32x1xf32> to vector<32x40xf32>
    %95 = arith.addf %93, %94 : vector<32x40xf32>
    %cst_102 = arith.constant 0.000000e+00 : f32
    %96 = vector.broadcast %cst_102 : f32 to vector<32x40xf32>
    %97 = arith.maximumf %95, %96 : vector<32x40xf32>
    %98 = vector.shape_cast %97 : vector<32x40xf32> to vector<32x10x4xf32>
    %cst_103 = arith.constant dense<0xFF800000> : vector<32x10xf32>
    %99 = vector.multi_reduction <maximumf>, %98, %cst_103 [2] : vector<32x10x4xf32> to vector<32x10xf32>
    %cst_104 = arith.constant 0.000000e+00 : f32
    %100 = vector.broadcast %cst_104 : f32 to vector<32x4xf32>
    %c0_105 = arith.constant 0 : index
    %c0_106 = arith.constant 0 : index
    %101 = vector.load %arg10[%c0_105, %c0_106] : memref<32x24xf32, #tpu.memory_space<vmem>>, vector<32x4xf32>
    tpu.vector_store %arg10[%c0_105, %c0_106], %100 {strides = array<i32>} : memref<32x24xf32, #tpu.memory_space<vmem>>, vector<32x4xf32>,
    %c0_107 = arith.constant 0 : index
    %c8_108 = arith.constant 8 : index
    %102 = vector.load %arg10[%c0_107, %c8_108] : memref<32x24xf32, #tpu.memory_space<vmem>>, vector<32x4xf32>
    tpu.vector_store %arg10[%c0_107, %c8_108], %100 {strides = array<i32>} : memref<32x24xf32, #tpu.memory_space<vmem>>, vector<32x4xf32>,
    %103 = vector.extract_strided_slice %99 {offsets = [0, 0], sizes = [32, 4], strides = [1, 1]} : vector<32x10xf32> to vector<32x4xf32>
    %c0_109 = arith.constant 0 : index
    %c4_110 = arith.constant 4 : index
    %104 = vector.load %arg10[%c0_109, %c4_110] : memref<32x24xf32, #tpu.memory_space<vmem>>, vector<32x4xf32>
    tpu.vector_store %arg10[%c0_109, %c4_110], %103 {strides = array<i32>} : memref<32x24xf32, #tpu.memory_space<vmem>>, vector<32x4xf32>,
    %c0_111 = arith.constant 0 : index
    %c12 = arith.constant 12 : index
    %105 = vector.load %arg10[%c0_111, %c12] : memref<32x24xf32, #tpu.memory_space<vmem>>, vector<32x4xf32>
    tpu.vector_store %arg10[%c0_111, %c12], %100 {strides = array<i32>} : memref<32x24xf32, #tpu.memory_space<vmem>>, vector<32x4xf32>,
    %c0_112 = arith.constant 0 : index
    %c20_113 = arith.constant 20 : index
    %106 = vector.load %arg10[%c0_112, %c20_113] : memref<32x24xf32, #tpu.memory_space<vmem>>, vector<32x4xf32>
    tpu.vector_store %arg10[%c0_112, %c20_113], %100 {strides = array<i32>} : memref<32x24xf32, #tpu.memory_space<vmem>>, vector<32x4xf32>,
    %107 = vector.extract_strided_slice %99 {offsets = [0, 6], sizes = [32, 4], strides = [1, 1]} : vector<32x10xf32> to vector<32x4xf32>
    %c0_114 = arith.constant 0 : index
    %c16_115 = arith.constant 16 : index
    %108 = vector.load %arg10[%c0_114, %c16_115] : memref<32x24xf32, #tpu.memory_space<vmem>>, vector<32x4xf32>
    tpu.vector_store %arg10[%c0_114, %c16_115], %107 {strides = array<i32>} : memref<32x24xf32, #tpu.memory_space<vmem>>, vector<32x4xf32>,
    %cst_116 = arith.constant 0.000000e+00 : f32
    %109 = vector.broadcast %cst_116 : f32 to vector<64x16xf32>
    %c0_117 = arith.constant 0 : index
    %c0_118 = arith.constant 0 : index
    %c0_119 = arith.constant 0 : index
    %110 = vector.load %arg4[%c0_117, %c0_118, %c0_119] : memref<9x64x32xf32, #tpu.memory_space<vmem>>, vector<1x64x32xf32>
    %111 = vector.shape_cast %110 : vector<1x64x32xf32> to vector<64x32xf32>
    %c0_120 = arith.constant 0 : index
    %c0_121 = arith.constant 0 : index
    %112 = vector.load %arg10[%c0_120, %c0_121] : memref<32x24xf32, #tpu.memory_space<vmem>>, vector<32x16xf32>
    %cst_122 = arith.constant dense<0.000000e+00> : vector<64x16xf32>
    %113 = tpu.matmul %111, %112, %cst_122 {dimension_numbers = #tpu.dot_dimension_numbers<[1], [0], [0], [1], [0, 0, 1, 1], [], []>} : vector<64x32xf32>, vector<32x16xf32>, vector<64x16xf32> -> vector<64x16xf32>
    %114 = arith.addf %109, %113 : vector<64x16xf32>
    %c1_123 = arith.constant 1 : index
    %c0_124 = arith.constant 0 : index
    %c0_125 = arith.constant 0 : index
    %115 = vector.load %arg4[%c1_123, %c0_124, %c0_125] : memref<9x64x32xf32, #tpu.memory_space<vmem>>, vector<1x64x32xf32>
    %116 = vector.shape_cast %115 : vector<1x64x32xf32> to vector<64x32xf32>
    %c0_126 = arith.constant 0 : index
    %c1_127 = arith.constant 1 : index
    %117 = vector.load %arg10[%c0_126, %c1_127] : memref<32x24xf32, #tpu.memory_space<vmem>>, vector<32x16xf32>
    %cst_128 = arith.constant dense<0.000000e+00> : vector<64x16xf32>
    %118 = tpu.matmul %116, %117, %cst_128 {dimension_numbers = #tpu.dot_dimension_numbers<[1], [0], [0], [1], [0, 0, 1, 1], [], []>} : vector<64x32xf32>, vector<32x16xf32>, vector<64x16xf32> -> vector<64x16xf32>
    %119 = arith.addf %114, %118 : vector<64x16xf32>
    %c2_129 = arith.constant 2 : index
    %c0_130 = arith.constant 0 : index
    %c0_131 = arith.constant 0 : index
    %120 = vector.load %arg4[%c2_129, %c0_130, %c0_131] : memref<9x64x32xf32, #tpu.memory_space<vmem>>, vector<1x64x32xf32>
    %121 = vector.shape_cast %120 : vector<1x64x32xf32> to vector<64x32xf32>
    %c0_132 = arith.constant 0 : index
    %c2_133 = arith.constant 2 : index
    %122 = vector.load %arg10[%c0_132, %c2_133] : memref<32x24xf32, #tpu.memory_space<vmem>>, vector<32x16xf32>
    %cst_134 = arith.constant dense<0.000000e+00> : vector<64x16xf32>
    %123 = tpu.matmul %121, %122, %cst_134 {dimension_numbers = #tpu.dot_dimension_numbers<[1], [0], [0], [1], [0, 0, 1, 1], [], []>} : vector<64x32xf32>, vector<32x16xf32>, vector<64x16xf32> -> vector<64x16xf32>
    %124 = arith.addf %119, %123 : vector<64x16xf32>
    %c3_135 = arith.constant 3 : index
    %c0_136 = arith.constant 0 : index
    %c0_137 = arith.constant 0 : index
    %125 = vector.load %arg4[%c3_135, %c0_136, %c0_137] : memref<9x64x32xf32, #tpu.memory_space<vmem>>, vector<1x64x32xf32>
    %126 = vector.shape_cast %125 : vector<1x64x32xf32> to vector<64x32xf32>
    %c0_138 = arith.constant 0 : index
    %c3_139 = arith.constant 3 : index
    %127 = vector.load %arg10[%c0_138, %c3_139] : memref<32x24xf32, #tpu.memory_space<vmem>>, vector<32x16xf32>
    %cst_140 = arith.constant dense<0.000000e+00> : vector<64x16xf32>
    %128 = tpu.matmul %126, %127, %cst_140 {dimension_numbers = #tpu.dot_dimension_numbers<[1], [0], [0], [1], [0, 0, 1, 1], [], []>} : vector<64x32xf32>, vector<32x16xf32>, vector<64x16xf32> -> vector<64x16xf32>
    %129 = arith.addf %124, %128 : vector<64x16xf32>
    %c4_141 = arith.constant 4 : index
    %c0_142 = arith.constant 0 : index
    %c0_143 = arith.constant 0 : index
    %130 = vector.load %arg4[%c4_141, %c0_142, %c0_143] : memref<9x64x32xf32, #tpu.memory_space<vmem>>, vector<1x64x32xf32>
    %131 = vector.shape_cast %130 : vector<1x64x32xf32> to vector<64x32xf32>
    %c0_144 = arith.constant 0 : index
    %c4_145 = arith.constant 4 : index
    %132 = vector.load %arg10[%c0_144, %c4_145] : memref<32x24xf32, #tpu.memory_space<vmem>>, vector<32x16xf32>
    %cst_146 = arith.constant dense<0.000000e+00> : vector<64x16xf32>
    %133 = tpu.matmul %131, %132, %cst_146 {dimension_numbers = #tpu.dot_dimension_numbers<[1], [0], [0], [1], [0, 0, 1, 1], [], []>} : vector<64x32xf32>, vector<32x16xf32>, vector<64x16xf32> -> vector<64x16xf32>
    %134 = arith.addf %129, %133 : vector<64x16xf32>
    %c5_147 = arith.constant 5 : index
    %c0_148 = arith.constant 0 : index
    %c0_149 = arith.constant 0 : index
    %135 = vector.load %arg4[%c5_147, %c0_148, %c0_149] : memref<9x64x32xf32, #tpu.memory_space<vmem>>, vector<1x64x32xf32>
    %136 = vector.shape_cast %135 : vector<1x64x32xf32> to vector<64x32xf32>
    %c0_150 = arith.constant 0 : index
    %c5_151 = arith.constant 5 : index
    %137 = vector.load %arg10[%c0_150, %c5_151] : memref<32x24xf32, #tpu.memory_space<vmem>>, vector<32x16xf32>
    %cst_152 = arith.constant dense<0.000000e+00> : vector<64x16xf32>
    %138 = tpu.matmul %136, %137, %cst_152 {dimension_numbers = #tpu.dot_dimension_numbers<[1], [0], [0], [1], [0, 0, 1, 1], [], []>} : vector<64x32xf32>, vector<32x16xf32>, vector<64x16xf32> -> vector<64x16xf32>
    %139 = arith.addf %134, %138 : vector<64x16xf32>
    %c6_153 = arith.constant 6 : index
    %c0_154 = arith.constant 0 : index
    %c0_155 = arith.constant 0 : index
    %140 = vector.load %arg4[%c6_153, %c0_154, %c0_155] : memref<9x64x32xf32, #tpu.memory_space<vmem>>, vector<1x64x32xf32>
    %141 = vector.shape_cast %140 : vector<1x64x32xf32> to vector<64x32xf32>
    %c0_156 = arith.constant 0 : index
    %c6_157 = arith.constant 6 : index
    %142 = vector.load %arg10[%c0_156, %c6_157] : memref<32x24xf32, #tpu.memory_space<vmem>>, vector<32x16xf32>
    %cst_158 = arith.constant dense<0.000000e+00> : vector<64x16xf32>
    %143 = tpu.matmul %141, %142, %cst_158 {dimension_numbers = #tpu.dot_dimension_numbers<[1], [0], [0], [1], [0, 0, 1, 1], [], []>} : vector<64x32xf32>, vector<32x16xf32>, vector<64x16xf32> -> vector<64x16xf32>
    %144 = arith.addf %139, %143 : vector<64x16xf32>
    %c7_159 = arith.constant 7 : index
    %c0_160 = arith.constant 0 : index
    %c0_161 = arith.constant 0 : index
    %145 = vector.load %arg4[%c7_159, %c0_160, %c0_161] : memref<9x64x32xf32, #tpu.memory_space<vmem>>, vector<1x64x32xf32>
    %146 = vector.shape_cast %145 : vector<1x64x32xf32> to vector<64x32xf32>
    %c0_162 = arith.constant 0 : index
    %c7_163 = arith.constant 7 : index
    %147 = vector.load %arg10[%c0_162, %c7_163] : memref<32x24xf32, #tpu.memory_space<vmem>>, vector<32x16xf32>
    %cst_164 = arith.constant dense<0.000000e+00> : vector<64x16xf32>
    %148 = tpu.matmul %146, %147, %cst_164 {dimension_numbers = #tpu.dot_dimension_numbers<[1], [0], [0], [1], [0, 0, 1, 1], [], []>} : vector<64x32xf32>, vector<32x16xf32>, vector<64x16xf32> -> vector<64x16xf32>
    %149 = arith.addf %144, %148 : vector<64x16xf32>
    %c8_165 = arith.constant 8 : index
    %c0_166 = arith.constant 0 : index
    %c0_167 = arith.constant 0 : index
    %150 = vector.load %arg4[%c8_165, %c0_166, %c0_167] : memref<9x64x32xf32, #tpu.memory_space<vmem>>, vector<1x64x32xf32>
    %151 = vector.shape_cast %150 : vector<1x64x32xf32> to vector<64x32xf32>
    %c0_168 = arith.constant 0 : index
    %c8_169 = arith.constant 8 : index
    %152 = vector.load %arg10[%c0_168, %c8_169] : memref<32x24xf32, #tpu.memory_space<vmem>>, vector<32x16xf32>
    %cst_170 = arith.constant dense<0.000000e+00> : vector<64x16xf32>
    %153 = tpu.matmul %151, %152, %cst_170 {dimension_numbers = #tpu.dot_dimension_numbers<[1], [0], [0], [1], [0, 0, 1, 1], [], []>} : vector<64x32xf32>, vector<32x16xf32>, vector<64x16xf32> -> vector<64x16xf32>
    %154 = arith.addf %149, %153 : vector<64x16xf32>
    %155 = vector.broadcast %4 : vector<64x1xf32> to vector<64x16xf32>
    %156 = arith.mulf %154, %155 : vector<64x16xf32>
    %157 = vector.broadcast %5 : vector<64x1xf32> to vector<64x16xf32>
    %158 = arith.addf %156, %157 : vector<64x16xf32>
    %cst_171 = arith.constant 0.000000e+00 : f32
    %159 = vector.broadcast %cst_171 : f32 to vector<64x16xf32>
    %160 = arith.maximumf %158, %159 : vector<64x16xf32>
    %c0_172 = arith.constant 0 : index
    %c0_173 = arith.constant 0 : index
    %161 = vector.load %arg6[%c0_172, %c0_173] : memref<65x5xf32, #tpu.memory_space<vmem>>, vector<64x5xf32>
    %c64 = arith.constant 64 : index
    %c0_174 = arith.constant 0 : index
    %162 = vector.load %arg6[%c64, %c0_174] : memref<65x5xf32, #tpu.memory_space<vmem>>, vector<1x5xf32>
    %163 = vector.extract_strided_slice %160 {offsets = [0, 0], sizes = [64, 4], strides = [1, 1]} : vector<64x16xf32> to vector<64x4xf32>
    %cst_175 = arith.constant dense<0xFF800000> : vector<64xf32>
    %164 = vector.multi_reduction <maximumf>, %163, %cst_175 [1] : vector<64x4xf32> to vector<64xf32>
    %165 = vector.shape_cast %164 : vector<64xf32> to vector<64x1xf32>
    %166 = vector.broadcast %165 : vector<64x1xf32> to vector<64x5xf32>
    %167 = arith.mulf %161, %166 : vector<64x5xf32>
    %cst_176 = arith.constant dense<0.000000e+00> : vector<5xf32>
    %168 = vector.multi_reduction <add>, %167, %cst_176 [0] : vector<64x5xf32> to vector<5xf32>
    %169 = vector.shape_cast %168 : vector<5xf32> to vector<1x5xf32>
    %170 = arith.addf %169, %162 : vector<1x5xf32>
    %c0_177 = arith.constant 0 : index
    %c0_178 = arith.constant 0 : index
    %c0_179 = arith.constant 0 : index
    %171 = vector.load %arg7[%c0_177, %c0_178, %c0_179] : memref<2x1x5xf32, #tpu.memory_space<vmem>>, vector<1x1x5xf32>
    %172 = vector.shape_cast %171 : vector<1x1x5xf32> to vector<1x5xf32>
    %173 = vector.shape_cast %170 : vector<1x5xf32> to vector<1x1x5xf32>
    tpu.vector_store %arg7[%c0_177, %c0_178, %c0_179], %173 {strides = array<i32>} : memref<2x1x5xf32, #tpu.memory_space<vmem>>, vector<1x1x5xf32>,
    %174 = vector.extract_strided_slice %160 {offsets = [0, 12], sizes = [64, 4], strides = [1, 1]} : vector<64x16xf32> to vector<64x4xf32>
    %cst_180 = arith.constant dense<0xFF800000> : vector<64xf32>
    %175 = vector.multi_reduction <maximumf>, %174, %cst_180 [1] : vector<64x4xf32> to vector<64xf32>
    %176 = vector.shape_cast %175 : vector<64xf32> to vector<64x1xf32>
    %177 = vector.broadcast %176 : vector<64x1xf32> to vector<64x5xf32>
    %178 = arith.mulf %161, %177 : vector<64x5xf32>
    %cst_181 = arith.constant dense<0.000000e+00> : vector<5xf32>
    %179 = vector.multi_reduction <add>, %178, %cst_181 [0] : vector<64x5xf32> to vector<5xf32>
    %180 = vector.shape_cast %179 : vector<5xf32> to vector<1x5xf32>
    %181 = arith.addf %180, %162 : vector<1x5xf32>
    %c1_182 = arith.constant 1 : index
    %c0_183 = arith.constant 0 : index
    %c0_184 = arith.constant 0 : index
    %182 = vector.load %arg7[%c1_182, %c0_183, %c0_184] : memref<2x1x5xf32, #tpu.memory_space<vmem>>, vector<1x1x5xf32>
    %183 = vector.shape_cast %182 : vector<1x1x5xf32> to vector<1x5xf32>
    %184 = vector.shape_cast %181 : vector<1x5xf32> to vector<1x1x5xf32>
    tpu.vector_store %arg7[%c1_182, %c0_183, %c0_184], %184 {strides = array<i32>} : memref<2x1x5xf32, #tpu.memory_space<vmem>>, vector<1x1x5xf32>,
    return
  }
  func.func @transform_0(%arg0: i32) -> (i32, i32, i32) {
    %c0_i32 = arith.constant 0 : i32
    %c0_i32_0 = arith.constant 0 : i32
    %c0_i32_1 = arith.constant 0 : i32
    return %arg0, %c0_i32, %c0_i32_0 : i32, i32, i32
  }
  func.func @transform_1(%arg0: i32) -> (i32, i32) {
    %c0_i32 = arith.constant 0 : i32
    %c0_i32_0 = arith.constant 0 : i32
    %c0_i32_1 = arith.constant 0 : i32
    return %c0_i32, %c0_i32_0 : i32, i32
  }
  func.func @transform_2(%arg0: i32) -> (i32, i32, i32) {
    %c0_i32 = arith.constant 0 : i32
    %c0_i32_0 = arith.constant 0 : i32
    %c0_i32_1 = arith.constant 0 : i32
    %c0_i32_2 = arith.constant 0 : i32
    return %c0_i32, %c0_i32_0, %c0_i32_1 : i32, i32, i32
  }
  func.func @transform_3(%arg0: i32) -> (i32, i32, i32) {
    %c0_i32 = arith.constant 0 : i32
    %c0_i32_0 = arith.constant 0 : i32
    %c0_i32_1 = arith.constant 0 : i32
    %c0_i32_2 = arith.constant 0 : i32
    return %c0_i32, %c0_i32_0, %c0_i32_1 : i32, i32, i32
  }
  func.func @transform_4(%arg0: i32) -> (i32, i32) {
    %c0_i32 = arith.constant 0 : i32
    %c0_i32_0 = arith.constant 0 : i32
    %c0_i32_1 = arith.constant 0 : i32
    return %c0_i32, %c0_i32_0 : i32, i32
  }
  func.func @transform_5(%arg0: i32) -> (i32, i32) {
    %c0_i32 = arith.constant 0 : i32
    %c0_i32_0 = arith.constant 0 : i32
    %c0_i32_1 = arith.constant 0 : i32
    return %c0_i32, %c0_i32_0 : i32, i32
  }
  func.func @transform_6(%arg0: i32) -> (i32, i32, i32) {
    %c0_i32 = arith.constant 0 : i32
    %c0_i32_0 = arith.constant 0 : i32
    %c0_i32_1 = arith.constant 0 : i32
    return %arg0, %c0_i32, %c0_i32_0 : i32, i32, i32
  }
}

</mosaic_0001>

<bundles_post_ra>
// kernel: cnn1d_forward.1
= control target key start
LH: loop header
LB: loop body
LE: loop exit
PB: predicated region body
PF: predicated region fallthrough
CT: control target
= control target key end

     0   :  { %s5276_s23 = smov 4   ;;  %s8536_s0 = inlined_call_operand.vmem [shape: f32[2,1,64], index: 0, kind: input, shape index: {}]   ;;  %s8537_s1 = inlined_call_operand.vmem [shape: f32[16,9], index: 1, kind: input, shape index: {}]   ;;  %s8538_s2 = inlined_call_operand.vmem [shape: f32[9,32,16], index: 2, kind: input, shape index: {}]   ;;  %s8539_s3 = inlined_call_operand.vmem [shape: f32[9,64,32], index: 3, kind: input, shape index: {}]   ;;  %s8540_s4 = inlined_call_operand.vmem [shape: f32[112,2], index: 4, kind: input, shape index: {}]   ;;  %s8541_s5 = inlined_call_operand.vmem [shape: f32[65,5], index: 5, kind: input, shape index: {}]   ;;  %s8542_s6 = inlined_call_operand.hbm [shape: f32[2,1,5], index: 6, kind: output, shape index: {}]  }
   0x1   :  { %v47_v0 = vld [vmem:[%s8536_s0] sm:$0x1] }
   0x2   :  { %49 = vrot.lane.b32.xlu0 %v47_v0, %s5276_s23 }
   0x3   :  { %11 = vsyncpa [#allocation6], 0  ;;  %v4825_v1 = vld [vmem:[%s8536_s0 + $0x1] sm:$0x1]  ;;  %s5277_s26 = smov 76   ;;  %v8564_v2 = vlaneseq  ;;  %v8565_v3 = vmov 0.0  }
   0x4   :  { %v24_v4 = vld [vmem:[%s8540_s4] sm:$0xff]  ;;  %v8560_v5 = vmov 0   ;;  %v8562_v6 = vmov 1   ;;  %v25_v7 = vld [vmem:[%s8540_s4 + $0x8] sm:$0xff]  ;;  %vm70_vm15 = vcmask 621568   ;;  %s8549_s30 = smov 123  }
   0x5   :  { %vm40_vm0 = vcmp.lt.s32.totalorder %v8564_v2, 4  ;;  %vm43_vm1 = vcmp.ge.s32.totalorder %v8564_v2, 68  ;;  %vm44_vm2 = vcmp.lt.s32.totalorder %v8564_v2, 72  ;;  %5080 = vset.pattern.permute.xlu2 %v8560_v5  ;;  %5081 = vset.pattern.permute.xlu0 %v8560_v5  ;;  %vm60_vm4 = vcmp.ge.s32.totalorder %v8564_v2, 12  ;;  %s8551_s7 = smov 127   ;;  %s8547_s8 = smov 125  }
   0x6   :  { %42 = vst.msk [vmem:[#allocation2] sm:$0x1] %vm40_vm0, %v8565_v3  ;;  %vm45_vm3 = vmand %vm43_vm1, %vm44_vm2  ;;  %227 = vperm.xlu2 %5080, %v24_v4   ;;  %vm61_vm5 = vcmp.lt.s32.totalorder %v8564_v2, 16  ;;  %5082 = vset.pattern.permute.xlu1 %v8562_v6  ;;  %vm52_vm7 = vcmp.ge.s32.totalorder %v8564_v2, 4  ;;  %vm53_vm8 = vcmp.lt.s32.totalorder %v8564_v2, 68  ;;  %vm56_vm9 = vcmp.ge.s32.totalorder %v8564_v2, 72 }
   0x7   :  { %46 = vst.msk [vmem:[#allocation2] sm:$0x1] %vm45_vm3, %v8565_v3  ;;  %vm62_vm6 = vmand %vm60_vm4, %vm61_vm5  ;;  %240 = vperm.xlu1 %5082, %v24_v4   ;;  %vm57_vm10 = vcmp.lt.s32.totalorder %v8564_v2, 76  ;;  %vm73_vm13 = vcmp.ge.s32.totalorder %v8564_v2, 76  ;;  %vm74_vm14 = vcmp.lt.s32.totalorder %v8564_v2, 140  ;;  %s5284_s9 = smov 120  }
   0x8   :  { %63 = vst.msk [vmem:[#allocation2 + $0x1] sm:$0x1] %vm62_vm6, %v8565_v3  ;;  %vm54_vm11 = vmand %vm52_vm7, %vm53_vm8  ;;  %s8553_s10 = smov 126   ;;  %s5286_s11 = smov 124   ;;  %vm87_vm1 = vcmask 1039360   ;;  %vm95_vm2 = vcmask 1031168  }
   0x9   :  { %vm58_vm12 = vmand %vm56_vm9, %vm57_vm10  ;;  %s8545_s12 = smov 122   ;;  %s8543_s13 = smov 121   ;;  %vm145_vm3 = vcmask 1040384   ;;  %vm148_vm4 = vcmask 1041408   ;;  %vm103_vm5 = vcmask 1022976   ;;  %vm151_vm6 = vcmask 1042432  }
   0xa   :  { %67 = vrot.lane.b32.xlu0 %v4825_v1, %s5277_s26  ;;  %vm75_vm0 = vmand %vm73_vm13, %vm74_vm14  ;;  %vm111_vm7 = vcmask 1014784   ;;  %vm154_vm8 = vcmask 1043456   ;;  %vm127_vm9 = vcmask 998400   ;;  %vm119_vm10 = vcmask 1006592   ;;  %v166_v61 = vld [vmem:[%s8537_s1] sm:$0xff]  ;;  %v167_v4 = vld [vmem:[%s8537_s1 + $0x8] sm:$0xff] }
   0xb   :  { %vm143_vm13 = vcmask 982016   ;;  %vm135_vm14 = vcmask 990208   ;;  %s5289_s18 = smov 116   ;;  %s5290_s1 = smov 104  }
   0xc   :  { %s5291_s19 = smov 108   ;;  %s5292_s20 = smov 112  }
   0xd   :  { %s5293_s21 = smov 92   ;;  %s5294_s22 = smov 96  }
   0xe   :  { %5083 = vset.pattern.permute.xlu2 %v8562_v6  ;;  %s5295_s24 = smov 100   ;;  %s5296_s25 = smov 80  }
   0xf   :  { %244 = vperm.xlu2 %5083, %v25_v7   ;;  %5125 = vset.pattern.permute.xlu1 %v8560_v5  ;;  %s5297_s27 = smov 84   ;;  %s5298_s28 = smov 88  }
  0x10   :  { %s5299_s0 = smov 68   ;;  %s5300_s29 = smov 72  }
  0x11   :  { %s5301_s14 = smov 56   ;;  %s8556_s15 = smov 60  }
  0x12   :  { %232 = vperm.xlu0 %5081, %v25_v7   ;;  %s5303_s16 = smov 64   ;;  %s5304_s17 = smov 44  }
  0x17   :  { %5124 = vset.pattern.permute.xlu2 %v8560_v5 }
  0x60   :  { %v5399_v16 = vpop.permute.xlu2 %227 }
  0x69   :  { %v5401_v17 = vpop.permute.xlu2 %244 }
  0x74   :  { %v50_v8 = vpop.permute.xlu0 %49 }
  0x75   :  { %55 = vst.msk [vmem:[#allocation2] sm:$0x1] %vm54_vm11, %v50_v8  ;;  %vm157_vm11 = vcmask 1044480  }
  0x76   :  { %59 = vst.msk [vmem:[#allocation2] sm:$0x1] %vm58_vm12, %v8565_v3  ;;  %vm160_vm12 = vcmask 1045504  }
  0x79   :  { %v5403_v18 = vpop.permute.xlu1 %240 }
  0x7c   :  { %v68_v9 = vpop.permute.xlu0 %67 }
  0x7d   :  { %v69_v10 = vrot.slane %v68_v9, 7 }
  0x7f   :  { %v71_v11 = vsel %vm70_vm15, %v69_v10, %v68_v9  ;;  %vm163_vm15 = vcmask 1046528  }
  0x80   :  { %76 = vst.msk [vmem:[#allocation2] sm:$0x3] %vm75_vm0, %v71_v11  ;;  %vm168_vm0 = vcmask 72704  }
  0x84   :  { %v5405_v21 = vpop.permute.xlu0 %232 }
  0x87   :  { %v77_v12 = vld [vmem:[#allocation2] sm:$0x3] }
  0x88   :  { %v79_v13 = vperm.slane %v77_v12, 0  ;;  %v80_v14 = vperm.slane %v77_v12, 1 }
  0x8a   :  { %v5104_v15 = vpack.i.bf16 %v80_v14, %v79_v13 }
  0x8c   :  { %5105 = vrot.lane.b32.xlu0 %v5104_v15, %s8549_s30  ;;  %5085 = vrot.lane.b32.xlu1 %v5104_v15, %s8551_s7  ;;  %s8557_s30 = smov 36   ;;  %s8558_s7 = smov 40  }
  0x8d   :  { %5095 = vrot.lane.b32.xlu2 %v5104_v15, %s8547_s8  ;;  %s5307_s8 = smov 32  }
  0x94   :  { %139 = vrot.lane.b32.xlu0 %v79_v13, %s5284_s9  ;;  %5090 = vrot.lane.b32.xlu1 %v5104_v15, %s8553_s10  ;;  %s8559_s10 = smov 20  }
  0x95   :  { %5100 = vrot.lane.b32.xlu2 %v5104_v15, %s5286_s11 }
  0x9c   :  { %5110 = vrot.lane.b32.xlu1 %v5104_v15, %s8545_s12  ;;  %s5306_s12 = smov 52  }
  0x9d   :  { %5115 = vrot.lane.b32.xlu2 %v5104_v15, %s8543_s13  ;;  %s8555_s13 = smov 48  }
  0xa4   :  { %141 = vrot.lane.b32.xlu1 %v80_v14, %s5284_s9 }
  0xe7   :  { %v5096_v19 = vpop.permute.xlu2 %5095 }
  0xe8   :  { %v5098_v30 = vunpack.i.h.bf16 %v5096_v19  ;;  %v5097_v31 = vunpack.i.l.bf16 %v5096_v19 }
  0xea   :  { %v104_v37 = vsel %vm103_vm5, %v5097_v31, %v5098_v30  ;;  %vm1737_vm5 = vcmask 162912  }
  0xef   :  { %v5101_v25 = vpop.permute.xlu2 %5100 }
  0xf0   :  { %v5103_v35 = vunpack.i.h.bf16 %v5101_v25  ;;  %v5102_v36 = vunpack.i.l.bf16 %v5101_v25 }
  0xf2   :  { %v112_v46 = vsel %vm111_vm7, %v5102_v36, %v5103_v35  ;;  %vm1786_vm7 = vcmask 1042434  }
  0xf7   :  { %v5116_v47 = vpop.permute.xlu2 %5115 }
  0xf8   :  { %v5118_v51 = vunpack.i.h.bf16 %v5116_v47  ;;  %v5117_v52 = vunpack.i.l.bf16 %v5116_v47 }
  0xfa   :  { %v136_v60 = vsel %vm135_vm14, %v5117_v52, %v5118_v51  ;;  %vm1810_vm14 = vcmask 228544  }
  0xfe   :  { %v5086_v20 = vpop.permute.xlu1 %5085  ;;  %v5106_v33 = vpop.permute.xlu0 %5105 }
  0xff   :  { %v5088_v22 = vunpack.i.h.bf16 %v5086_v20  ;;  %v5087_v23 = vunpack.i.l.bf16 %v5086_v20  ;;  %v5108_v43 = vunpack.i.h.bf16 %v5106_v33  ;;  %v5107_v44 = vunpack.i.l.bf16 %v5106_v33 }
 0x101   :  { %v88_v28 = vsel %vm87_vm1, %v5087_v23, %v5088_v22  ;;  %v147_v41 = vsel %vm145_vm3, %v80_v14, %v5088_v22  ;;  %v120_v53 = vsel %vm119_vm10, %v5107_v44, %v5108_v43  ;;  %vm1452_vm1 = vcmask 31744  }
 0x102   :  { %v146_v32 = vsel %vm145_vm3, %v79_v13, %v88_v28  ;;  %1694 = vst.msk [vmem:[#allocation3] sm:$0xff] %vm1452_vm1, %v8565_v3  ;;  %vm1792_vm10 = vcmask 1045509  }
 0x103   :  { %1695 = vst.msk [vmem:[#allocation3 + $0x8] sm:$0xff] %vm1452_vm1, %v8565_v3 }
 0x104   :  { %3473 = vst.msk [vmem:[#allocation4] sm:$0xff] %vm1452_vm1, %v8565_v3 }
 0x105   :  { %3474 = vst.msk [vmem:[#allocation4 + $0x8] sm:$0xff] %vm1452_vm1, %v8565_v3 }
 0x106   :  { %v5091_v24 = vpop.permute.xlu1 %5090  ;;  %v140_v55 = vpop.permute.xlu0 %139  ;;  %3475 = vst.msk [vmem:[#allocation4 + $0x10] sm:$0xff] %vm1452_vm1, %v8565_v3 }
 0x107   :  { %v5093_v26 = vunpack.i.h.bf16 %v5091_v24  ;;  %v5092_v27 = vunpack.i.l.bf16 %v5091_v24  ;;  %3476 = vst.msk [vmem:[#allocation4 + $0x18] sm:$0xff] %vm1452_vm1, %v8565_v3 }
 0x109   :  { %v96_v29 = vsel %vm95_vm2, %v5092_v27, %v5093_v26  ;;  %v150_v45 = vsel %vm148_vm4, %v147_v41, %v5093_v26  ;;  %vm452_vm2 = vcmask 1047556  }
 0x10a   :  { %v149_v34 = vsel %vm148_vm4, %v146_v32, %v96_v29  ;;  %v153_v50 = vsel %vm151_vm6, %v150_v45, %v5098_v30  ;;  %vm1696_vm4 = vcmask 195744  }
 0x10b   :  { %v152_v42 = vsel %vm151_vm6, %v149_v34, %v104_v37  ;;  %v156_v58 = vsel %vm154_vm8, %v153_v50, %v5103_v35  ;;  %vm1784_vm6 = vcmask 1041409  }
 0x10c   :  { %v155_v48 = vsel %vm154_vm8, %v152_v42, %v112_v46  ;;  %v159_v63 = vsel %vm157_vm11, %v156_v58, %v5108_v43  ;;  %vm1788_vm8 = vcmask 1043459  }
 0x10d   :  { %v158_v54 = vsel %vm157_vm11, %v155_v48, %v120_v53  ;;  %vm1794_vm11 = vcmask 1046534  }
 0x10e   :  { %v5111_v38 = vpop.permute.xlu1 %5110 }
 0x10f   :  { %v5113_v39 = vunpack.i.h.bf16 %v5111_v38  ;;  %v5112_v40 = vunpack.i.l.bf16 %v5111_v38 }
 0x111   :  { %v128_v49 = vsel %vm127_vm9, %v5112_v40, %v5113_v39  ;;  %v162_v0 = vsel %vm160_vm12, %v159_v63, %v5113_v39  ;;  %vm1790_vm9 = vcmask 1044484  }
 0x112   :  { %v161_v57 = vsel %vm160_vm12, %v158_v54, %v128_v49  ;;  %v165_v1 = vsel %vm163_vm15, %v162_v0, %v5118_v51  ;;  %v5316_v49 = vmov 1983009808   ;;  %vm1796_vm12 = vcmask 1047559  }
 0x113   :  { %v164_v62 = vsel %vm163_vm15, %v161_v57, %v136_v60  ;;  %v457_v50 = vunpack.c.l.s4 %v5316_v49  ;;  %vm1813_vm15 = vcmask 392544  }
 0x115   :  { %v5644_v58 = vunpack.c.0.s8 %v457_v50 }
 0x116   :  { %v142_v56 = vpop.permute.xlu1 %141 }
 0x117   :  { %v144_v59 = vsel %vm143_vm13, %v140_v55, %v142_v56  ;;  %vm1807_vm13 = vcmask 162848  }
 0x118   :  { %4826 = vmatpush.msk.msra.mxu1 %vm145_vm3, %v144_v59 }
 0x11a   :  { %194 = vmatpush.msra.mxu1 %v164_v62 }
 0x11b   :  { %4827 = vmatmul.msk.f32.vlgmr.msra.gmra.mxu1 %vm168_vm0, %v166_v61 }
 0x11c   :  { %4829 = vmatpush.msk.msrb.mxu1 %vm145_vm3, %v142_v56  ;;  %vm1465_vm3 = vcmask 25600  }
 0x11e   :  { %217 = vmatpush.msrb.mxu1 %v165_v1 }
 0x123   :  { %4828 = vmatmul.msk.f32.gmra.mxu1 %vm168_vm0, %v167_v4 }
 0x12b   :  { %4830 = vmatmul.msk.f32.vlgmr.msrb.gmra.mxu1 %vm168_vm0, %v166_v61 }
 0x133   :  { %4831 = vmatmul.msk.f32.gmra.mxu1 %vm168_vm0, %v167_v4  ;;  %vm1868_vm0 = vcmask 343312  }
 0x198   :  { %v196_v7 = vpop.f32.mrf.mxu1 }
 0x199   :  { %v235_v8 = vmul.f32 %v5399_v16, %v196_v7 }
 0x19b   :  { %v247_v9 = vadd.f32 %v5403_v18, %v235_v8 }
 0x19d   :  { %v5429_v10 = vmax.f32 %v247_v9, 0.0 }
 0x19f   :  { %269 = vrot.lane.b32.xlu2 %v5429_v10, %s5289_s18  ;;  %263 = vrot.lane.b32.xlu0 %v5429_v10, %s5284_s9 }
 0x1a0   :  { %257 = vrot.lane.b32.xlu1 %v5429_v10, %s5286_s11  ;;  %v199_v11 = vpop.f32.mrf.mxu1 }
 0x1a1   :  { %v237_v12 = vmul.f32 %v5405_v21, %v199_v11 }
 0x1a3   :  { %v249_v13 = vadd.f32 %v5401_v17, %v237_v12  ;;  %v5317_v12 = vmov 1934713408  }
 0x1a5   :  { %v5493_v14 = vmax.f32 %v249_v13, 0.0  ;;  %v505_v13 = vunpack.c.l.s4 %v5317_v12 }
 0x1a7   :  { %287 = vrot.lane.b32.xlu2 %v5429_v10, %s5290_s1  ;;  %281 = vrot.lane.b32.xlu0 %v5429_v10, %s5291_s19 }
 0x1a8   :  { %275 = vrot.lane.b32.xlu1 %v5429_v10, %s5292_s20  ;;  %v219_v34 = vpop.f32.mrf.mxu1 }
 0x1a9   :  { %v236_v38 = vmul.f32 %v5399_v16, %v219_v34 }
 0x1ab   :  { %v248_v39 = vadd.f32 %v5403_v18, %v236_v38 }
 0x1ad   :  { %v5611_v44 = vmax.f32 %v248_v39, 0.0 }
 0x1af   :  { %305 = vrot.lane.b32.xlu2 %v5429_v10, %s5293_s21  ;;  %299 = vrot.lane.b32.xlu0 %v5429_v10, %s5294_s22  ;;  %8583 = vst [vmem:[#allocation8_spill] sm:$0xff] %v5611_v44 }
 0x1b0   :  { %293 = vrot.lane.b32.xlu1 %v5429_v10, %s5295_s24  ;;  %v222_v43 = vpop.f32.mrf.mxu1 }
 0x1b1   :  { %v238_v16 = vmul.f32 %v5405_v21, %v222_v43 }
 0x1b3   :  { %v250_v45 = vadd.f32 %v5401_v17, %v238_v16  ;;  %v454_v17 = vrot.slane %v5429_v10, 4 }
 0x1b5   :  { %v5627_v48 = vmax.f32 %v250_v45, 0.0 }
 0x1b7   :  { %323 = vrot.lane.b32.xlu2 %v5429_v10, %s5296_s25  ;;  %317 = vrot.lane.b32.xlu0 %v5429_v10, %s5297_s27  ;;  %8584 = vst [vmem:[#allocation9_spill] sm:$0xff] %v5627_v48 }
 0x1b8   :  { %311 = vrot.lane.b32.xlu1 %v5429_v10, %s5298_s28 }
 0x1bf   :  { %341 = vrot.lane.b32.xlu2 %v5429_v10, %s5299_s0  ;;  %335 = vrot.lane.b32.xlu0 %v5429_v10, %s5300_s29 }
 0x1c0   :  { %329 = vrot.lane.b32.xlu1 %v5429_v10, %s5277_s26 }
 0x1c7   :  { %359 = vrot.lane.b32.xlu2 %v5429_v10, %s5301_s14  ;;  %353 = vrot.lane.b32.xlu0 %v5429_v10, %s8556_s15  ;;  %s5312_s15 = smov 28  }
 0x1c8   :  { %347 = vrot.lane.b32.xlu1 %v5429_v10, %s5303_s16 }
 0x1cf   :  { %377 = vrot.lane.b32.xlu2 %v5429_v10, %s5304_s17  ;;  %371 = vrot.lane.b32.xlu0 %v5429_v10, %s8555_s13  ;;  %s5311_s13 = smov 24  }
 0x1d0   :  { %365 = vrot.lane.b32.xlu1 %v5429_v10, %s5306_s12 }
 0x1d7   :  { %395 = vrot.lane.b32.xlu2 %v5429_v10, %s5307_s8  ;;  %389 = vrot.lane.b32.xlu0 %v5429_v10, %s8557_s30  ;;  %s5313_s30 = smov 8  }
 0x1d8   :  { %383 = vrot.lane.b32.xlu1 %v5429_v10, %s8558_s7  ;;  %s5314_s7 = smov 12  }
 0x1df   :  { %413 = vrot.lane.b32.xlu2 %v5429_v10, %s8559_s10  ;;  %407 = vrot.lane.b32.xlu0 %v5429_v10, %s5311_s13  ;;  %s5315_s10 = smov 16  }
 0x1e0   :  { %401 = vrot.lane.b32.xlu1 %v5429_v10, %s5312_s15 }
 0x1e7   :  { %431 = vrot.lane.b32.xlu2 %v5429_v10, %s5313_s30  ;;  %425 = vrot.lane.b32.xlu0 %v5429_v10, %s5314_s7 }
 0x1e8   :  { %419 = vrot.lane.b32.xlu1 %v5429_v10, %s5315_s10 }
 0x1ef   :  { %271 = vrot.lane.b32.xlu0 %v5493_v14, %s5289_s18  ;;  %259 = vrot.lane.b32.xlu2 %v5493_v14, %s5286_s11 }
 0x1f0   :  { %437 = vrot.lane.b32.xlu1 %v5429_v10, %s5276_s23 }
 0x1f7   :  { %289 = vrot.lane.b32.xlu0 %v5493_v14, %s5290_s1  ;;  %277 = vrot.lane.b32.xlu2 %v5493_v14, %s5292_s20 }
 0x1f8   :  { %265 = vrot.lane.b32.xlu1 %v5493_v14, %s5284_s9 }
 0x1f9   :  { %v5507_v15 = vpop.permute.xlu2 %269 }
 0x1fa   :  { %v464_v57 = vrot.slane %v5507_v15, 4 }
 0x1ff   :  { %307 = vrot.lane.b32.xlu0 %v5493_v14, %s5293_s21  ;;  %295 = vrot.lane.b32.xlu2 %v5493_v14, %s5295_s24 }
 0x200   :  { %283 = vrot.lane.b32.xlu1 %v5493_v14, %s5291_s19 }
 0x201   :  { %v5515_v19 = vpop.permute.xlu2 %287 }
 0x202   :  { %v476_v9 = vrot.slane %v5515_v19, 4 }
 0x207   :  { %325 = vrot.lane.b32.xlu0 %v5493_v14, %s5296_s25  ;;  %313 = vrot.lane.b32.xlu2 %v5493_v14, %s5298_s28  ;;  %s8579_s25 = smov 40   ;;  %s8606_s28 = smov 126  }
 0x208   :  { %301 = vrot.lane.b32.xlu1 %v5493_v14, %s5294_s22 }
 0x209   :  { %v5523_v20 = vpop.permute.xlu2 %305 }
 0x20f   :  { %343 = vrot.lane.b32.xlu0 %v5493_v14, %s5299_s0  ;;  %331 = vrot.lane.b32.xlu2 %v5493_v14, %s5277_s26  ;;  %s8578_s26 = smov 60   ;;  %s8607_s0 = smov 127  }
 0x210   :  { %319 = vrot.lane.b32.xlu1 %v5493_v14, %s5297_s27  ;;  %s8580_s27 = smov 48  }
 0x211   :  { %v5543_v22 = vpop.permute.xlu2 %323  ;;  %v5545_v23 = vpop.permute.xlu0 %263 }
 0x212   :  { %v5547_v24 = vpop.permute.xlu1 %257  ;;  %v451_v60 = vrot.slane %v5545_v23, 4  ;;  %v455_v61 = vsel %vm452_vm2, %v5545_v23, %v454_v17 }
 0x213   :  { %v5667_v23 = vperm.slane %v455_v61, %v5644_v58  ;;  %v465_v34 = vsel %vm452_vm2, %v464_v57, %v5547_v24  ;;  %v466_v38 = vrot.slane %v5547_v24, 4 }
 0x214   :  { %v453_v50 = vsel %vm452_vm2, %v451_v60, %v5429_v10 }
 0x217   :  { %361 = vrot.lane.b32.xlu0 %v5493_v14, %s5301_s14  ;;  %349 = vrot.lane.b32.xlu2 %v5493_v14, %s5303_s16  ;;  %s8609_s16 = smov 125  }
 0x218   :  { %337 = vrot.lane.b32.xlu1 %v5493_v14, %s5300_s29 }
 0x219   :  { %v5555_v25 = vpop.permute.xlu2 %341  ;;  %v5557_v26 = vpop.permute.xlu0 %281 }
 0x21a   :  { %v5559_v27 = vpop.permute.xlu1 %275  ;;  %v600_v59 = vrot.slane %v5555_v25, 4 }
 0x21b   :  { %v477_v43 = vsel %vm452_vm2, %v476_v9, %v5559_v27 }
 0x21c   :  { %v5704_v60 = vperm.slane %v477_v43, %v5644_v58  ;;  %v5732_v43 = vunpack.c.0.s8 %v505_v13 }
 0x21f   :  { %379 = vrot.lane.b32.xlu0 %v5493_v14, %s5304_s17  ;;  %367 = vrot.lane.b32.xlu2 %v5493_v14, %s5306_s12  ;;  %s8581_s12 = smov 20   ;;  %s4813_s17 = sshll.u32 %s8542_s6, 4  ;;  %s4814_s17 = int_to_ptr.hbm [resolvable:$true] %s4813_s17 }
 0x220   :  { %355 = vrot.lane.b32.xlu1 %v5493_v14, %s8578_s26  ;;  %s5318_s26 = smov [#allocation5]  }
 0x221   :  { %v5567_v28 = vpop.permute.xlu2 %359  ;;  %v5569_v29 = vpop.permute.xlu0 %299 }
 0x222   :  { %v5571_v30 = vpop.permute.xlu1 %293 }
 0x223   :  { %v488_v21 = vrot.slane %v5571_v30, 4 }
 0x225   :  { %v489_v54 = vsel %vm452_vm2, %v488_v21, %v5557_v26 }
 0x226   :  { %v5654_v0 = vperm.slane %v489_v54, %v5644_v58 }
 0x227   :  { %397 = vrot.lane.b32.xlu0 %v5493_v14, %s5307_s8  ;;  %385 = vrot.lane.b32.xlu2 %v5493_v14, %s8579_s25  ;;  %s8582_s8 = smov 36   ;;  %s8611_s25 = smov 122  }
 0x228   :  { %373 = vrot.lane.b32.xlu1 %v5493_v14, %s8580_s27  ;;  %v524_v24 = vrot.slane %v5654_v0, 4  ;;  %s8612_s27 = smov 121  }
 0x229   :  { %v5579_v31 = vpop.permute.xlu2 %377  ;;  %v5581_v32 = vpop.permute.xlu0 %317 }
 0x22a   :  { %v5583_v33 = vpop.permute.xlu1 %311  ;;  %v714_v55 = vrot.slane %v5579_v31, 4  ;;  %v576_v11 = vrot.slane %v5581_v32, 4 }
 0x22c   :  { %v577_v57 = vsel %vm452_vm2, %v576_v11, %v5523_v20  ;;  %v525_v11 = vsel %vm452_vm2, %v524_v24, %v5704_v60 }
 0x22d   :  { %v5717_v9 = vperm.slane %v577_v57, %v5644_v58 }
 0x22f   :  { %415 = vrot.lane.b32.xlu0 %v5493_v14, %s8581_s12  ;;  %403 = vrot.lane.b32.xlu2 %v5493_v14, %s5312_s15  ;;  %s8608_s15 = smov 123   ;;  %s5319_s12 = smov 1  }
 0x230   :  { %391 = vrot.lane.b32.xlu1 %v5493_v14, %s8582_s8 }
 0x231   :  { %v5591_v35 = vpop.permute.xlu2 %395  ;;  %v5593_v36 = vpop.permute.xlu0 %335 }
 0x232   :  { %v5595_v37 = vpop.permute.xlu1 %329  ;;  %v588_v1 = vrot.slane %v5593_v36, 4 }
 0x233   :  { %v601_v4 = vsel %vm452_vm2, %v600_v59, %v5595_v37  ;;  %v467_v59 = vsel %vm452_vm2, %v5507_v15, %v466_v38 }
 0x234   :  { %v5678_v16 = vperm.slane %v601_v4, %v5644_v58 }
 0x236   :  { %v636_v4 = vrot.slane %v5678_v16, 4 }
 0x237   :  { %433 = vrot.lane.b32.xlu0 %v5493_v14, %s5313_s30  ;;  %421 = vrot.lane.b32.xlu2 %v5493_v14, %s5315_s10 }
 0x238   :  { %409 = vrot.lane.b32.xlu1 %v5493_v14, %s5311_s13 }
 0x239   :  { %v5605_v40 = vpop.permute.xlu0 %353  ;;  %v5607_v41 = vpop.permute.xlu2 %413 }
 0x23a   :  { %v5609_v42 = vpop.permute.xlu1 %347  ;;  %v690_v51 = vrot.slane %v5605_v40, 4 }
 0x23b   :  { %v678_v62 = vrot.slane %v5609_v42, 4 }
 0x23d   :  { %v679_v45 = vsel %vm452_vm2, %v5567_v28, %v678_v62 }
 0x23e   :  { %v5707_v61 = vperm.slane %v679_v45, %v5644_v58  ;;  %v514_v45 = vrot.slane %v5667_v23, 4 }
 0x23f   :  { %439 = vrot.lane.b32.xlu2 %v5493_v14, %s5276_s23  ;;  %445 = vrot.lane.b32.xlu0 %v5611_v44, %s5286_s11 }
 0x240   :  { %427 = vrot.lane.b32.xlu1 %v5493_v14, %s5314_s7 }
 0x241   :  { %v5620_v18 = vpop.permute.xlu0 %371  ;;  %v5625_v47 = vpop.permute.xlu2 %431 }
 0x242   :  { %v5623_v46 = vpop.permute.xlu1 %365  ;;  %v702_v21 = vrot.slane %v5620_v18, 4 }
 0x243   :  { %v691_v56 = vsel %vm452_vm2, %v5623_v46, %v690_v51  ;;  %v589_v51 = vsel %vm452_vm2, %v588_v1, %v5543_v22  ;;  %v688_v5 = vrot.slane %v5623_v46, 4 }
 0x244   :  { %v5660_v7 = vperm.slane %v691_v56, %v5644_v58  ;;  %v478_v56 = vrot.slane %v5559_v27, 4  ;;  %v564_v27 = vrot.slane %v5583_v33, 4  ;;  %v5713_v1 = vperm.slane %v589_v51, %v5644_v58 }
 0x246   :  { %v736_v17 = vrot.slane %v5660_v7, 4  ;;  %v479_v38 = vsel %vm452_vm2, %v5515_v19, %v478_v56  ;;  %v5747_v19 = vperm.slane %v525_v11, %v5732_v43  ;;  %v637_v13 = vsel %vm452_vm2, %v636_v4, %v5713_v1 }
 0x248   :  { %447 = vrot.lane.b32.xlu1 %v5627_v48, %s5286_s11  ;;  %v737_v12 = vsel %vm452_vm2, %v736_v17, %v5707_v61  ;;  %v565_v17 = vsel %vm452_vm2, %v564_v27, %v5569_v29  ;;  %v676_v48 = vrot.slane %v5567_v28, 4  ;;  %v812_v28 = vrot.slane %v5625_v47, 4 }
 0x249   :  { %v5633_v52 = vpop.permute.xlu0 %389  ;;  %v5662_v8 = vpop.permute.xlu2 %259  ;;  %v5752_v56 = vperm.slane %v737_v12, %v5732_v43  ;;  %v5770_v11 = vperm.slane %v565_v17, %v5644_v58  ;;  %v5773_v12 = vperm.slane %v637_v13, %v5732_v43 }
 0x24a   :  { %v5635_v53 = vpop.permute.xlu1 %383  ;;  %v715_v63 = vsel %vm452_vm2, %v5633_v52, %v714_v55  ;;  %8585 = vst [vmem:[#allocation10_spill] sm:$0xff] %v5662_v8  ;;  %v5694_v55 = vperm.slane %v465_v34, %v5644_v58 }
 0x24b   :  { %v5673_v39 = vperm.slane %v715_v63, %v5644_v58  ;;  %v703_v10 = vsel %vm452_vm2, %v5635_v53, %v702_v21  ;;  %v490_v63 = vrot.slane %v5557_v26, 4  ;;  %v5727_v26 = vperm.slane %v453_v50, %v5644_v58  ;;  %8587 = vst [vmem:[#allocation12_spill] sm:$0xff] %v5752_v56 }
 0x24c   :  { %v5720_v15 = vperm.slane %v703_v10, %v5644_v58  ;;  %v500_v34 = vrot.slane %v5694_v55, 4  ;;  %v5736_v21 = vperm.slane %v467_v59, %v5644_v58  ;;  %v612_v10 = vrot.slane %v5717_v9, 4 }
 0x24d   :  { %v760_v62 = vrot.slane %v5673_v39, 4  ;;  %v491_v24 = vsel %vm452_vm2, %v5571_v30, %v490_v63  ;;  %v5755_v30 = vperm.slane %v479_v38, %v5644_v58  ;;  %v712_v59 = vrot.slane %v5633_v52, 4 }
 0x24e   :  { %v501_v63 = vsel %vm452_vm2, %v500_v34, %v5727_v26  ;;  %v5767_v4 = vperm.slane %v491_v24, %v5644_v58  ;;  %v515_v52 = vsel %vm452_vm2, %v5736_v21, %v514_v45  ;;  %v800_v38 = vrot.slane %v5607_v41, 4 }
 0x24f   :  { %v761_v50 = vsel %vm452_vm2, %v760_v62, %v5720_v15  ;;  %v548_v34 = vrot.slane %v5747_v19, 4  ;;  %v538_v24 = vrot.slane %v5755_v30, 4  ;;  %v713_v17 = vsel %vm452_vm2, %v712_v59, %v5579_v31 }
 0x250   :  { %v5764_v27 = vperm.slane %v761_v50, %v5732_v43  ;;  %v782_v50 = vrot.slane %v5752_v56, 4  ;;  %v5785_v6 = vperm.slane %v501_v63, %v5732_v43  ;;  %v613_v13 = vsel %vm452_vm2, %v612_v10, %v5770_v11 }
 0x251   :  { %v5683_v49 = vpop.permute.xlu0 %407  ;;  %v5740_v51 = vpop.permute.xlu2 %277  ;;  %v660_v31 = vrot.slane %v5773_v12, 4  ;;  %v5800_v59 = vperm.slane %v515_v52, %v5732_v43  ;;  %v689_v10 = vsel %vm452_vm2, %v688_v5, %v5605_v40  ;;  %v700_v63 = vrot.slane %v5635_v53, 4 }
 0x252   :  { %v5691_v54 = vpop.permute.xlu1 %401  ;;  %8586 = vst [vmem:[#allocation11_spill] sm:$0xff] %v5740_v51  ;;  %v788_v45 = vrot.slane %v5683_v49, 4  ;;  %v5795_v3 = vsel %vm452_vm2, %v5764_v27, %v782_v50  ;;  %v5813_v50 = vperm.slane %v713_v17, %v5644_v58  ;;  %v5821_v40 = vperm.slane %v613_v13, %v5732_v43 }
 0x253   :  { %8588 = vst [vmem:[#allocation13_spill] sm:$0xff] %v5764_v27  ;;  %v801_v46 = vsel %vm452_vm2, %v800_v38, %v5691_v54  ;;  %v802_v2 = vrot.slane %v5691_v54, 4  ;;  %v549_v54 = vsel %vm452_vm2, %v548_v34, %v5785_v6  ;;  %v539_v38 = vsel %vm452_vm2, %v5767_v4, %v538_v24 }
 0x254   :  { %8589 = vst [vmem:[#allocation14_spill] sm:$0xff] %v5795_v3  ;;  %v5816_v52 = vperm.slane %v801_v46, %v5644_v58  ;;  %v789_v53 = vsel %vm452_vm2, %v788_v45, %v5591_v35  ;;  %v790_v17 = vrot.slane %v5591_v35, 4  ;;  %v5829_v27 = vperm.slane %v689_v10, %v5644_v58 }
 0x255   :  { %v803_v34 = vsel %vm452_vm2, %v5607_v41, %v802_v2  ;;  %v1453_v46 = vsel %vm1452_vm1, %v549_v54, -inf  ;;  %v661_v51 = vsel %vm452_vm2, %v660_v31, %v5821_v40  ;;  %v701_v13 = vsel %vm452_vm2, %v700_v63, %v5620_v18 }
 0x256   :  { %v5841_v35 = vperm.slane %v789_v53, %v5644_v58  ;;  %v5844_v10 = vperm.slane %v803_v34, %v5644_v58  ;;  %v836_v54 = vrot.slane %v5816_v52, 4  ;;  %v677_v18 = vsel %vm452_vm2, %v676_v48, %v5609_v42 }
 0x257   :  { %v748_v63 = vrot.slane %v5813_v50, 4  ;;  %v791_v42 = vsel %vm452_vm2, %v5683_v49, %v790_v17 }
 0x259   :  { %v426_v57 = vpop.permute.xlu0 %425  ;;  %v5818_v3 = vpop.permute.xlu2 %295 }
 0x25a   :  { %v5759_v62 = vpop.permute.xlu1 %419  ;;  %8590 = vst [vmem:[#allocation15_spill] sm:$0xff] %v5818_v3  ;;  %v826_v24 = vrot.slane %v426_v57, 4 }
 0x25b   :  { %v813_v45 = vsel %vm452_vm2, %v812_v28, %v5759_v62  ;;  %v724_v28 = vrot.slane %v5829_v27, 4 }
 0x261   :  { %v5805_v44 = vpop.permute.xlu0 %271  ;;  %v5894_v8 = vpop.permute.xlu2 %313 }
 0x262   :  { %v438_v5 = vpop.permute.xlu1 %437  ;;  %8592 = vst [vmem:[#allocation17_spill] sm:$0xff] %v5894_v8 }
 0x263   :  { %v824_v56 = vrot.slane %v438_v5, 4  ;;  %v827_v41 = vsel %vm452_vm2, %v438_v5, %v826_v24  ;;  %v5857_v5 = vperm.slane %v813_v45, %v5644_v58  ;;  %v5864_v24 = vperm.slane %v701_v13, %v5644_v58 }
 0x264   :  { %v5860_v53 = vperm.slane %v827_v41, %v5644_v58  ;;  %v5875_v45 = vperm.slane %v677_v18, %v5644_v58  ;;  %v837_v13 = vsel %vm452_vm2, %v836_v54, %v5841_v35  ;;  %v5891_v18 = vperm.slane %v791_v42, %v5644_v58 }
 0x265   :  { %v825_v2 = vsel %vm452_vm2, %v824_v56, %v426_v57  ;;  %v814_v57 = vrot.slane %v5759_v62, 4  ;;  %v1456_v56 = vsel %vm1452_vm1, %v661_v51, -inf  ;;  %v550_v51 = vrot.slane %v5785_v6, 4 }
 0x266   :  { %v5848_v31 = vperm.slane %v825_v2, %v5644_v58  ;;  %v5872_v62 = vperm.slane %v539_v38, %v5732_v43  ;;  %v848_v2 = vrot.slane %v5844_v10, 4  ;;  %v562_v38 = vrot.slane %v5800_v59, 4 }
 0x267   :  { %v815_v17 = vsel %vm452_vm2, %v5625_v47, %v814_v57  ;;  %v749_v41 = vsel %vm452_vm2, %v748_v63, %v5864_v24  ;;  %v725_v54 = vsel %vm452_vm2, %v724_v28, %v5875_v45  ;;  %v551_v57 = vsel %vm452_vm2, %v5747_v19, %v550_v51 }
 0x268   :  { %v860_v34 = vrot.slane %v5848_v31, 4  ;;  %1454 = vmax.xlane.f32.xlu2 %v1453_v46  ;;  %v762_v63 = vrot.slane %v5720_v15, 4  ;;  %v823_v42 = vperm.slane %v815_v17, %v5644_v58  ;;  %v755_v3 = vperm.slane %v749_v41, %v5732_v43 }
 0x269   :  { %v5868_v48 = vpop.permute.xlu0 %289  ;;  %1457 = vmax.xlane.f32.xlu0 %v1456_v56  ;;  %v872_v56 = vrot.slane %v5860_v53, 4  ;;  %v849_v8 = vsel %vm452_vm2, %v848_v2, %v5891_v18  ;;  %v526_v28 = vrot.slane %v5704_v60, 4  ;;  %v1469_v51 = vsel %vm1452_vm1, %v551_v57, -inf }
 0x26a   :  { %8591 = vst [vmem:[#allocation16_spill] sm:$0xff] %v5868_v48  ;;  %v5878_v46 = vpop.permute.xlu1 %265  ;;  %v861_v49 = vsel %vm452_vm2, %v860_v34, %v5857_v5  ;;  %v843_v34 = vperm.slane %v837_v13, %v5732_v43  ;;  %v731_v48 = vperm.slane %v725_v54, %v5732_v43  ;;  %v5920_v60 = vperm.slane %v849_v8, %v5732_v43 }
 0x26b   :  { %v867_v6 = vperm.slane %v861_v49, %v5732_v43  ;;  %v563_v49 = vsel %vm452_vm2, %v5872_v62, %v562_v38  ;;  %v873_v38 = vsel %vm452_vm2, %v872_v56, %v823_v42  ;;  %v527_v2 = vsel %vm452_vm2, %v5654_v0, %v526_v28 }
 0x26c   :  { %v1559_v17 = vsel %vm1452_vm1, %v563_v49, -inf  ;;  %v772_v54 = vrot.slane %v755_v3, 4  ;;  %v502_v56 = vrot.slane %v5727_v26, 4  ;;  %v774_v57 = vrot.slane %v731_v48, 4  ;;  %v5940_v26 = vpop.permute.xlu2 %331 }
 0x26d   :  { %v884_v47 = vrot.slane %v867_v6, 4  ;;  %v5931_v49 = vperm.slane %v527_v2, %v5732_v43 }
 0x26e   :  { %v775_v0 = vsel %vm452_vm2, %v755_v3, %v774_v57  ;;  %v503_v3 = vsel %vm452_vm2, %v5694_v55, %v502_v56  ;;  %v874_v57 = vrot.slane %v823_v42, 4 }
 0x26f   :  { %v885_v13 = vsel %vm452_vm2, %v884_v47, %v843_v34  ;;  %v763_v47 = vsel %vm452_vm2, %v5673_v39, %v762_v63  ;;  %v738_v39 = vrot.slane %v5707_v61, 4  ;;  %v614_v63 = vrot.slane %v5770_v11, 4 }
 0x270   :  { %v1462_v19 = vsel %vm1452_vm1, %v885_v13, -inf  ;;  %v886_v13 = vrot.slane %v843_v34, 4  ;;  %v5936_v28 = vperm.slane %v763_v47, %v5732_v43  ;;  %v773_v34 = vsel %vm452_vm2, %v772_v54, %v731_v48 }
 0x271   :  { %1463 = vmax.xlane.f32.xlu2 %v1462_v19  ;;  %v5914_v15 = vpop.permute.xlu0 %307  ;;  %1470 = vmax.xlane.f32.xlu0 %v1469_v51  ;;  %v5928_v19 = vperm.slane %v873_v38, %v5732_v43  ;;  %v894_v51 = vrot.slane %v5920_v60, 4  ;;  %v638_v38 = vrot.slane %v5713_v1, 4  ;;  %v1475_v2 = vsel %vm1452_vm1, %v775_v0, -inf }
 0x272   :  { %v5922_v41 = vpop.permute.xlu1 %283  ;;  %1560 = vmax.xlane.f32.xlu1 %v1559_v17  ;;  %v887_v8 = vsel %vm452_vm2, %v867_v6, %v886_v13  ;;  %v850_v17 = vrot.slane %v5891_v18, 4  ;;  %v739_v48 = vsel %vm452_vm2, %v5660_v7, %v738_v39  ;;  %v1459_v1 = vsel %vm1452_vm1, %v773_v34, -inf }
 0x273   :  { %v5949_v6 = vsel %vm452_vm2, %v5928_v19, %v894_v51  ;;  %v1478_v61 = vsel %vm1452_vm1, %v887_v8, -inf  ;;  %v552_v11 = vrot.slane %v5931_v49, 4  ;;  %v784_v55 = vrot.slane %v5936_v28, 4 }
 0x274   :  { %v5964_v18 = vperm.slane %v503_v3, %v5732_v43  ;;  %v5967_v56 = vperm.slane %v739_v48, %v5732_v43  ;;  %v639_v7 = vsel %vm452_vm2, %v5678_v16, %v638_v38  ;;  %v662_v13 = vrot.slane %v5821_v40, 4  ;;  %v5992_v3 = vpop.permute.xlu2 %349 }
 0x275   :  { %v615_v0 = vsel %vm452_vm2, %v5717_v9, %v614_v63  ;;  %v851_v8 = vsel %vm452_vm2, %v5844_v10, %v850_v17  ;;  %v536_v34 = vrot.slane %v5767_v4, 4  ;;  %v647_v42 = vperm.slane %v639_v7, %v5732_v43 }
 0x276   :  { %v553_v51 = vsel %vm452_vm2, %v552_v11, %v5964_v18  ;;  %v785_v39 = vsel %vm452_vm2, %v784_v55, %v5967_v56  ;;  %v663_v16 = vsel %vm452_vm2, %v5773_v12, %v662_v13  ;;  %v875_v40 = vsel %vm452_vm2, %v5860_v53, %v874_v57 }
 0x277   :  { %v578_v9 = vrot.slane %v5523_v20, 4  ;;  %v602_v10 = vrot.slane %v5595_v37, 4  ;;  %v623_v63 = vperm.slane %v615_v0, %v5732_v43  ;;  %v5990_v38 = vperm.slane %v851_v8, %v5732_v43 }
 0x278   :  { %v1484_v4 = vsel %vm1452_vm1, %v553_v51, -inf  ;;  %v1550_v12 = vsel %vm1452_vm1, %v785_v39, -inf  ;;  %v1472_v20 = vsel %vm1452_vm1, %v663_v16, -inf  ;;  %v6000_v37 = vperm.slane %v875_v40, %v5732_v43 }
 0x279   :  { %1476 = vmax.xlane.f32.xlu2 %v1475_v2  ;;  %1479 = vmax.xlane.f32.xlu0 %v1478_v61  ;;  %v5959_v54 = vpop.permute.xlu0 %325  ;;  %v579_v17 = vsel %vm452_vm2, %v5581_v32, %v578_v9  ;;  %v664_v2 = vrot.slane %v647_v42, 4  ;;  %v537_v61 = vsel %vm452_vm2, %v536_v34, %v5755_v30  ;;  %v603_v48 = vsel %vm452_vm2, %v5555_v25, %v602_v10 }
 0x27a   :  { %v5961_v47 = vpop.permute.xlu1 %301  ;;  %1460 = vmax.xlane.f32.xlu1 %v1459_v1  ;;  %v666_v1 = vrot.slane %v623_v63, 4  ;;  %v898_v32 = vrot.slane %v5990_v38, 4  ;;  %v590_v11 = vrot.slane %v5543_v22, 4  ;;  %v512_v55 = vrot.slane %v5736_v21, 4 }
 0x27b   :  { %v587_v7 = vperm.slane %v579_v17, %v5644_v58  ;;  %v566_v13 = vrot.slane %v5569_v29, 4  ;;  %v543_v25 = vperm.slane %v537_v61, %v5732_v43  ;;  %v611_v22 = vperm.slane %v603_v48, %v5644_v58 }
 0x27c   :  { %v667_v0 = vsel %vm452_vm2, %v647_v42, %v666_v1  ;;  %v899_v30 = vsel %vm452_vm2, %v6000_v37, %v898_v32  ;;  %v591_v8 = vsel %vm452_vm2, %v5593_v36, %v590_v11  ;;  %v665_v21 = vsel %vm452_vm2, %v664_v2, %v623_v63  ;;  %v6032_v63 = vpop.permute.xlu2 %367 }
 0x27d   :  { %v567_v51 = vsel %vm452_vm2, %v5583_v33, %v566_v13  ;;  %v624_v39 = vrot.slane %v587_v7, 4  ;;  %v1502_v29 = vsel %vm1452_vm1, %v667_v0, -inf  ;;  %v1568_v34 = vsel %vm1452_vm1, %v899_v30, -inf }
 0x27e   :  { %v513_v16 = vsel %vm452_vm2, %v512_v55, %v5667_v23  ;;  %v599_v42 = vperm.slane %v591_v8, %v5644_v58  ;;  %v1487_v36 = vsel %vm1452_vm1, %v665_v21, -inf  ;;  %v556_v40 = vrot.slane %v543_v25, 4 }
 0x27f   :  { %v575_v9 = vperm.slane %v567_v51, %v5644_v58  ;;  %v648_v10 = vrot.slane %v611_v22, 4  ;;  %v554_v23 = vrot.slane %v5964_v18, 4  ;;  %v896_v8 = vrot.slane %v6000_v37, 4 }
 0x280   :  { %v726_v37 = vrot.slane %v5875_v45, 4 }
 0x281   :  { %1485 = vmax.xlane.f32.xlu2 %v1484_v4  ;;  %1551 = vmax.xlane.f32.xlu0 %v1550_v12  ;;  %v6012_v57 = vpop.permute.xlu0 %343  ;;  %v786_v4 = vrot.slane %v5967_v56, 4  ;;  %v519_v12 = vperm.slane %v513_v16, %v5732_v43  ;;  %v625_v17 = vsel %vm452_vm2, %v624_v39, %v575_v9  ;;  %v626_v48 = vrot.slane %v575_v9, 4 }
 0x282   :  { %v6002_v53 = vpop.permute.xlu1 %319  ;;  %1473 = vmax.xlane.f32.xlu1 %v1472_v20  ;;  %v650_v20 = vrot.slane %v599_v42, 4  ;;  %v555_v32 = vsel %vm452_vm2, %v5931_v49, %v554_v23  ;;  %v649_v56 = vsel %vm452_vm2, %v648_v10, %v599_v42  ;;  %v631_v11 = vperm.slane %v625_v17, %v5732_v43 }
 0x283   :  { %v787_v2 = vsel %vm452_vm2, %v5936_v28, %v786_v4  ;;  %v557_v61 = vsel %vm452_vm2, %v556_v40, %v519_v12  ;;  %v1499_v28 = vsel %vm1452_vm1, %v555_v32, -inf  ;;  %v655_v13 = vperm.slane %v649_v56, %v5732_v43 }
 0x284   :  { %v1565_v18 = vsel %vm1452_vm1, %v787_v2, -inf  ;;  %v1514_v55 = vsel %vm1452_vm1, %v557_v61, -inf  ;;  %v651_v0 = vsel %vm452_vm2, %v611_v22, %v650_v20  ;;  %v558_v49 = vrot.slane %v519_v12, 4  ;;  %v6058_v39 = vpop.permute.xlu2 %385 }
 0x285   :  { %v627_v21 = vsel %vm452_vm2, %v587_v7, %v626_v48  ;;  %v670_v51 = vrot.slane %v631_v11, 4  ;;  %v750_v16 = vrot.slane %v5864_v24, 4  ;;  %v560_v40 = vrot.slane %v5872_v62, 4 }
 0x286   :  { %v635_v22 = vperm.slane %v627_v21, %v5732_v43  ;;  %v862_v9 = vrot.slane %v5857_v5, 4  ;;  %v668_v24 = vrot.slane %v655_v13, 4  ;;  %v727_v45 = vsel %vm452_vm2, %v5829_v27, %v726_v37 }
 0x287   :  { %v671_v42 = vsel %vm452_vm2, %v655_v13, %v670_v51  ;;  %v838_v62 = vrot.slane %v5841_v35, 4  ;;  %v561_v2 = vsel %vm452_vm2, %v560_v40, %v5800_v59  ;;  %v735_v27 = vperm.slane %v727_v45, %v5732_v43 }
 0x288   :  { %v1532_v10 = vsel %vm1452_vm1, %v671_v42, -inf  ;;  %v674_v23 = vrot.slane %v635_v22, 4  ;;  %v863_v17 = vsel %vm452_vm2, %v5848_v31, %v862_v9  ;;  %v669_v61 = vsel %vm452_vm2, %v668_v24, %v631_v11 }
 0x289   :  { %1503 = vmax.xlane.f32.xlu2 %v1502_v29  ;;  %1569 = vmax.xlane.f32.xlu0 %v1568_v34  ;;  %v6043_v1 = vpop.permute.xlu0 %361  ;;  %v559_v29 = vsel %vm452_vm2, %v543_v25, %v558_v49  ;;  %v659_v34 = vperm.slane %v651_v0, %v5732_v43  ;;  %v952_v35 = vrot.slane %v5878_v46, 4  ;;  %v6093_v32 = vperm.slane %v863_v17, %v5732_v43  ;;  %v8593_v49 = vld [vmem:[#allocation16_spill] sm:$0xff] }
 0x28a   :  { %v6034_v33 = vpop.permute.xlu1 %337  ;;  %1488 = vmax.xlane.f32.xlu1 %v1487_v36  ;;  %v897_v36 = vsel %vm452_vm2, %v896_v8, %v5990_v38  ;;  %v1529_v7 = vsel %vm1452_vm1, %v559_v29, -inf  ;;  %v751_v38 = vsel %vm452_vm2, %v5813_v50, %v750_v16  ;;  %v954_v31 = vrot.slane %v5493_v14, 4 }
 0x28b   :  { %v672_v4 = vrot.slane %v659_v34, 4  ;;  %v1553_v12 = vsel %vm1452_vm1, %v897_v36, -inf  ;;  %v675_v20 = vsel %vm452_vm2, %v659_v34, %v674_v23  ;;  %v759_v48 = vperm.slane %v751_v38, %v5732_v43  ;;  %v8594_v34 = vld [vmem:[#allocation15_spill] sm:$0xff]  ;;  %v8595_v36 = vld [vmem:[#allocation10_spill] sm:$0xff] }
 0x28c   :  { %v1100_v56 = vrot.slane %v6012_v57, 4  ;;  %v1544_v59 = vsel %vm1452_vm1, %v561_v2, -inf  ;;  %v839_v11 = vsel %vm452_vm2, %v5816_v52, %v838_v62  ;;  %v1517_v13 = vsel %vm1452_vm1, %v669_v61, -inf }
 0x28d   :  { %v673_v50 = vsel %vm452_vm2, %v672_v4, %v635_v22  ;;  %v976_v8 = vrot.slane %v8593_v49, 4  ;;  %v1088_v21 = vrot.slane %v6034_v33, 4  ;;  %v776_v51 = vrot.slane %v759_v48, 4 }
 0x28e   :  { %v1547_v0 = vsel %vm1452_vm1, %v673_v50, -inf  ;;  %v778_v29 = vrot.slane %v735_v27, 4  ;;  %v988_v16 = vrot.slane %v8594_v34, 4  ;;  %v953_v42 = vsel %vm452_vm2, %v952_v35, %v5493_v14  ;;  %v8596_v14 = vld [vmem:[#allocation11_spill] sm:$0xff] }
 0x28f   :  { %v847_v52 = vperm.slane %v839_v11, %v5732_v43  ;;  %v888_v22 = vrot.slane %v6093_v32, 4  ;;  %v966_v37 = vrot.slane %v8595_v36, 4  ;;  %v1101_v40 = vsel %vm452_vm2, %v1100_v56, %v5940_v26 }
 0x290   :  { %v1076_v9 = vrot.slane %v6002_v53, 4  ;;  %v978_v4 = vrot.slane %v8596_v14, 4  ;;  %v989_v23 = vsel %vm452_vm2, %v988_v16, %v5922_v41  ;;  %v977_v45 = vsel %vm452_vm2, %v976_v8, %v8596_v14 }
 0x291   :  { %1566 = vmax.xlane.f32.xlu2 %v1565_v18  ;;  %1515 = vmax.xlane.f32.xlu0 %v1514_v55  ;;  %v6071_v25 = vpop.permute.xlu0 %379  ;;  %v6097_v18 = vpop.permute.xlu2 %403  ;;  %v964_v55 = vrot.slane %v5805_v44, 4  ;;  %v959_v38 = vperm.slane %v953_v42, %v5644_v58  ;;  %v1089_v62 = vsel %vm452_vm2, %v1088_v21, %v5959_v54  ;;  %v777_v17 = vsel %vm452_vm2, %v776_v51, %v735_v27 }
 0x292   :  { %v6054_v30 = vpop.permute.xlu1 %355  ;;  %1500 = vmax.xlane.f32.xlu1 %v1499_v28  ;;  %v1562_v28 = vsel %vm1452_vm1, %v675_v20, -inf  ;;  %v6139_v2 = vperm.slane %v1101_v40, %v5644_v58  ;;  %v889_v61 = vsel %vm452_vm2, %v888_v22, %v847_v52  ;;  %v890_v50 = vrot.slane %v847_v52, 4 }
 0x293   :  { %v995_v35 = vperm.slane %v989_v23, %v5644_v58  ;;  %v983_v27 = vperm.slane %v977_v45, %v5644_v58  ;;  %v1490_v11 = vsel %vm1452_vm1, %v777_v17, -inf  ;;  %v979_v8 = vsel %vm452_vm2, %v8593_v49, %v978_v4 }
 0x294   :  { %v1002_v21 = vrot.slane %v959_v38, 4  ;;  %v990_v42 = vrot.slane %v5922_v41, 4  ;;  %v1136_v52 = vrot.slane %v6139_v2, 4  ;;  %v892_v40 = vrot.slane %v5928_v19, 4 }
 0x295   :  { %v1024_v49 = vrot.slane %v995_v35, 4  ;;  %v6174_v41 = vperm.slane %v979_v8, %v5644_v58  ;;  %v1026_v14 = vrot.slane %v983_v27, 4  ;;  %v891_v17 = vsel %vm452_vm2, %v6093_v32, %v890_v50  ;;  %v8599_v32 = vld [vmem:[#allocation12_spill] sm:$0xff] }
 0x296   :  { %v991_v45 = vsel %vm452_vm2, %v8594_v34, %v990_v42  ;;  %v1508_v8 = vsel %vm1452_vm1, %v891_v17, -inf }
 0x297   :  { %v1038_v42 = vrot.slane %v6174_v41, 4 }
 0x299   :  { %1530 = vmax.xlane.f32.xlu2 %v1529_v7  ;;  %1533 = vmax.xlane.f32.xlu0 %v1532_v10  ;;  %v955_v7 = vsel %vm452_vm2, %v5878_v46, %v954_v31  ;;  %v6119_v10 = vpop.permute.xlu0 %397  ;;  %v779_v46 = vsel %vm452_vm2, %v759_v48, %v778_v29  ;;  %v1077_v31 = vsel %vm452_vm2, %v1076_v9, %v5914_v15  ;;  %v6157_v51 = vpop.permute.xlu2 %421  ;;  %v1493_v29 = vsel %vm1452_vm1, %v889_v61, -inf }
 0x29a   :  { %v6080_v5 = vpop.permute.xlu1 %373  ;;  %1554 = vmax.xlane.f32.xlu1 %v1553_v12  ;;  %v965_v12 = vsel %vm452_vm2, %v964_v55, %v8595_v36  ;;  %v6136_v20 = vperm.slane %v955_v7, %v5644_v58  ;;  %v1505_v56 = vsel %vm1452_vm1, %v779_v46, -inf  ;;  %v8597_v55 = vld [vmem:[#allocation13_spill] sm:$0xff]  ;;  %v6164_v22 = vperm.slane %v1077_v31, %v5644_v58 }
 0x29b   :  { %v971_v48 = vperm.slane %v965_v12, %v5644_v58  ;;  %v8598_v36 = vld [vmem:[#allocation17_spill] sm:$0xff]  ;;  %v893_v31 = vsel %vm452_vm2, %v892_v40, %v5920_v60  ;;  %v6209_v60 = vperm.slane %v991_v45, %v5644_v58 }
 0x29c   :  { %v1014_v16 = vrot.slane %v6136_v20, 4 }
 0x29d   :  { %v1003_v19 = vsel %vm452_vm2, %v971_v48, %v1002_v21  ;;  %v1523_v21 = vsel %vm1452_vm1, %v893_v31, -inf }
 0x2a1   :  { %1563 = vmax.xlane.f32.xlu2 %v1562_v28  ;;  %1545 = vmax.xlane.f32.xlu0 %v1544_v59  ;;  %v6149_v59 = vperm.slane %v1089_v62, %v5644_v58  ;;  %v780_v28 = vrot.slane %v8597_v55, 4  ;;  %v6180_v23 = vpop.permute.xlu0 %415  ;;  %v1112_v62 = vrot.slane %v6164_v22, 4 }
 0x2a2   :  { %v6121_v24 = vpop.permute.xlu1 %391  ;;  %1518 = vmax.xlane.f32.xlu1 %v1517_v13  ;;  %v967_v13 = vsel %vm452_vm2, %v5805_v44, %v966_v37  ;;  %v1000_v44 = vrot.slane %v971_v48, 4  ;;  %v1064_v37 = vrot.slane %v8598_v36, 4  ;;  %v1027_v48 = vsel %vm452_vm2, %v995_v35, %v1026_v14 }
 0x2a3   :  { %v6171_v9 = vperm.slane %v967_v13, %v5644_v58  ;;  %v1137_v4 = vsel %vm452_vm2, %v1136_v52, %v6149_v59  ;;  %v1212_v46 = vrot.slane %v6121_v24, 4  ;;  %v781_v50 = vsel %vm452_vm2, %v780_v28, %v8599_v32 }
 0x2a4   :  { %v1065_v12 = vsel %vm452_vm2, %v1064_v37, %v5961_v47  ;;  %v1011_v13 = vperm.slane %v1003_v19, %v5732_v43  ;;  %v1102_v52 = vrot.slane %v5940_v26, 4  ;;  %v1039_v19 = vsel %vm452_vm2, %v6209_v60, %v1038_v42 }
 0x2a5   :  { %v1015_v61 = vsel %vm452_vm2, %v6171_v9, %v1014_v16  ;;  %v6200_v34 = vperm.slane %v1065_v12, %v5644_v58  ;;  %v1035_v16 = vperm.slane %v1027_v48, %v5732_v43  ;;  %v1188_v12 = vrot.slane %v6032_v63, 4 }
 0x2a6   :  { %v6215_v35 = vperm.slane %v1015_v61, %v5732_v43  ;;  %v1176_v42 = vrot.slane %v6043_v1, 4 }
 0x2a7   :  { %v1113_v28 = vsel %vm452_vm2, %v1112_v62, %v6200_v34  ;;  %v1189_v61 = vsel %vm452_vm2, %v1188_v12, %v6054_v30  ;;  %v1052_v32 = vrot.slane %v1035_v16, 4 }
 0x2a8   :  { %v1062_v62 = vrot.slane %v6215_v35, 4 }
 0x2a9   :  { %1491 = vmax.xlane.f32.xlu2 %v1490_v11  ;;  %1494 = vmax.xlane.f32.xlu0 %v1493_v29  ;;  %v1025_v11 = vsel %vm452_vm2, %v1024_v49, %v983_v27  ;;  %v1213_v27 = vsel %vm452_vm2, %v1212_v46, %v6071_v25  ;;  %v1078_v49 = vrot.slane %v5914_v15, 4  ;;  %v1200_v46 = vrot.slane %v6058_v39, 4 }
 0x2aa   :  { %v6167_v7 = vpop.permute.xlu1 %409  ;;  %1548 = vmax.xlane.f32.xlu1 %v1547_v0  ;;  %v1001_v0 = vsel %vm452_vm2, %v1000_v44, %v959_v38  ;;  %v6196_v38 = vperm.slane %v1137_v4, %v5732_v43  ;;  %v6219_v29 = vperm.slane %v1025_v11, %v5732_v43  ;;  %v6226_v44 = vpop.permute.xlu2 %439  ;;  %v6232_v40 = vperm.slane %v1213_v27, %v5644_v58 }
 0x2ab   :  { %v6203_v55 = vperm.slane %v1001_v0, %v5732_v43  ;;  %v1054_v4 = vrot.slane %v1011_v13, 4  ;;  %v6240_v0 = vperm.slane %v1113_v28, %v5732_v43  ;;  %v1324_v15 = vrot.slane %v6226_v44, 4  ;;  %v6253_v11 = vpop.permute.xlu0 %433 }
 0x2ac   :  { %v1160_v37 = vrot.slane %v6196_v38, 4  ;;  %v1201_v31 = vsel %vm452_vm2, %v1200_v46, %v6080_v5  ;;  %v1248_v27 = vrot.slane %v6232_v40, 4  ;;  %v1103_v28 = vsel %vm452_vm2, %v6012_v57, %v1102_v52 }
 0x2ad   :  { %v1050_v14 = vrot.slane %v6203_v55, 4  ;;  %v1055_v17 = vsel %vm452_vm2, %v1035_v16, %v1054_v4  ;;  %v6270_v16 = vperm.slane %v1189_v61, %v5644_v58  ;;  %v1312_v4 = vrot.slane %v6253_v11, 4 }
 0x2ae   :  { %v1161_v48 = vsel %vm452_vm2, %v1160_v37, %v6240_v0  ;;  %v1619_v37 = vsel %vm1452_vm1, %v1055_v17, -inf  ;;  %v1066_v57 = vrot.slane %v5961_v47, 4  ;;  %v1114_v52 = vrot.slane %v6200_v34, 4 }
 0x2af   :  { %v1051_v45 = vsel %vm452_vm2, %v6219_v29, %v1050_v14  ;;  %v1577_v12 = vsel %vm1452_vm1, %v1161_v48, -inf  ;;  %v1138_v46 = vrot.slane %v6149_v59, 4  ;;  %v6290_v47 = vperm.slane %v1103_v28, %v5644_v58 }
 0x2b0   :  { %v1589_v14 = vsel %vm1452_vm1, %v1051_v45, -inf  ;;  %v1053_v45 = vsel %vm452_vm2, %v1052_v32, %v1011_v13  ;;  %v1177_v59 = vsel %vm452_vm2, %v1176_v42, %v5992_v3  ;;  %v1115_v61 = vsel %vm452_vm2, %v6164_v22, %v1114_v52 }
 0x2b1   :  { %1506 = vmax.xlane.f32.xlu2 %v1505_v56  ;;  %1509 = vmax.xlane.f32.xlu0 %v1508_v8  ;;  %v1520_v56 = vsel %vm1452_vm1, %v781_v50, -inf  ;;  %v1090_v50 = vrot.slane %v5959_v54, 4  ;;  %v6273_v54 = vperm.slane %v1201_v31, %v5644_v58  ;;  %v1079_v13 = vsel %vm452_vm2, %v6002_v53, %v1078_v49 }
 0x2b2   :  { %1524 = vmax.xlane.f32.xlu1 %v1523_v21  ;;  %v6237_v26 = vpop.permute.xlu1 %427  ;;  %v6262_v21 = vperm.slane %v1039_v19, %v5732_v43  ;;  %v1313_v31 = vsel %vm452_vm2, %v1312_v4, %v6157_v51  ;;  %v1288_v48 = vrot.slane %v6167_v7, 4  ;;  %v6312_v22 = vperm.slane %v1177_v59, %v5644_v58 }
 0x2b3   :  { %v1325_v8 = vsel %vm452_vm2, %v1324_v15, %v6237_v26  ;;  %v1300_v15 = vrot.slane %v6180_v23, 4  ;;  %v1091_v34 = vsel %vm452_vm2, %v6034_v33, %v1090_v50  ;;  %v1139_v33 = vsel %vm452_vm2, %v6139_v2, %v1138_v46 }
 0x2b4   :  { %v6281_v19 = vperm.slane %v1325_v8, %v5644_v58  ;;  %v1063_v17 = vsel %vm452_vm2, %v6262_v21, %v1062_v62  ;;  %v1224_v62 = vrot.slane %v6270_v16, 4  ;;  %v6315_v53 = vperm.slane %v1091_v34, %v5644_v58 }
 0x2b5   :  { %v1301_v49 = vsel %vm452_vm2, %v1300_v15, %v6097_v18  ;;  %v6320_v8 = vperm.slane %v1115_v61, %v5732_v43  ;;  %v6323_v28 = vperm.slane %v1079_v13, %v5644_v58  ;;  %v1319_v2 = vperm.slane %v1313_v31, %v5644_v58 }
 0x2b6   :  { %v1360_v32 = vrot.slane %v6281_v19, 4  ;;  %v1679_v42 = vsel %vm1452_vm1, %v1063_v17, -inf  ;;  %v1148_v4 = vrot.slane %v6290_v47, 4  ;;  %v1147_v52 = vperm.slane %v1139_v33, %v5732_v43 }
 0x2b7   :  { %v1225_v46 = vsel %vm452_vm2, %v1224_v62, %v6312_v22  ;;  %v6335_v15 = vperm.slane %v1301_v49, %v5644_v58  ;;  %v1166_v17 = vrot.slane %v6320_v8, 4  ;;  %v1067_v59 = vsel %vm452_vm2, %v8598_v36, %v1066_v57 }
 0x2b8   :  { %v1231_v61 = vperm.slane %v1225_v46, %v5732_v43  ;;  %v1124_v13 = vrot.slane %v6323_v28, 4  ;;  %v6357_v57 = vperm.slane %v1067_v59, %v5644_v58  ;;  %v1036_v46 = vrot.slane %v6209_v60, 4 }
 0x2b9   :  { %1590 = vmax.xlane.f32.xlu2 %v1589_v14  ;;  %1521 = vmax.xlane.f32.xlu0 %v1520_v56  ;;  %v1249_v56 = vsel %vm452_vm2, %v1248_v27, %v6273_v54  ;;  %v1604_v27 = vsel %vm1452_vm1, %v1053_v45, -inf  ;;  %v1048_v14 = vrot.slane %v6219_v29, 4  ;;  %v1361_v29 = vsel %vm452_vm2, %v1360_v32, %v1319_v2 }
 0x2ba   :  { %1578 = vmax.xlane.f32.xlu1 %v1577_v12  ;;  %v6309_v50 = vperm.slane %v1249_v56, %v5732_v43  ;;  %v1289_v12 = vsel %vm452_vm2, %v1288_v48, %v6119_v10  ;;  %v1149_v56 = vsel %vm452_vm2, %v1148_v4, %v6315_v53  ;;  %v6351_v31 = vperm.slane %v1361_v29, %v5732_v43 }
 0x2bb   :  { %v1295_v34 = vperm.slane %v1289_v12, %v5644_v58  ;;  %v1049_v62 = vsel %vm452_vm2, %v1048_v14, %v6203_v55  ;;  %v1336_v48 = vrot.slane %v6335_v15, 4  ;;  %v1155_v36 = vperm.slane %v1149_v56, %v5732_v43 }
 0x2bc   :  { %v1272_v45 = vrot.slane %v6309_v50, 4  ;;  %v1574_v33 = vsel %vm1452_vm1, %v1049_v62, -inf  ;;  %v1125_v14 = vsel %vm452_vm2, %v1124_v13, %v6357_v57  ;;  %v1012_v12 = vrot.slane %v6171_v9, 4 }
 0x2bd   :  { %v1337_v49 = vsel %vm452_vm2, %v1336_v48, %v1295_v34  ;;  %v1168_v4 = vrot.slane %v1155_v36, 4  ;;  %v1162_v29 = vrot.slane %v6240_v0, 4  ;;  %v1037_v60 = vsel %vm452_vm2, %v1036_v46, %v6174_v41  ;;  %v6389_v41 = vpop.permute.xlu0 %445 }
 0x2be   :  { %v1273_v32 = vsel %vm452_vm2, %v1272_v45, %v1231_v61  ;;  %v6369_v45 = vperm.slane %v1337_v49, %v5732_v43  ;;  %v1013_v13 = vsel %vm452_vm2, %v1012_v12, %v6136_v20  ;;  %v1362_v48 = vrot.slane %v1319_v2, 4 }
 0x2bf   :  { %v1580_v55 = vsel %vm1452_vm1, %v1273_v32, -inf  ;;  %v1163_v59 = vsel %vm452_vm2, %v6196_v38, %v1162_v29  ;;  %v1019_v62 = vperm.slane %v1013_v13, %v5732_v43  ;;  %v1164_v38 = vrot.slane %v1147_v52, 4 }
 0x2c0   :  { %v1592_v0 = vsel %vm1452_vm1, %v1163_v59, -inf  ;;  %v1043_v20 = vperm.slane %v1037_v60, %v5732_v43  ;;  %v1226_v12 = vrot.slane %v6312_v22, 4  ;;  %v1250_v60 = vrot.slane %v6273_v54, 4 }
 0x2c1   :  { %1605 = vmax.xlane.f32.xlu2 %v1604_v27  ;;  %1680 = vmax.xlane.f32.xlu0 %v1679_v42  ;;  %v1384_v42 = vrot.slane %v6351_v31, 4  ;;  %v1058_v49 = vrot.slane %v1019_v62, 4  ;;  %v1165_v2 = vsel %vm452_vm2, %v1164_v38, %v6320_v8  ;;  %v1126_v54 = vrot.slane %v6357_v57, 4 }
 0x2c2   :  { %1620 = vmax.xlane.f32.xlu1 %v1619_v37  ;;  %v1167_v37 = vsel %vm452_vm2, %v1147_v52, %v1166_v17  ;;  %v1131_v17 = vperm.slane %v1125_v14, %v5732_v43  ;;  %v1227_v22 = vsel %vm452_vm2, %v6270_v16, %v1226_v12  ;;  %v1150_v16 = vrot.slane %v6315_v53, 4 }
 0x2c3   :  { %v1622_v27 = vsel %vm1452_vm1, %v1167_v37, -inf  ;;  %v1385_v56 = vsel %vm452_vm2, %v1384_v42, %v6369_v45  ;;  %v1059_v14 = vsel %vm452_vm2, %v1043_v20, %v1058_v49  ;;  %v1190_v38 = vrot.slane %v6054_v30, 4 }
 0x2c4   :  { %v1169_v9 = vsel %vm452_vm2, %v1168_v4, %v1131_v17  ;;  %v1583_v37 = vsel %vm1452_vm1, %v1385_v56, -inf  ;;  %v1607_v4 = vsel %vm1452_vm1, %v1165_v2, -inf  ;;  %v1170_v29 = vrot.slane %v1131_v17, 4 }
 0x2c5   :  { %v1637_v32 = vsel %vm1452_vm1, %v1169_v9, -inf  ;;  %v1214_v9 = vrot.slane %v6071_v25, 4  ;;  %v1251_v25 = vsel %vm452_vm2, %v6232_v40, %v1250_v60  ;;  %v1326_v57 = vrot.slane %v6237_v26, 4 }
 0x2c6   :  { %v1127_v53 = vsel %vm452_vm2, %v6323_v28, %v1126_v54  ;;  %v1151_v28 = vsel %vm452_vm2, %v6290_v47, %v1150_v16  ;;  %v1290_v16 = vrot.slane %v6119_v10, 4 }
 0x2c7   :  { %v1159_v47 = vperm.slane %v1151_v28, %v5732_v43 }
 0x2c9   :  { %1623 = vmax.xlane.f32.xlu2 %v1622_v27  ;;  %1575 = vmax.xlane.f32.xlu0 %v1574_v33  ;;  %v1274_v27 = vrot.slane %v1231_v61, 4  ;;  %v1363_v33 = vsel %vm452_vm2, %v6281_v19, %v1362_v48  ;;  %v1056_v19 = vrot.slane %v1043_v20, 4  ;;  %v1202_v20 = vrot.slane %v6080_v5, 4 }
 0x2ca   :  { %1581 = vmax.xlane.f32.xlu1 %v1580_v55  ;;  %v1338_v55 = vrot.slane %v1295_v34, 4  ;;  %v6397_v52 = vperm.slane %v1363_v33, %v5732_v43  ;;  %v1649_v34 = vsel %vm1452_vm1, %v1059_v14, -inf }
 0x2cb   :  { %v1275_v42 = vsel %vm452_vm2, %v6309_v50, %v1274_v27  ;;  %v1057_v59 = vsel %vm452_vm2, %v1056_v19, %v1019_v62  ;;  %v1060_v62 = vrot.slane %v6262_v21, 4  ;;  %v1259_v21 = vperm.slane %v1251_v25, %v5732_v43 }
 0x2cc   :  { %v1595_v61 = vsel %vm1452_vm1, %v1275_v42, -inf  ;;  %v1339_v50 = vsel %vm452_vm2, %v6335_v15, %v1338_v55  ;;  %v1388_v8 = vrot.slane %v6397_v52, 4  ;;  %v6416_v15 = vpop.permute.xlu1 %447  ;;  %v1386_v27 = vrot.slane %v6369_v45, 4 }
 0x2cd   :  { %v6412_v13 = vperm.slane %v1339_v50, %v5732_v43  ;;  %v1061_v33 = vsel %vm452_vm2, %v1060_v62, %v6215_v35  ;;  %v1191_v55 = vsel %vm452_vm2, %v6032_v63, %v1190_v38  ;;  %v1203_v42 = vsel %vm452_vm2, %v6058_v39, %v1202_v20 }
 0x2ce   :  { %v1387_v45 = vsel %vm452_vm2, %v6351_v31, %v1386_v27  ;;  %v1135_v35 = vperm.slane %v1127_v53, %v5732_v43  ;;  %v1327_v63 = vsel %vm452_vm2, %v6226_v44, %v1326_v57  ;;  %v6467_v39 = vperm.slane %v1191_v55, %v5644_v58 }
 0x2cf   :  { %v1389_v17 = vsel %vm452_vm2, %v1388_v8, %v6412_v13  ;;  %v1598_v31 = vsel %vm1452_vm1, %v1387_v45, -inf  ;;  %v1178_v19 = vrot.slane %v5992_v3, 4  ;;  %v1276_v50 = vrot.slane %v1259_v21, 4 }
 0x2d0   :  { %v6475_v44 = vperm.slane %v1327_v63, %v5644_v58  ;;  %v1174_v8 = vrot.slane %v1135_v35, 4  ;;  %v1314_v3 = vrot.slane %v6157_v51, 4  ;;  %v1390_v60 = vrot.slane %v6412_v13, 4 }
 0x2d1   :  { %1584 = vmax.xlane.f32.xlu2 %v1583_v37  ;;  %1593 = vmax.xlane.f32.xlu0 %v1592_v0  ;;  %v1171_v37 = vsel %vm452_vm2, %v1155_v36, %v1170_v29  ;;  %v1215_v0 = vsel %vm452_vm2, %v6121_v24, %v1214_v9  ;;  %v1634_v36 = vsel %vm1452_vm1, %v1057_v59, -inf  ;;  %v1613_v24 = vsel %vm1452_vm1, %v1389_v17, -inf  ;;  %v8600_v29 = vld [vmem:[#allocation8_spill] sm:$0xff] }
 0x2d2   :  { %1638 = vmax.xlane.f32.xlu1 %v1637_v32  ;;  %v1652_v48 = vsel %vm1452_vm1, %v1171_v37, -inf  ;;  %v1235_v32 = vperm.slane %v1227_v22, %v5732_v43  ;;  %v6437_v40 = vperm.slane %v1215_v0, %v5644_v58  ;;  %v6480_v59 = vperm.slane %v8600_v29, %v5644_v58 }
 0x2d3   :  { %v1179_v9 = vsel %vm452_vm2, %v6043_v1, %v1178_v19  ;;  %v1302_v37 = vrot.slane %v6097_v18, 4  ;;  %v1236_v22 = vrot.slane %v6467_v39, 4  ;;  %v1175_v62 = vsel %vm452_vm2, %v1159_v47, %v1174_v8 }
 0x2d4   :  { %v1278_v49 = vrot.slane %v1235_v32, 4  ;;  %v1260_v2 = vrot.slane %v6437_v40, 4  ;;  %v1315_v25 = vsel %vm452_vm2, %v6253_v11, %v1314_v3  ;;  %v1391_v1 = vsel %vm452_vm2, %v6397_v52, %v1390_v60 }
 0x2d5   :  { %v1277_v51 = vsel %vm452_vm2, %v1276_v50, %v1235_v32  ;;  %v1187_v13 = vperm.slane %v1179_v9, %v5644_v58  ;;  %v1303_v11 = vsel %vm452_vm2, %v6180_v23, %v1302_v37  ;;  %v1682_v38 = vsel %vm1452_vm1, %v1175_v62, -inf }
 0x2d6   :  { %v1279_v14 = vsel %vm452_vm2, %v1259_v21, %v1278_v49  ;;  %v922_v52 = vrot.slane %v6480_v59, 4  ;;  %v1323_v32 = vperm.slane %v1315_v25, %v5644_v58  ;;  %v1628_v20 = vsel %vm1452_vm1, %v1391_v1, -inf }
 0x2d7   :  { %v1237_v21 = vsel %vm452_vm2, %v1236_v22, %v1187_v13  ;;  %v1291_v27 = vsel %vm452_vm2, %v6167_v7, %v1290_v16  ;;  %v1172_v23 = vrot.slane %v1159_v47, 4  ;;  %v1311_v53 = vperm.slane %v1303_v11, %v5644_v58 }
 0x2d8   :  { %v1243_v55 = vperm.slane %v1237_v21, %v5732_v43  ;;  %v1299_v45 = vperm.slane %v1291_v27, %v5644_v58  ;;  %v1238_v47 = vrot.slane %v1187_v13, 4  ;;  %v1374_v19 = vrot.slane %v1323_v32, 4 }
 0x2d9   :  { %1596 = vmax.xlane.f32.xlu2 %v1595_v61  ;;  %1608 = vmax.xlane.f32.xlu0 %v1607_v4  ;;  %v1664_v61 = vsel %vm1452_vm1, %v1061_v33, -inf  ;;  %v1211_v4 = vperm.slane %v1203_v42, %v5644_v58  ;;  %v1173_v63 = vsel %vm452_vm2, %v1172_v23, %v1135_v35  ;;  %v900_v25 = vrot.slane %v8600_v29, 4 }
 0x2da   :  { %1650 = vmax.xlane.f32.xlu1 %v1649_v34  ;;  %v1625_v34 = vsel %vm1452_vm1, %v1279_v14, -inf  ;;  %v1667_v50 = vsel %vm1452_vm1, %v1173_v63, -inf  ;;  %v1239_v3 = vsel %vm452_vm2, %v6467_v39, %v1238_v47  ;;  %v1375_v37 = vsel %vm452_vm2, %v6475_v44, %v1374_v19 }
 0x2db   :  { %v6406_v46 = vpop.xlane.xlu2 %1454  ;;  %v1261_v12 = vsel %vm452_vm2, %v1260_v2, %v1211_v4  ;;  %v1262_v57 = vrot.slane %v1211_v4, 4  ;;  %v1282_v22 = vrot.slane %v1243_v55, 4  ;;  %v1247_v13 = vperm.slane %v1239_v3, %v5732_v43 }
 0x2dc   :  { %v6408_v56 = vpop.xlane.xlu0 %1457  ;;  %v1267_v18 = vperm.slane %v1261_v12, %v5732_v43  ;;  %v1350_v12 = vrot.slane %v1299_v45, 4  ;;  %v8601_v21 = vmov 0.0  }
 0x2dd   :  { %v1263_v42 = vsel %vm452_vm2, %v6437_v40, %v1262_v57  ;;  %1697 = vst.msk [vmem:[#allocation3] sm:$0xff] %vm1696_vm4, %v8601_v21 }
 0x2de   :  { %v1280_v10 = vrot.slane %v1267_v18, 4  ;;  %v6539_v40 = vperm.slane %v1263_v42, %v5732_v43  ;;  %v1283_v39 = vsel %vm452_vm2, %v1267_v18, %v1282_v22  ;;  %v1351_v11 = vsel %vm452_vm2, %v1311_v53, %v1350_v12  ;;  %1698 = vst.msk [vmem:[#allocation3 + $0x8] sm:$0xff] %vm1696_vm4, %v8601_v21  ;;  %v8602_v12 = vld [vmem:[#allocation9_spill] sm:$0xff] }
 0x2df   :  { %v1359_v18 = vperm.slane %v1351_v11, %v5732_v43  ;;  %v1405_v3 = vperm.slane %v8602_v12, %v5644_v58 }
 0x2e0   :  { %v1281_v14 = vsel %vm452_vm2, %v1280_v10, %v1243_v55  ;;  %v1284_v60 = vrot.slane %v6539_v40, 4 }
 0x2e1   :  { %1653 = vmax.xlane.f32.xlu2 %v1652_v48  ;;  %1635 = vmax.xlane.f32.xlu0 %v1634_v36  ;;  %v1372_v48 = vrot.slane %v6475_v44, 4  ;;  %v6505_v36 = vperm.slane %v6389_v41, %v5644_v58  ;;  %v1383_v44 = vperm.slane %v1375_v37, %v5732_v43 }
 0x2e2   :  { %1614 = vmax.xlane.f32.xlu1 %v1613_v24  ;;  %v1610_v24 = vsel %vm1452_vm1, %v1277_v51, -inf  ;;  %v1285_v29 = vsel %vm452_vm2, %v1284_v60, %v1247_v13  ;;  %v8603_v60 = vlaneseq }
 0x2e3   :  { %v923_v33 = vsel %vm452_vm2, %v6505_v36, %v922_v52  ;;  %v1373_v49 = vsel %vm452_vm2, %v1372_v48, %v1323_v32  ;;  %v920_v52 = vrot.slane %v6505_v36, 4  ;;  %v901_v32 = vsel %vm452_vm2, 0.0, %v900_v25 }
 0x2e4   :  { %v6444_v30 = vpop.xlane.xlu2 %1463  ;;  %v6446_v5 = vpop.xlane.xlu0 %1470  ;;  %v1379_v4 = vperm.slane %v1373_v49, %v5732_v43  ;;  %v1396_v57 = vrot.slane %v1383_v44, 4  ;;  %v6580_v23 = vperm.slane %v901_v32, %v5644_v58  ;;  %v1398_v49 = vrot.slane %v1359_v18, 4 }
 0x2e5   :  { %v6454_v26 = vpop.xlane.xlu1 %1560  ;;  %v921_v10 = vsel %vm452_vm2, %v920_v52, %v6480_v59  ;;  %v6607_v37 = vand.u32 127, %v8603_v60 }
 0x2e6   :  { %v1392_v9 = vrot.slane %v1379_v4, 4  ;;  %v1399_v63 = vsel %vm452_vm2, %v1383_v44, %v1398_v49  ;;  %v927_v59 = vperm.slane %v921_v10, %v5732_v43 }
 0x2e7   :  { %v6622_v52 = vadd.s32 4294967292, %v6607_v37 }
 0x2e8   :  { %v1466_v32 = vsel %vm1465_vm3, %v927_v59, -inf }
 0x2e9   :  { %1665 = vmax.xlane.f32.xlu2 %v1664_v61  ;;  %1599 = vmax.xlane.f32.xlu0 %v1598_v31  ;;  %v6535_v61 = vperm.slane %v923_v33, %v5732_v43  ;;  %v1348_v31 = vrot.slane %v1311_v53, 4 }
 0x2ea   :  { %1626 = vmax.xlane.f32.xlu1 %v1625_v34  ;;  %v1640_v34 = vsel %vm1452_vm1, %v1281_v14, -inf }
 0x2eb   :  { %v1349_v8 = vsel %vm452_vm2, %v1348_v31, %v1299_v45  ;;  %v1496_v35 = vsel %vm1465_vm3, %v6535_v61, -inf  ;;  %v1397_v45 = vsel %vm452_vm2, %v1396_v57, %v1359_v18  ;;  %v934_v31 = vrot.slane %v6580_v23, 4 }
 0x2ec   :  { %v6488_v17 = vpop.xlane.xlu2 %1476  ;;  %v6490_v0 = vpop.xlane.xlu0 %1479  ;;  %v1355_v62 = vperm.slane %v1349_v8, %v5732_v43  ;;  %v1673_v47 = vsel %vm1452_vm1, %v1397_v45, -inf  ;;  %v944_v8 = vrot.slane %v927_v59, 4  ;;  %v6628_v18 = vadd.s32 4294967284, %v6607_v37 }
 0x2ed   :  { %v6495_v54 = vpop.xlane.xlu1 %1460  ;;  %v946_v57 = vrot.slane %v6535_v61, 4 }
 0x2ee   :  { %v1393_v16 = vsel %vm452_vm2, %v1392_v9, %v1355_v62  ;;  %v1394_v27 = vrot.slane %v1355_v62, 4  ;;  %v1286_v9 = vrot.slane %v1247_v13, 4  ;;  %v945_v44 = vsel %vm452_vm2, 0.0, %v944_v8 }
 0x2f0   :  { %v1395_v14 = vsel %vm452_vm2, %v1379_v4, %v1394_v27  ;;  %v1287_v13 = vsel %vm452_vm2, %v6539_v40, %v1286_v9  ;;  %v1481_v40 = vsel %vm1465_vm3, %v945_v44, -inf }
 0x2f1   :  { %1629 = vmax.xlane.f32.xlu2 %v1628_v20  ;;  %1611 = vmax.xlane.f32.xlu0 %v1610_v24  ;;  %v1655_v20 = vsel %vm1452_vm1, %v1283_v39, -inf  ;;  %v1643_v24 = vsel %vm1452_vm1, %v1393_v16, -inf  ;;  %v1658_v19 = vsel %vm1452_vm1, %v1395_v14, -inf  ;;  %v1410_v39 = vrot.slane %v6416_v15, 4 }
 0x2f2   :  { %1683 = vmax.xlane.f32.xlu1 %v1682_v38  ;;  %v910_v38 = vrot.slane %v6389_v41, 4  ;;  %v1670_v41 = vsel %vm1452_vm1, %v1285_v29, -inf  ;;  %v1422_v29 = vrot.slane %v1405_v3, 4 }
 0x2f4   :  { %v6526_v7 = vpop.xlane.xlu2 %1485  ;;  %v6528_v28 = vpop.xlane.xlu0 %1551  ;;  %v911_v36 = vsel %vm452_vm2, 0.0, %v910_v38 }
 0x2f5   :  { %v6530_v2 = vpop.xlane.xlu1 %1473  ;;  %v6587_v55 = vperm.slane %v911_v36, %v5644_v58 }
 0x2f6   :  { %v1740_v36 = vperm.slane %v6530_v2, %v6628_v18  ;;  %v1734_v2 = vperm.slane %v6406_v46, %v6622_v52 }
 0x2f7   :  { %v935_v4 = vsel %vm452_vm2, %v6587_v55, %v934_v31  ;;  %v1736_v31 = vperm.slane %v6408_v56, %v6628_v18 }
 0x2f8   :  { %v943_v25 = vperm.slane %v935_v4, %v5732_v43  ;;  %v947_v4 = vsel %vm452_vm2, 0.0, %v946_v57  ;;  %v1757_v57 = vperm.slane %v6454_v26, %v6622_v52 }
 0x2f9   :  { %1641 = vmax.xlane.f32.xlu2 %v1640_v34  ;;  %1668 = vmax.xlane.f32.xlu0 %v1667_v50  ;;  %v1415_v34 = vperm.slane %v6416_v15, %v5644_v58  ;;  %v1688_v50 = vsel %vm1452_vm1, %v1399_v63, -inf  ;;  %v1411_v15 = vsel %vm452_vm2, 0.0, %v1410_v39 }
 0x2fa   :  { %1497 = vmax.xlane.f32.xlu1 %v1496_v35  ;;  %v1400_v35 = vrot.slane %v8602_v12, 4  ;;  %v6640_v49 = vperm.slane %v1411_v15, %v5644_v58 }
 0x2fb   :  { %v1420_v16 = vrot.slane %v1415_v34, 4  ;;  %v1423_v27 = vsel %vm452_vm2, %v1415_v34, %v1422_v29  ;;  %v1742_v34 = vperm.slane %v6526_v7, %v6622_v52 }
 0x2fc   :  { %v6553_v1 = vpop.xlane.xlu2 %1503  ;;  %v6555_v51 = vpop.xlane.xlu0 %1569  ;;  %v1401_v38 = vsel %vm452_vm2, 0.0, %v1400_v35  ;;  %v1431_v8 = vperm.slane %v1423_v27, %v5732_v43  ;;  %v1738_v35 = vsel %vm1737_vm5, %v1736_v31, %v1734_v2  ;;  %v1432_v44 = vrot.slane %v6640_v49, 4 }
 0x2fd   :  { %v6558_v48 = vpop.xlane.xlu1 %1488  ;;  %v6637_v10 = vperm.slane %v1401_v38, %v5644_v58  ;;  %v1746_v56 = vperm.slane %v6553_v1, %v6628_v18 }
 0x2fe   :  { %v1743_v45 = vperm.slane %v6558_v48, %v6628_v18 }
 0x301   :  { %1656 = vmax.xlane.f32.xlu2 %v1655_v20  ;;  %1644 = vmax.xlane.f32.xlu0 %v1643_v24  ;;  %v1685_v20 = vsel %vm1452_vm1, %v1287_v13, -inf  ;;  %v950_v24 = vrot.slane %v943_v25, 4 }
 0x302   :  { %1671 = vmax.xlane.f32.xlu1 %v1670_v41  ;;  %v1421_v41 = vsel %vm452_vm2, %v1420_v16, %v1405_v3 }
 0x303   :  { %v951_v61 = vsel %vm452_vm2, 0.0, %v950_v24  ;;  %v6646_v59 = vperm.slane %v1421_v41, %v5732_v43 }
 0x304   :  { %v6582_v53 = vpop.xlane.xlu2 %1566  ;;  %v6584_v33 = vpop.xlane.xlu0 %1515  ;;  %v1571_v12 = vsel %vm1465_vm3, %v951_v61, -inf }
 0x305   :  { %v6589_v42 = vpop.xlane.xlu1 %1500  ;;  %v1748_v7 = vperm.slane %v6584_v33, %v6622_v52  ;;  %v1586_v1 = vsel %vm1465_vm3, %v6646_v59, -inf  ;;  %v932_v33 = vrot.slane %v6587_v55, 4 }
 0x307   :  { %v933_v27 = vsel %vm452_vm2, %v932_v33, %v6580_v23 }
 0x309   :  { %1674 = vmax.xlane.f32.xlu2 %v1673_v47  ;;  %1659 = vmax.xlane.f32.xlu0 %v1658_v19  ;;  %v1739_v47 = vperm.slane %v6446_v5, %v6622_v52  ;;  %v1745_v19 = vperm.slane %v6589_v42, %v6622_v52  ;;  %v1556_v5 = vsel %vm1465_vm3, %v943_v25, -inf  ;;  %v1744_v42 = vsel %vm1737_vm5, %v1743_v45, %v1742_v34 }
 0x30a   :  { %1689 = vmax.xlane.f32.xlu1 %v1688_v50  ;;  %v1446_v25 = vrot.slane %v1431_v8, 4  ;;  %v939_v34 = vperm.slane %v933_v27, %v5732_v43 }
 0x30b   :  { %v1741_v46 = vsel %vm1737_vm5, %v1740_v36, %v1739_v47  ;;  %v1747_v9 = vsel %vm1737_vm5, %v1746_v56, %v1745_v19  ;;  %v1433_v47 = vsel %vm452_vm2, %v1432_v44, %v6637_v10 }
 0x30c   :  { %v6609_v22 = vpop.xlane.xlu2 %1530  ;;  %v6611_v62 = vpop.xlane.xlu0 %1533  ;;  %v1785_v3 = vsel %vm1784_vm6, %v1741_v46, %v1738_v35  ;;  %v1447_v41 = vsel %vm452_vm2, 0.0, %v1446_v25  ;;  %v1444_v46 = vrot.slane %v6646_v59, 4 }
 0x30d   :  { %v6615_v11 = vpop.xlane.xlu1 %1554  ;;  %v1787_v39 = vsel %vm1786_vm7, %v1744_v42, %v1785_v3  ;;  %v1751_v16 = vperm.slane %v6609_v22, %v6622_v52  ;;  %v1752_v13 = vperm.slane %v6611_v62, %v6628_v18  ;;  %v1511_v22 = vsel %vm1465_vm3, %v947_v4, -inf  ;;  %v8604_v3 = vld [vmem:[#allocation14_spill] sm:$0xff] }
 0x30e   :  { %v1789_v38 = vsel %vm1788_vm8, %v1747_v9, %v1787_v39  ;;  %v1631_v26 = vsel %vm1465_vm3, %v1447_v41, -inf  ;;  %v1439_v4 = vperm.slane %v1433_v47, %v5732_v43  ;;  %v1445_v35 = vsel %vm452_vm2, 0.0, %v1444_v46 }
 0x30f   :  { %v1753_v36 = vsel %vm1737_vm5, %v1752_v13, %v1751_v16 }
 0x310   :  { %v1646_v56 = vsel %vm1465_vm3, %v1439_v4, -inf  ;;  %v1448_v25 = vrot.slane %v1439_v4, 4 }
 0x311   :  { %1467 = vmax.xlane.f32.xlu2 %v1466_v32  ;;  %1686 = vmax.xlane.f32.xlu0 %v1685_v20  ;;  %v1434_v20 = vrot.slane %v6637_v10, 4  ;;  %v1526_v10 = vsel %vm1465_vm3, %v939_v34, -inf }
 0x312   :  { %1482 = vmax.xlane.f32.xlu1 %v1481_v40  ;;  %v1449_v13 = vsel %vm452_vm2, 0.0, %v1448_v25 }
 0x313   :  { %v1435_v31 = vsel %vm452_vm2, %v6640_v49, %v1434_v20  ;;  %v1661_v44 = vsel %vm1465_vm3, %v1449_v13, -inf  ;;  %v948_v20 = vrot.slane %v939_v34, 4 }
 0x314   :  { %v1564_v14 = vpop.xlane.xlu2 %1563  ;;  %v1546_v63 = vpop.xlane.xlu0 %1545  ;;  %v1443_v49 = vperm.slane %v1435_v31, %v5732_v43 }
 0x315   :  { %v1519_v48 = vpop.xlane.xlu1 %1518  ;;  %v1758_v55 = vperm.slane %v1564_v14, %v6628_v18  ;;  %v1754_v62 = vperm.slane %v1546_v63, %v6622_v52  ;;  %v1616_v63 = vsel %vm1465_vm3, %v1431_v8, -inf }
 0x316   :  { %v1749_v50 = vperm.slane %v1519_v48, %v6628_v18  ;;  %v1676_v8 = vsel %vm1465_vm3, %v1443_v49, -inf }
 0x317   :  { %v1759_v61 = vsel %vm1737_vm5, %v1758_v55, %v1757_v57 }
 0x318   :  { %v1750_v60 = vsel %vm1737_vm5, %v1749_v50, %v1748_v7 }
 0x319   :  { %1557 = vmax.xlane.f32.xlu2 %v1556_v5  ;;  %1572 = vmax.xlane.f32.xlu0 %v1571_v12  ;;  %v1791_v24 = vsel %vm1790_vm9, %v1750_v60, %v1789_v38  ;;  %v1450_v5 = vrot.slane %v1443_v49, 4  ;;  %v1535_v60 = vsel %vm1452_vm1, %v8604_v3, -inf  ;;  %v1538_v38 = vsel %vm1452_vm1, %v5949_v6, -inf }
 0x31a   :  { %1587 = vmax.xlane.f32.xlu1 %v1586_v1  ;;  %v1793_v45 = vsel %vm1792_vm10, %v1753_v36, %v1791_v24  ;;  %v1601_v1 = vsel %vm1465_vm3, %v1445_v35, -inf }
 0x31b   :  { %v1451_v9 = vsel %vm452_vm2, 0.0, %v1450_v5 }
 0x31c   :  { %v6683_v29 = vpop.xlane.xlu2 %1491  ;;  %v6685_v32 = vpop.xlane.xlu0 %1494  ;;  %v1691_v59 = vsel %vm1465_vm3, %v1451_v9, -inf }
 0x31d   :  { %v1549_v15 = vpop.xlane.xlu1 %1548 }
 0x31e   :  { %v1755_v40 = vperm.slane %v1549_v15, %v6628_v18 }
 0x320   :  { %v1756_v14 = vsel %vm1737_vm5, %v1755_v40, %v1754_v62 }
 0x321   :  { %v1795_v2 = vsel %vm1794_vm11, %v1756_v14, %v1793_v45  ;;  %1512 = vmax.xlane.f32.xlu2 %v1511_v22  ;;  %1617 = vmax.xlane.f32.xlu0 %v1616_v63  ;;  %v949_v22 = vsel %vm452_vm2, 0.0, %v948_v20 }
 0x322   :  { %v1797_v23 = vsel %vm1796_vm12, %v1759_v61, %v1795_v2  ;;  %1632 = vmax.xlane.f32.xlu1 %v1631_v26  ;;  %v1541_v62 = vsel %vm1465_vm3, %v949_v22, -inf }
 0x323   :  { %1808 = vst.msk [vmem:[#allocation3] sm:$0xff] %vm1807_vm13, %v1797_v23 }
 0x324   :  { %1811 = vst.msk [vmem:[#allocation3] sm:$0xff] %vm1810_vm14, %v8601_v21  ;;  %v6713_v19 = vpop.xlane.xlu2 %1506  ;;  %v6715_v48 = vpop.xlane.xlu0 %1509 }
 0x325   :  { %v6719_v50 = vpop.xlane.xlu1 %1524  ;;  %1814 = vst.msk [vmem:[#allocation3] sm:$0xff] %vm1813_vm15, %v8601_v21 }
 0x329   :  { %1527 = vmax.xlane.f32.xlu2 %v1526_v10  ;;  %1677 = vmax.xlane.f32.xlu0 %v1676_v8 }
 0x32a   :  { %1647 = vmax.xlane.f32.xlu1 %v1646_v56 }
 0x32c   :  { %v1591_v42 = vpop.xlane.xlu2 %1590  ;;  %v6726_v7 = vpop.xlane.xlu0 %1521 }
 0x32d   :  { %v1579_v12 = vpop.xlane.xlu1 %1578  ;;  %v1763_v47 = vperm.slane %v1591_v42, %v6622_v52 }
 0x32e   :  { %v1761_v4 = vperm.slane %v1579_v12, %v6628_v18 }
 0x331   :  { %1602 = vmax.xlane.f32.xlu2 %v1601_v1  ;;  %1536 = vmax.xlane.f32.xlu0 %v1535_v60 }
 0x332   :  { %1692 = vmax.xlane.f32.xlu1 %v1691_v59 }
 0x334   :  { %v1606_v33 = vpop.xlane.xlu2 %1605  ;;  %v1681_v39 = vpop.xlane.xlu0 %1680 }
 0x335   :  { %v1621_v16 = vpop.xlane.xlu1 %1620  ;;  %v1766_v49 = vperm.slane %v1606_v33, %v6622_v52 }
 0x336   :  { %v1769_v12 = vperm.slane %v1621_v16, %v6622_v52 }
 0x339   :  { %1662 = vmax.xlane.f32.xlu2 %v1661_v44 }
 0x33a   :  { %1539 = vmax.xlane.f32.xlu1 %v1538_v38 }
 0x33c   :  { %v1624_v55 = vpop.xlane.xlu2 %1623  ;;  %v1576_v24 = vpop.xlane.xlu0 %1575 }
 0x33d   :  { %v6738_v15 = vpop.xlane.xlu1 %1581  ;;  %v1760_v34 = vperm.slane %v1576_v24, %v6622_v52  ;;  %v1770_v9 = vperm.slane %v1624_v55, %v6628_v18 }
 0x33f   :  { %v1762_v42 = vsel %vm1737_vm5, %v1761_v4, %v1760_v34  ;;  %v1771_v25 = vsel %vm1737_vm5, %v1770_v9, %v1769_v12  ;;  %v6822_v12 = vadd.s32 4294967262, %v6607_v37 }
 0x341   :  { %1542 = vmax.xlane.f32.xlu2 %v1541_v62 }
 0x344   :  { %v6742_v40 = vpop.xlane.xlu2 %1584  ;;  %v1594_v41 = vpop.xlane.xlu0 %1593 }
 0x345   :  { %v1639_v57 = vpop.xlane.xlu1 %1638  ;;  %v1764_v31 = vperm.slane %v1594_v41, %v6628_v18  ;;  %v1781_v41 = vperm.slane %v1681_v39, %v6622_v52 }
 0x346   :  { %v1773_v3 = vperm.slane %v1639_v57, %v6628_v18 }
 0x347   :  { %v1765_v10 = vsel %vm1737_vm5, %v1764_v31, %v1763_v47 }
 0x348   :  { %v1798_v1 = vsel %vm1784_vm6, %v1765_v10, %v1762_v42 }
 0x34c   :  { %v6744_v36 = vpop.xlane.xlu2 %1596  ;;  %v1609_v27 = vpop.xlane.xlu0 %1608 }
 0x34d   :  { %v1651_v45 = vpop.xlane.xlu1 %1650  ;;  %v1767_v23 = vperm.slane %v1609_v27, %v6628_v18 }
 0x34e   :  { %v1775_v44 = vperm.slane %v1651_v45, %v6622_v52 }
 0x34f   :  { %v1768_v56 = vsel %vm1737_vm5, %v1767_v23, %v1766_v49 }
 0x350   :  { %v1799_v60 = vsel %vm1786_vm7, %v1768_v56, %v1798_v1  ;;  %v6819_v1 = vadd.s32 4294967270, %v6607_v37 }
 0x351   :  { %v1800_v13 = vsel %vm1788_vm8, %v1771_v25, %v1799_v60  ;;  %v6827_v60 = vld [vmem:[%s8540_s4 + $0x20] sm:$0xff] }
 0x352   :  { %v1874_v25 = vperm.slane %v6488_v17, %v6819_v1 }
 0x353   :  { %2477 = vperm.xlu1 %5125, %v6827_v60  }
 0x354   :  { %v1654_v6 = vpop.xlane.xlu2 %1653  ;;  %v1636_v14 = vpop.xlane.xlu0 %1635 }
 0x355   :  { %v6746_v63 = vpop.xlane.xlu1 %1614  ;;  %v1772_v5 = vperm.slane %v1636_v14, %v6622_v52  ;;  %v1776_v33 = vperm.slane %v1654_v6, %v6628_v18 }
 0x357   :  { %v1774_v59 = vsel %vm1737_vm5, %v1773_v3, %v1772_v5  ;;  %v1777_v57 = vsel %vm1737_vm5, %v1776_v33, %v1775_v44  ;;  %v1875_v33 = vperm.slane %v6490_v0, %v6822_v12  ;;  %v1904_v44 = vperm.slane %v6582_v53, %v6819_v1 }
 0x358   :  { %v1801_v38 = vsel %vm1790_vm9, %v1774_v59, %v1800_v13  ;;  %v6832_v59 = vld [vmem:[%s8540_s4 + $0x18] sm:$0xff]  ;;  %v6841_v13 = vadd.s32 4294967254, %v6607_v37  ;;  %v1905_v53 = vperm.slane %v6555_v51, %v6822_v12 }
 0x359   :  { %v1802_v45 = vsel %vm1792_vm10, %v1777_v57, %v1801_v38  ;;  %2472 = vperm.xlu2 %5124, %v6832_v59   ;;  %v1900_v38 = vperm.slane %v6615_v11, %v6822_v12  ;;  %v1867_v11 = vperm.slane %v6444_v30, %v6822_v12  ;;  %v1909_v57 = vperm.slane %v6738_v15, %v6819_v1 }
 0x35c   :  { %v1666_v61 = vpop.xlane.xlu2 %1665  ;;  %v6748_v2 = vpop.xlane.xlu0 %1599 }
 0x35d   :  { %v6750_v26 = vpop.xlane.xlu1 %1626  ;;  %v1778_v16 = vperm.slane %v1666_v61, %v6622_v52  ;;  %v1915_v30 = vperm.slane %v6748_v2, %v6822_v12  ;;  %v1914_v2 = vperm.slane %v6744_v36, %v6819_v1 }
 0x35f   :  { %v1916_v36 = vsel %vm1868_vm0, %v1915_v30, %v1914_v2 }
 0x364   :  { %v6759_v8 = vpop.xlane.xlu2 %1629  ;;  %v6761_v46 = vpop.xlane.xlu0 %1611 }
 0x365   :  { %v1684_v35 = vpop.xlane.xlu1 %1683  ;;  %v1919_v15 = vperm.slane %v6761_v46, %v6819_v1 }
 0x366   :  { %v1782_v20 = vperm.slane %v1684_v35, %v6628_v18 }
 0x368   :  { %v1783_v6 = vsel %vm1737_vm5, %v1782_v20, %v1781_v41  ;;  %v6862_v41 = vsel %vm1868_vm0, %v1875_v33, %v1874_v25 }
 0x36c   :  { %v6778_v55 = vpop.xlane.xlu2 %1641  ;;  %v1669_v24 = vpop.xlane.xlu0 %1668 }
 0x36d   :  { %v1779_v22 = vperm.slane %v1669_v24, %v6628_v18  ;;  %v6782_v62 = vpop.xlane.xlu1 %1497  ;;  %v1910_v24 = vperm.slane %v6742_v40, %v6822_v12  ;;  %v1865_v40 = vperm.slane %v6495_v54, %v6819_v1 }
 0x36f   :  { %v1780_v27 = vsel %vm1737_vm5, %v1779_v22, %v1778_v16  ;;  %v1899_v22 = vperm.slane %v6528_v28, %v6819_v1  ;;  %vm1872_vm5 = vcmask 408912   ;;  %v1911_v51 = vsel %vm1868_vm0, %v1910_v24, %v1909_v57 }
 0x370   :  { %v1803_v14 = vsel %vm1794_vm11, %v1780_v27, %v1802_v45  ;;  %v1906_v27 = vsel %vm1868_vm0, %v1905_v53, %v1904_v44 }
 0x371   :  { %v1804_v31 = vsel %vm1796_vm12, %v1783_v6, %v1803_v14  ;;  %v1901_v45 = vsel %vm1868_vm0, %v1900_v38, %v1899_v22 }
 0x372   :  { %1809 = vst.msk [vmem:[#allocation3 + $0x8] sm:$0xff] %vm1807_vm13, %v1804_v31  ;;  %vm1969_vm13 = vcmask 353504  }
 0x373   :  { %1812 = vst.msk [vmem:[#allocation3 + $0x8] sm:$0xff] %vm1810_vm14, %v8601_v21  ;;  %vm1967_vm14 = vcmask 359648  }
 0x374   :  { %v6794_v18 = vpop.xlane.xlu2 %1656  ;;  %v6796_v39 = vpop.xlane.xlu0 %1644  ;;  %1815 = vst.msk [vmem:[#allocation3 + $0x8] sm:$0xff] %vm1813_vm15, %v8601_v21  ;;  %vm1965_vm15 = vcmask 359650  }
 0x375   :  { %v6798_v61 = vpop.xlane.xlu1 %1671  ;;  %v1930_v30 = vperm.slane %v6796_v39, %v6822_v12  ;;  %v1929_v39 = vperm.slane %v6778_v55, %v6819_v1  ;;  %v1885_v55 = vperm.slane %v6715_v48, %v6822_v12 }
 0x376   :  { %v1939_v25 = vperm.slane %v6798_v61, %v6819_v1  ;;  %v1925_v61 = vperm.slane %v6759_v8, %v6822_v12 }
 0x37c   :  { %v6800_v23 = vpop.xlane.xlu2 %1674  ;;  %v6802_v47 = vpop.xlane.xlu0 %1659 }
 0x37d   :  { %v6804_v34 = vpop.xlane.xlu1 %1689  ;;  %v1940_v31 = vperm.slane %v6800_v23, %v6822_v12 }
 0x37e   :  { %v1945_v46 = vperm.slane %v6804_v34, %v6822_v12 }
 0x384   :  { %v6806_v49 = vpop.xlane.xlu2 %1467  ;;  %v6808_v4 = vpop.xlane.xlu0 %1686 }
 0x385   :  { %v6810_v10 = vpop.xlane.xlu1 %1482 }
 0x38c   :  { %v1558_v56 = vpop.xlane.xlu2 %1557  ;;  %v1573_v5 = vpop.xlane.xlu0 %1572 }
 0x38d   :  { %v1588_v35 = vpop.xlane.xlu1 %1587  ;;  %v1902_v17 = vperm.slane %v1558_v56, %v6841_v13  ;;  %v1907_v16 = vperm.slane %v1573_v5, %v6841_v13  ;;  %v1944_v56 = vperm.slane %v6808_v4, %v6819_v1  ;;  %v8605_v5 = vmov 1  }
 0x38e   :  { %v1912_v28 = vperm.slane %v1588_v35, %v6841_v13  ;;  %5142 = vset.pattern.permute.xlu1 %v8605_v5  ;;  %5141 = vset.pattern.permute.xlu2 %v8605_v5  ;;  %v1920_v35 = vperm.slane %v6746_v63, %v6822_v12  ;;  %v1924_v63 = vperm.slane %v6750_v26, %v6819_v1 }
 0x38f   :  { %v1903_v6 = vsel %vm1872_vm5, %v1902_v17, %v1901_v45  ;;  %v1908_v14 = vsel %vm1872_vm5, %v1907_v16, %v1906_v27  ;;  %v1941_v16 = vsel %vm1868_vm0, %v1940_v31, %v1939_v25 }
 0x390   :  { %v1954_v23 = vsel %vm1784_vm6, %v1908_v14, %v1903_v6  ;;  %v1913_v4 = vsel %vm1872_vm5, %v1912_v28, %v1911_v51  ;;  %v1921_v17 = vsel %vm1868_vm0, %v1920_v35, %v1919_v15  ;;  %v1869_v51 = vsel %vm1868_vm0, %v1867_v11, %v1865_v40 }
 0x391   :  { %v1955_v53 = vsel %vm1786_vm7, %v1913_v4, %v1954_v23  ;;  %v1926_v14 = vsel %vm1868_vm0, %v1925_v61, %v1924_v63  ;;  %v1871_v15 = vperm.slane %v6806_v49, %v6841_v13  ;;  %v1879_v11 = vperm.slane %v6683_v29, %v6819_v1 }
 0x392   :  { %v1877_v40 = vperm.slane %v6810_v10, %v6841_v13  ;;  %v1884_v49 = vperm.slane %v6713_v19, %v6819_v1  ;;  %v1889_v10 = vperm.slane %v6726_v7, %v6819_v1  ;;  %v1931_v35 = vsel %vm1868_vm0, %v1930_v30, %v1929_v39  ;;  %v1973_v30 = vld [vmem:[%s8538_s2 + $0x10] sm:$0xff] }
 0x393   :  { %v1873_v19 = vsel %vm1872_vm5, %v1871_v15, %v1869_v51  ;;  %v29_v51 = vld [vmem:[%s8540_s4 + $0x28] sm:$0xff] }
 0x394   :  { %v6814_v9 = vpop.xlane.xlu2 %1512  ;;  %v1618_v3 = vpop.xlane.xlu0 %1617 }
 0x395   :  { %v6816_v42 = vpop.xlane.xlu1 %1632  ;;  %v1922_v33 = vperm.slane %v1618_v3, %v6841_v13  ;;  %v1946_v3 = vsel %vm1868_vm0, %v1945_v46, %v1944_v56  ;;  %v1887_v48 = vperm.slane %v6814_v9, %v6841_v13  ;;  %v1886_v9 = vsel %vm1868_vm0, %v1885_v55, %v1884_v49 }
 0x396   :  { %v1927_v57 = vperm.slane %v6816_v42, %v6841_v13 }
 0x397   :  { %v1923_v8 = vsel %vm1872_vm5, %v1922_v33, %v1921_v17  ;;  %v1882_v33 = vperm.slane %v6782_v62, %v6841_v13 }
 0x398   :  { %v1928_v56 = vsel %vm1872_vm5, %v1927_v57, %v1926_v14 }
 0x39c   :  { %v6847_v20 = vpop.xlane.xlu2 %1527  ;;  %v1678_v54 = vpop.xlane.xlu0 %1677 }
 0x39d   :  { %v6853_v0 = vpop.xlane.xlu1 %1647  ;;  %v1942_v44 = vperm.slane %v1678_v54, %v6841_v13  ;;  %v1935_v54 = vperm.slane %v6802_v47, %v6822_v12  ;;  %v1880_v47 = vperm.slane %v6685_v32, %v6822_v12 }
 0x39e   :  { %v1932_v31 = vperm.slane %v6853_v0, %v6841_v13  ;;  %v1934_v0 = vperm.slane %v6794_v18, %v6819_v1  ;;  %v1878_v18 = vsel %vm1872_vm5, %v1877_v40, %v6862_v41  ;;  %v4845_v40 = vld [vmem:[%s8538_s2 + $0x48] sm:$0xff] }
 0x39f   :  { %v1943_v27 = vsel %vm1872_vm5, %v1942_v44, %v1941_v16  ;;  %v1892_v44 = vperm.slane %v6847_v20, %v6841_v13  ;;  %v1949_v63 = vsel %vm1788_vm8, %v1878_v18, %v1873_v19 }
 0x3a0   :  { %v1936_v32 = vsel %vm1868_vm0, %v1935_v54, %v1934_v0  ;;  %v1933_v46 = vsel %vm1872_vm5, %v1932_v31, %v1931_v35  ;;  %v4844_v31 = vld [vmem:[%s8538_s2 + $0x40] sm:$0xff] }
 0x3a4   :  { %v1603_v38 = vpop.xlane.xlu2 %1602  ;;  %v1537_v41 = vpop.xlane.xlu0 %1536 }
 0x3a5   :  { %v1917_v24 = vperm.slane %v1603_v38, %v6841_v13  ;;  %v1693_v34 = vpop.xlane.xlu1 %1692 }
 0x3a6   :  { %v1947_v22 = vperm.slane %v1693_v34, %v6841_v13  ;;  %v1888_v34 = vsel %vm1872_vm5, %v1887_v48, %v1886_v9 }
 0x3a7   :  { %v1918_v26 = vsel %vm1872_vm5, %v1917_v24, %v1916_v36  ;;  %v1890_v36 = vperm.slane %v6719_v50, %v6822_v12  ;;  %v1881_v24 = vsel %vm1868_vm0, %v1880_v47, %v1879_v11  ;;  %v1894_v50 = vperm.slane %v1537_v41, %v6819_v1  ;;  %v4846_v47 = vld [vmem:[%s8538_s2 + $0x50] sm:$0xff]  ;;  %v4868_v41 = vld [vmem:[%s8538_s2 + $0xa0] sm:$0xff] }
 0x3a8   :  { %v1956_v45 = vsel %vm1788_vm8, %v1918_v26, %v1955_v53  ;;  %v1948_v28 = vsel %vm1872_vm5, %v1947_v22, %v1946_v3  ;;  %v1883_v20 = vsel %vm1872_vm5, %v1882_v33, %v1881_v24  ;;  %v4877_v24 = vld [vmem:[%s8538_s2 + $0xc8] sm:$0xff] }
 0x3a9   :  { %v1957_v6 = vsel %vm1790_vm9, %v1923_v8, %v1956_v45  ;;  %v1961_v42 = vsel %vm1784_vm6, %v1948_v28, %v1943_v27  ;;  %v1891_v62 = vsel %vm1868_vm0, %v1890_v36, %v1889_v10  ;;  %v1950_v3 = vsel %vm1790_vm9, %v1883_v20, %v1949_v63  ;;  %v4834_v63 = vld [vmem:[%s8538_s2 + $0x30] sm:$0xff] }
 0x3aa   :  { %1970 = vst.msk [vmem:[#allocation3 + $0xe] sm:$0x3] %vm1969_vm13, %v1961_v42  ;;  %v1958_v2 = vsel %vm1792_vm10, %v1928_v56, %v1957_v6  ;;  %v1893_v17 = vsel %vm1872_vm5, %v1892_v44, %v1891_v62  ;;  %v1951_v53 = vsel %vm1792_vm10, %v1888_v34, %v1950_v3  ;;  %v8610_v28 = vmov 0   ;;  %v1974_v42 = vld [vmem:[%s8538_s2 + $0x18] sm:$0xff]  ;;  %v4853_v3 = vld [vmem:[%s8538_s2 + $0x68] sm:$0xff] }
 0x3ab   :  { %v1959_v23 = vsel %vm1794_vm11, %v1933_v46, %v1958_v2  ;;  %v1952_v57 = vsel %vm1794_vm11, %v1893_v17, %v1951_v53  ;;  %vm3628_vm13 = vcmask 212112  }
 0x3ac   :  { %v1663_v29 = vpop.xlane.xlu2 %1662 }
 0x3ad   :  { %v1937_v25 = vperm.slane %v1663_v29, %v6841_v13  ;;  %v1540_v4 = vpop.xlane.xlu1 %1539 }
 0x3ae   :  { %v1895_v61 = vperm.slane %v1540_v4, %v6822_v12  ;;  %v4876_v4 = vld [vmem:[%s8538_s2 + $0xc0] sm:$0xff] }
 0x3af   :  { %v1938_v7 = vsel %vm1872_vm5, %v1937_v25, %v1936_v32  ;;  %v4832_v25 = vld [vmem:[%s8538_s2 + $0x20] sm:$0xff]  ;;  %v4847_v32 = vld [vmem:[%s8538_s2 + $0x58] sm:$0xff] }
 0x3b0   :  { %v1960_v38 = vsel %vm1796_vm12, %v1938_v7, %v1959_v23  ;;  %v1896_v12 = vsel %vm1868_vm0, %v1895_v61, %v1894_v50  ;;  %vm1990_vm0 = vcmask 130048   ;;  %v4833_v23 = vld [vmem:[%s8538_s2 + $0x28] sm:$0xff]  ;;  %v4852_v61 = vld [vmem:[%s8538_s2 + $0x60] sm:$0xff] }
 0x3b1   :  { %1968 = vst.msk [vmem:[#allocation3 + $0x6] sm:$0xff] %vm1967_vm14, %v1960_v38  ;;  %v4869_v50 = vld [vmem:[%s8538_s2 + $0xa8] sm:$0xff]  ;;  %vm3578_vm14 = vcmask 64544  }
 0x3b4   :  { %v1543_v16 = vpop.xlane.xlu2 %1542 }
 0x3b5   :  { %v1897_v22 = vperm.slane %v1543_v16, %v6841_v13  ;;  %v26_v13 = vld [vmem:[%s8540_s4 + $0x10] sm:$0xff]  ;;  %v4835_v16 = vld [vmem:[%s8538_s2 + $0x38] sm:$0xff] }
 0x3b7   :  { %v1898_v26 = vsel %vm1872_vm5, %v1897_v22, %v1896_v12  ;;  %v4878_v22 = vld [vmem:[%s8538_s2 + $0xd0] sm:$0xff]  ;;  %vm3477_vm5 = vcmask 97344  }
 0x3b8   :  { %v1953_v8 = vsel %vm1796_vm12, %v1898_v26, %v1952_v57  ;;  %v1976_v27 = vld [vmem:[#allocation3 + $0x8] sm:$0xff]  ;;  %v4860_v26 = vld [vmem:[%s8538_s2 + $0x80] sm:$0xff]  ;;  %3478 = vst.msk [vmem:[#allocation4] sm:$0xff] %vm3477_vm5, %v8601_v21 }
 0x3b9   :  { %1966 = vst.msk [vmem:[#allocation3 - $0x2] sm:$0xfc] %vm1965_vm15, %v1953_v8  ;;  %2058 = vmatpush.msra.mxu0 %v1976_v27  ;;  %v4870_v12 = vld [vmem:[%s8538_s2 + $0xb0] sm:$0xff]  ;;  %v4879_v8 = vld [vmem:[%s8538_s2 + $0xd8] sm:$0xff]  ;;  %vm3583_vm15 = vcmask 130144  }
 0x3ba   :  { %v4854_v57 = vld [vmem:[%s8538_s2 + $0x70] sm:$0xff]  ;;  %3479 = vst.msk [vmem:[#allocation4 + $0x8] sm:$0xff] %vm3477_vm5, %v8601_v21 }
 0x3bb   :  { %3480 = vst.msk [vmem:[#allocation4 + $0x10] sm:$0xff] %vm3477_vm5, %v8601_v21 }
 0x3bc   :  { %v7008_v6 = vpop.permute.xlu2 %2472  ;;  %3481 = vst.msk [vmem:[#allocation4 + $0x18] sm:$0xff] %vm3477_vm5, %v8601_v21 }
 0x3c0   :  { %v1975_v1 = vld [vmem:[#allocation3] sm:$0xff] }
 0x3c1   :  { %2059 = vmatpush.msra.mxu0 %v1975_v1  ;;  %v5131_v45 = vpack.i.bf16 %v1975_v1, %v1976_v27 }
 0x3c3   :  { %5132 = vrot.lane.b32.xlu2 %v5131_v45, %s8606_s28  ;;  %5127 = vrot.lane.b32.xlu1 %v5131_v45, %s5286_s11 }
 0x3c4   :  { %5120 = vrot.lane.b32.xlu0 %v5131_v45, %s8607_s0 }
 0x3c5   :  { %v7021_v39 = vpop.permute.xlu1 %2477 }
 0x3cb   :  { %2490 = vperm.xlu2 %5141, %v26_v13   ;;  %2498 = vperm.xlu1 %5142, %v6827_v60   ;;  %v1971_v60 = vld [vmem:[%s8538_s2] sm:$0xff] }
 0x3cc   :  { %2467 = vperm.xlu0 %5081, %v26_v13   ;;  %4840 = vmatmul.msk.f32.vlgmr.msra.gmra.mxu0 %vm1990_vm0, %v1971_v60  ;;  %v4855_v13 = vld [vmem:[%s8538_s2 + $0x78] sm:$0xff] }
 0x3d3   :  { %2494 = vperm.xlu2 %5141, %v6832_v59   ;;  %5145 = vrot.lane.b32.xlu1 %v5131_v45, %s8608_s15  ;;  %v1972_v59 = vld [vmem:[%s8538_s2 + $0x8] sm:$0xff] }
 0x3d4   :  { %5137 = vrot.lane.b32.xlu0 %v5131_v45, %s8609_s16  ;;  %5244 = vset.pattern.permute.xlu1 %v8610_v28 }
 0x3d5   :  { %4841 = vmatmul.msk.f32.gmra.mxu0 %vm1990_vm0, %v1972_v59  ;;  %v4862_v59 = vld [vmem:[%s8538_s2 + $0x90] sm:$0xff] }
 0x3db   :  { %5155 = vrot.lane.b32.xlu2 %v5131_v45, %s8611_s25  ;;  %5160 = vrot.lane.b32.xlu1 %v5131_v45, %s8612_s27 }
 0x3dc   :  { %2482 = vperm.xlu0 %5081, %v29_v51   ;;  %5245 = vset.pattern.permute.xlu2 %v8610_v28 }
 0x3dd   :  { %4842 = vmatmul.msk.f32.gmra.mxu0 %vm1990_vm0, %v1973_v30  ;;  %v4884_v30 = vld [vmem:[%s8538_s2 + $0xe0] sm:$0xff] }
 0x3e4   :  { %5143 = vset.pattern.permute.xlu0 %v8605_v5 }
 0x3e5   :  { %2502 = vperm.xlu0 %5143, %v29_v51   ;;  %4843 = vmatmul.msk.f32.gmra.mxu0 %vm1990_vm0, %v1974_v42  ;;  %v4861_v51 = vld [vmem:[%s8538_s2 + $0x88] sm:$0xff]  ;;  %v4863_v42 = vld [vmem:[%s8538_s2 + $0x98] sm:$0xff] }
 0x3ed   :  { %5150 = vrot.lane.b32.xlu0 %v5131_v45, %s5284_s9  ;;  %v4871_v45 = vld [vmem:[%s8538_s2 + $0xb8] sm:$0xff] }
 0x41d   :  { %v5133_v14 = vpop.permute.xlu2 %5132 }
 0x41e   :  { %v5134_v54 = vunpack.i.l.bf16 %v5133_v14  ;;  %v5135_v15 = vunpack.i.h.bf16 %v5133_v14  ;;  %v4885_v14 = vld [vmem:[%s8538_s2 + $0xe8] sm:$0xff] }
 0x420   :  { %2110 = vmatpush.msrb.mxu0 %v5134_v54  ;;  %v4886_v54 = vld [vmem:[%s8538_s2 + $0xf0] sm:$0xff] }
 0x422   :  { %2111 = vmatpush.msrb.mxu0 %v5135_v15  ;;  %v4892_v15 = vld [vmem:[%s8538_s2 + $0x100] sm:$0xff] }
 0x423   :  { %4848 = vmatmul.msk.f32.vlgmr.msrb.gmra.mxu0 %vm1990_vm0, %v4844_v31  ;;  %v4887_v31 = vld [vmem:[%s8538_s2 + $0xf8] sm:$0xff] }
 0x425   :  { %v7018_v11 = vpop.permute.xlu2 %2490 }
 0x42b   :  { %4849 = vmatmul.msk.f32.gmra.mxu0 %vm1990_vm0, %v4845_v40  ;;  %v4893_v40 = vld [vmem:[%s8538_s2 + $0x108] sm:$0xff] }
 0x42d   :  { %v7026_v56 = vpop.permute.xlu2 %2494 }
 0x433   :  { %4850 = vmatmul.msk.f32.gmra.mxu0 %vm1990_vm0, %v4846_v47  ;;  %v4894_v47 = vld [vmem:[%s8538_s2 + $0x110] sm:$0xff] }
 0x435   :  { %v5128_v49 = vpop.permute.xlu1 %5127  ;;  %v5156_v0 = vpop.permute.xlu2 %5155 }
 0x436   :  { %v5121_v2 = vpop.permute.xlu0 %5120  ;;  %v5157_v29 = vunpack.i.l.bf16 %v5156_v0  ;;  %v5158_v10 = vunpack.i.h.bf16 %v5156_v0  ;;  %v5129_v19 = vunpack.i.l.bf16 %v5128_v49  ;;  %v5130_v18 = vunpack.i.h.bf16 %v5128_v49  ;;  %v4895_v49 = vld [vmem:[%s8538_s2 + $0x118] sm:$0xff] }
 0x437   :  { %v5122_v55 = vunpack.i.l.bf16 %v5121_v2  ;;  %v5123_v35 = vunpack.i.h.bf16 %v5121_v2 }
 0x438   :  { %2334 = vmatpush.msra.mxu0 %v5157_v29 }
 0x439   :  { %2017 = vmatpush.msra.mxu2 %v5122_v55 }
 0x43a   :  { %2335 = vmatpush.msra.mxu0 %v5158_v10 }
 0x43b   :  { %2018 = vmatpush.msra.mxu2 %v5123_v35  ;;  %4851 = vmatmul.msk.f32.gmra.mxu0 %vm1990_vm0, %v4847_v32 }
 0x43c   :  { %4836 = vmatmul.msk.f32.vlgmr.msra.gmra.mxu2 %vm1990_vm0, %v4832_v25 }
 0x43d   :  { %2222 = vmatpush.msrb.mxu2 %v5129_v19  ;;  %v7040_v46 = vpop.permute.xlu1 %2498 }
 0x43e   :  { %v7043_v48 = vpop.permute.xlu0 %2467 }
 0x43f   :  { %2223 = vmatpush.msrb.mxu2 %v5130_v18 }
 0x443   :  { %4880 = vmatmul.msk.f32.vlgmr.msra.gmra.mxu0 %vm1990_vm0, %v4876_v4 }
 0x444   :  { %4837 = vmatmul.msk.f32.gmra.mxu2 %vm1990_vm0, %v4833_v23 }
 0x445   :  { %v5146_v7 = vpop.permute.xlu1 %5145 }
 0x446   :  { %v5138_v33 = vpop.permute.xlu0 %5137  ;;  %v5147_v44 = vunpack.i.l.bf16 %v5146_v7  ;;  %v5148_v36 = vunpack.i.h.bf16 %v5146_v7 }
 0x447   :  { %v5139_v38 = vunpack.i.l.bf16 %v5138_v33  ;;  %v5140_v9 = vunpack.i.h.bf16 %v5138_v33 }
 0x448   :  { %2278 = vmatpush.msra.mxu3 %v5147_v44 }
 0x449   :  { %2166 = vmatpush.msra.mxu1 %v5139_v38  ;;  %v2061_v0 = vpop.f32.mrf.mxu0 }
 0x44a   :  { %2279 = vmatpush.msra.mxu3 %v5148_v36 }
 0x44b   :  { %2167 = vmatpush.msra.mxu1 %v5140_v9  ;;  %4872 = vmatmul.msk.f32.vlgmr.msra.gmra.mxu3 %vm1990_vm0, %v4868_v41 }
 0x44c   :  { %4838 = vmatmul.msk.f32.gmra.mxu2 %vm1990_vm0, %v4834_v63  ;;  %4856 = vmatmul.msk.f32.vlgmr.msra.gmra.mxu1 %vm1990_vm0, %v4852_v61 }
 0x44d   :  { %v5161_v62 = vpop.permute.xlu1 %5160  ;;  %4881 = vmatmul.msk.f32.gmra.mxu0 %vm1990_vm0, %v4877_v24 }
 0x44e   :  { %v5162_v34 = vunpack.i.l.bf16 %v5161_v62  ;;  %v7068_v20 = vpop.permute.xlu0 %2482  ;;  %v5163_v17 = vunpack.i.h.bf16 %v5161_v62 }
 0x450   :  { %2390 = vmatpush.msrb.mxu1 %v5162_v34 }
 0x452   :  { %2391 = vmatpush.msrb.mxu1 %v5163_v17  ;;  %v2064_v2 = vpop.f32.mrf.mxu0 }
 0x453   :  { %4873 = vmatmul.msk.f32.gmra.mxu3 %vm1990_vm0, %v4869_v50 }
 0x454   :  { %4839 = vmatmul.msk.f32.gmra.mxu2 %vm1990_vm0, %v4835_v16  ;;  %4857 = vmatmul.msk.f32.gmra.mxu1 %vm1990_vm0, %v4853_v3 }
 0x455   :  { %4882 = vmatmul.msk.f32.gmra.mxu0 %vm1990_vm0, %v4878_v22 }
 0x457   :  { %v7087_v53 = vpop.permute.xlu0 %2502 }
 0x45a   :  { %v2067_v29 = vpop.f32.mrf.mxu0 }
 0x45b   :  { %4874 = vmatmul.msk.f32.gmra.mxu3 %vm1990_vm0, %v4870_v12 }
 0x45c   :  { %4858 = vmatmul.msk.f32.gmra.mxu1 %vm1990_vm0, %v4854_v57  ;;  %4864 = vmatmul.msk.f32.vlgmr.msrb.gmra.mxu2 %vm1990_vm0, %v4860_v26 }
 0x45d   :  { %4883 = vmatmul.msk.f32.gmra.mxu0 %vm1990_vm0, %v4879_v8 }
 0x45f   :  { %v5151_v27 = vpop.permute.xlu0 %5150 }
 0x460   :  { %v5152_v1 = vunpack.i.l.bf16 %v5151_v27  ;;  %v5153_v60 = vunpack.i.h.bf16 %v5151_v27 }
 0x462   :  { %2446 = vmatpush.msra.mxu2 %v5152_v1  ;;  %v2070_v55 = vpop.f32.mrf.mxu0 }
 0x463   :  { %4875 = vmatmul.msk.f32.gmra.mxu3 %vm1990_vm0, %v4871_v45 }
 0x464   :  { %4859 = vmatmul.msk.f32.gmra.mxu1 %vm1990_vm0, %v4855_v13  ;;  %4865 = vmatmul.msk.f32.gmra.mxu2 %vm1990_vm0, %v4861_v51 }
 0x465   :  { %2447 = vmatpush.msra.mxu2 %v5153_v60 }
 0x46c   :  { %4866 = vmatmul.msk.f32.gmra.mxu2 %vm1990_vm0, %v4862_v59  ;;  %4888 = vmatmul.msk.f32.vlgmr.msrb.gmra.mxu1 %vm1990_vm0, %v4884_v30 }
 0x474   :  { %4867 = vmatmul.msk.f32.gmra.mxu2 %vm1990_vm0, %v4863_v42  ;;  %4889 = vmatmul.msk.f32.gmra.mxu1 %vm1990_vm0, %v4885_v14 }
 0x47c   :  { %4890 = vmatmul.msk.f32.gmra.mxu1 %vm1990_vm0, %v4886_v54  ;;  %4896 = vmatmul.msk.f32.vlgmr.msra.gmra.mxu2 %vm1990_vm0, %v4892_v15 }
 0x484   :  { %4891 = vmatmul.msk.f32.gmra.mxu1 %vm1990_vm0, %v4887_v31  ;;  %4897 = vmatmul.msk.f32.gmra.mxu2 %vm1990_vm0, %v4893_v40 }
 0x48c   :  { %4898 = vmatmul.msk.f32.gmra.mxu2 %vm1990_vm0, %v4894_v47 }
 0x494   :  { %4899 = vmatmul.msk.f32.gmra.mxu2 %vm1990_vm0, %v4895_v49 }
 0x4a0   :  { %v2113_v35 = vpop.f32.mrf.mxu0 }
 0x4a8   :  { %v2116_v32 = vpop.f32.mrf.mxu0 }
 0x4b0   :  { %v2119_v7 = vpop.f32.mrf.mxu0 }
 0x4b8   :  { %v2122_v38 = vpop.f32.mrf.mxu0 }
 0x4bf   :  { %v2020_v10 = vpop.f32.mrf.mxu2 }
 0x4c0   :  { %v2062_v24 = vadd.f32 %v2061_v0, %v2020_v10  ;;  %v2337_v3 = vpop.f32.mrf.mxu0 }
 0x4c2   :  { %v2125_v34 = vadd.f32 %v2113_v35, %v2062_v24 }
 0x4c7   :  { %v2023_v25 = vpop.f32.mrf.mxu2 }
 0x4c8   :  { %v2065_v40 = vadd.f32 %v2064_v2, %v2023_v25 }
 0x4c9   :  { %v2169_v19 = vpop.f32.mrf.mxu1 }
 0x4ca   :  { %v2181_v50 = vadd.f32 %v2169_v19, %v2125_v34  ;;  %v2340_v13 = vpop.f32.mrf.mxu0 }
 0x4ce   :  { %v2281_v17 = vpop.f32.mrf.mxu3 }
 0x4cf   :  { %v2026_v18 = vpop.f32.mrf.mxu2 }
 0x4d0   :  { %v2068_v27 = vadd.f32 %v2067_v29, %v2026_v18 }
 0x4d1   :  { %v2172_v23 = vpop.f32.mrf.mxu1 }
 0x4d2   :  { %v2127_v60 = vadd.f32 %v2119_v7, %v2068_v27  ;;  %v2343_v29 = vpop.f32.mrf.mxu0 }
 0x4d6   :  { %v2284_v8 = vpop.f32.mrf.mxu3 }
 0x4d7   :  { %v2029_v4 = vpop.f32.mrf.mxu2 }
 0x4d8   :  { %v2071_v44 = vadd.f32 %v2070_v55, %v2029_v4 }
 0x4d9   :  { %v2175_v33 = vpop.f32.mrf.mxu1 }
 0x4da   :  { %v2128_v41 = vadd.f32 %v2122_v38, %v2071_v44  ;;  %v2183_v42 = vadd.f32 %v2175_v33, %v2127_v60 }
 0x4de   :  { %v2287_v31 = vpop.f32.mrf.mxu3 }
 0x4df   :  { %v2225_v36 = vpop.f32.mrf.mxu2 }
 0x4e0   :  { %v2237_v16 = vadd.f32 %v2225_v36, %v2181_v50  ;;  %v2346_v36 = vpop.f32.mrf.mxu0 }
 0x4e1   :  { %v2178_v9 = vpop.f32.mrf.mxu1 }
 0x4e2   :  { %v2184_v63 = vadd.f32 %v2178_v9, %v2128_v41  ;;  %v2293_v57 = vadd.f32 %v2281_v17, %v2237_v16 }
 0x4e4   :  { %v2349_v1 = vadd.f32 %v2337_v3, %v2293_v57 }
 0x4e7   :  { %v2228_v61 = vpop.f32.mrf.mxu2 }
 0x4e9   :  { %v2393_v22 = vpop.f32.mrf.mxu1 }
 0x4ea   :  { %v2405_v45 = vadd.f32 %v2393_v22, %v2349_v1 }
 0x4ef   :  { %v2231_v62 = vpop.f32.mrf.mxu2 }
 0x4f0   :  { %v2239_v54 = vadd.f32 %v2231_v62, %v2183_v42 }
 0x4f1   :  { %v2396_v30 = vpop.f32.mrf.mxu1 }
 0x4f2   :  { %v2295_v0 = vadd.f32 %v2287_v31, %v2239_v54 }
 0x4f7   :  { %v2234_v12 = vpop.f32.mrf.mxu2 }
 0x4f8   :  { %v2240_v26 = vadd.f32 %v2234_v12, %v2184_v63 }
 0x4f9   :  { %v2399_v55 = vpop.f32.mrf.mxu1 }
 0x4ff   :  { %v2449_v51 = vpop.f32.mrf.mxu2 }
 0x500   :  { %v2461_v59 = vadd.f32 %v2449_v51, %v2405_v45 }
 0x501   :  { %v2402_v41 = vpop.f32.mrf.mxu1 }
 0x502   :  { %v2485_v14 = vmul.f32 %v7043_v48, %v2461_v59  ;;  %v2126_v48 = vadd.f32 %v2116_v32, %v2065_v40 }
 0x504   :  { %v2505_v15 = vadd.f32 %v7018_v11, %v2485_v14  ;;  %v2182_v10 = vadd.f32 %v2172_v23, %v2126_v48  ;;  %v2351_v11 = vadd.f32 %v2343_v29, %v2295_v0 }
 0x506   :  { %v7159_v47 = vmax.f32 %v2505_v15, 0.0  ;;  %v2238_v35 = vadd.f32 %v2228_v61, %v2182_v10  ;;  %v2407_v2 = vadd.f32 %v2399_v55, %v2351_v11 }
 0x507   :  { %v2452_v49 = vpop.f32.mrf.mxu2 }
 0x508   :  { %2541 = vrot.lane.b32.xlu0 %v7159_v47, %s5289_s18  ;;  %2529 = vrot.lane.b32.xlu2 %v7159_v47, %s5284_s9  ;;  %v2294_v18 = vadd.f32 %v2284_v8, %v2238_v35  ;;  %v2627_v8 = vrot.slane %v7159_v47, 4 }
 0x509   :  { %2517 = vrot.lane.b32.xlu1 %v7159_v47, %s5286_s11 }
 0x50a   :  { %v2350_v33 = vadd.f32 %v2340_v13, %v2294_v18 }
 0x50c   :  { %v2406_v23 = vadd.f32 %v2396_v30, %v2350_v33 }
 0x50e   :  { %v2462_v44 = vadd.f32 %v2452_v49, %v2406_v23 }
 0x50f   :  { %v2455_v25 = vpop.f32.mrf.mxu2 }
 0x510   :  { %v2463_v19 = vadd.f32 %v2455_v25, %v2407_v2  ;;  %2565 = vrot.lane.b32.xlu2 %v7159_v47, %s5291_s19  ;;  %v2486_v38 = vmul.f32 %v7008_v6, %v2462_v44  ;;  %v2290_v6 = vpop.f32.mrf.mxu3 }
 0x511   :  { %2589 = vrot.lane.b32.xlu1 %v7159_v47, %s5295_s24 }
 0x512   :  { %v2487_v7 = vmul.f32 %v7021_v39, %v2463_v19  ;;  %v2506_v39 = vadd.f32 %v7026_v56, %v2486_v38  ;;  %v2296_v56 = vadd.f32 %v2290_v6, %v2240_v26 }
 0x514   :  { %v2507_v4 = vadd.f32 %v7040_v46, %v2487_v7  ;;  %v7189_v46 = vmax.f32 %v2506_v39, 0.0  ;;  %v2352_v9 = vadd.f32 %v2346_v36, %v2296_v56 }
 0x516   :  { %v7173_v32 = vmax.f32 %v2507_v4, 0.0  ;;  %v2408_v61 = vadd.f32 %v2402_v41, %v2352_v9 }
 0x517   :  { %v2458_v63 = vpop.f32.mrf.mxu2 }
 0x518   :  { %2553 = vrot.lane.b32.xlu2 %v7159_v47, %s5292_s20  ;;  %2533 = vrot.lane.b32.xlu0 %v7173_v32, %s5284_s9  ;;  %v2464_v24 = vadd.f32 %v2458_v63, %v2408_v61 }
 0x519   :  { %2577 = vrot.lane.b32.xlu1 %v7159_v47, %s5290_s1 }
 0x51a   :  { %v2488_v62 = vmul.f32 %v7068_v20, %v2464_v24 }
 0x51c   :  { %v2508_v34 = vadd.f32 %v7087_v53, %v2488_v62 }
 0x51e   :  { %v7217_v17 = vmax.f32 %v2508_v34, 0.0 }
 0x520   :  { %2613 = vrot.lane.b32.xlu2 %v7159_v47, %s5293_s21  ;;  %2581 = vrot.lane.b32.xlu0 %v7173_v32, %s5290_s1 }
 0x521   :  { %2601 = vrot.lane.b32.xlu1 %v7159_v47, %s5294_s22 }
 0x528   :  { %2519 = vrot.lane.b32.xlu2 %v7189_v46, %s5286_s11  ;;  %2569 = vrot.lane.b32.xlu0 %v7173_v32, %s5291_s19 }
 0x529   :  { %2531 = vrot.lane.b32.xlu1 %v7189_v46, %s5284_s9 }
 0x530   :  { %2567 = vrot.lane.b32.xlu2 %v7189_v46, %s5291_s19  ;;  %2557 = vrot.lane.b32.xlu0 %v7173_v32, %s5292_s20 }
 0x531   :  { %2543 = vrot.lane.b32.xlu1 %v7189_v46, %s5289_s18 }
 0x538   :  { %2555 = vrot.lane.b32.xlu2 %v7189_v46, %s5292_s20  ;;  %2617 = vrot.lane.b32.xlu0 %v7173_v32, %s5293_s21 }
 0x539   :  { %2591 = vrot.lane.b32.xlu1 %v7189_v46, %s5295_s24 }
 0x540   :  { %2593 = vrot.lane.b32.xlu2 %v7173_v32, %s5295_s24  ;;  %2605 = vrot.lane.b32.xlu0 %v7173_v32, %s5294_s22 }
 0x541   :  { %2579 = vrot.lane.b32.xlu1 %v7189_v46, %s5290_s1 }
 0x548   :  { %2535 = vrot.lane.b32.xlu2 %v7217_v17, %s5284_s9  ;;  %2523 = vrot.lane.b32.xlu0 %v7217_v17, %s5286_s11 }
 0x549   :  { %2615 = vrot.lane.b32.xlu1 %v7189_v46, %s5293_s21 }
 0x550   :  { %2583 = vrot.lane.b32.xlu2 %v7217_v17, %s5290_s1  ;;  %2547 = vrot.lane.b32.xlu0 %v7217_v17, %s5289_s18 }
 0x551   :  { %2603 = vrot.lane.b32.xlu1 %v7189_v46, %s5294_s22 }
 0x558   :  { %2571 = vrot.lane.b32.xlu2 %v7217_v17, %s5291_s19  ;;  %2619 = vrot.lane.b32.xlu0 %v7217_v17, %s5293_s21 }
 0x559   :  { %2521 = vrot.lane.b32.xlu1 %v7173_v32, %s5286_s11 }
 0x560   :  { %2559 = vrot.lane.b32.xlu2 %v7217_v17, %s5292_s20  ;;  %2607 = vrot.lane.b32.xlu0 %v7217_v17, %s5294_s22 }
 0x561   :  { %2545 = vrot.lane.b32.xlu1 %v7173_v32, %s5289_s18 }
 0x562   :  { %v2530_v20 = vpop.permute.xlu2 %2529 }
 0x563   :  { %v2628_v13 = vsel %vm452_vm2, %v2530_v20, %v2627_v8  ;;  %v2625_v59 = vrot.slane %v2530_v20, 4 }
 0x564   :  { %v7253_v15 = vperm.slane %v2628_v13, %v5644_v58 }
 0x565   :  { %v2626_v29 = vsel %vm452_vm2, %v2625_v59, %v7159_v47 }
 0x566   :  { %v2687_v18 = vrot.slane %v7253_v15, 4  ;;  %v2632_v41 = vperm.slane %v2626_v29, %v5644_v58 }
 0x569   :  { %2595 = vrot.lane.b32.xlu1 %v7217_v17, %s5295_s24 }
 0x56a   :  { %v2566_v53 = vpop.permute.xlu2 %2565 }
 0x56b   :  { %v2663_v0 = vrot.slane %v2566_v53, 4 }
 0x572   :  { %v2554_v16 = vpop.permute.xlu2 %2553 }
 0x573   :  { %v2651_v27 = vrot.slane %v2554_v16, 4 }
 0x57a   :  { %v2542_v22 = vpop.permute.xlu0 %2541  ;;  %v2614_v12 = vpop.permute.xlu2 %2613 }
 0x57b   :  { %v2518_v50 = vpop.permute.xlu1 %2517  ;;  %v2637_v57 = vrot.slane %v2542_v22, 4  ;;  %v2747_v1 = vrot.slane %v2614_v12, 4  ;;  %v2752_v14 = vperm.slane %v2614_v12, %v5644_v58 }
 0x57c   :  { %v2639_v45 = vrot.slane %v2518_v50, 4 }
 0x57d   :  { %v2638_v51 = vsel %vm452_vm2, %v2637_v57, %v2518_v50  ;;  %v2748_v42 = vsel %vm452_vm2, 0.0, %v2747_v1  ;;  %v2757_v35 = vrot.slane %v2752_v14, 4 }
 0x57e   :  { %v2640_v54 = vsel %vm452_vm2, %v2542_v22, %v2639_v45  ;;  %v7256_v31 = vperm.slane %v2638_v51, %v5644_v58  ;;  %v2756_v48 = vperm.slane %v2748_v42, %v5644_v58 }
 0x57f   :  { %v2648_v55 = vperm.slane %v2640_v54, %v5644_v58 }
 0x580   :  { %v2673_v7 = vrot.slane %v7256_v31, 4  ;;  %v2769_v39 = vrot.slane %v2756_v48, 4 }
 0x581   :  { %v2688_v36 = vsel %vm452_vm2, %v2648_v55, %v2687_v18  ;;  %v2685_v42 = vrot.slane %v2648_v55, 4 }
 0x582   :  { %v7287_v50 = vperm.slane %v2688_v36, %v5732_v43 }
 0x583   :  { %v2590_v3 = vpop.permute.xlu1 %2589 }
 0x584   :  { %v2661_v30 = vrot.slane %v2590_v3, 4  ;;  %v2664_v2 = vsel %vm452_vm2, %v2590_v3, %v2663_v0 }
 0x585   :  { %v2672_v6 = vperm.slane %v2664_v2, %v5644_v58 }
 0x586   :  { %v2662_v10 = vsel %vm452_vm2, %v2661_v30, %v2566_v53  ;;  %v2735_v30 = vrot.slane %v7287_v50, 4 }
 0x587   :  { %v2668_v33 = vperm.slane %v2662_v10, %v5644_v58  ;;  %v2709_v3 = vrot.slane %v2672_v6, 4 }
 0x589   :  { %v2697_v20 = vrot.slane %v2668_v33, 4 }
 0x58a   :  { %v7313_v29 = vpop.permute.xlu0 %2533 }
 0x58b   :  { %v2578_v26 = vpop.permute.xlu1 %2577 }
 0x58c   :  { %v2652_v60 = vsel %vm452_vm2, %v2578_v26, %v2651_v27  ;;  %v2649_v40 = vrot.slane %v2578_v26, 4 }
 0x58d   :  { %v2660_v49 = vperm.slane %v2652_v60, %v5644_v58 }
 0x58e   :  { %v2650_v4 = vsel %vm452_vm2, %v2649_v40, %v2554_v16  ;;  %v2674_v16 = vsel %vm452_vm2, %v2673_v7, %v2632_v41 }
 0x58f   :  { %v2711_v47 = vrot.slane %v2660_v49, 4  ;;  %v2656_v9 = vperm.slane %v2650_v4, %v5644_v58  ;;  %v2710_v45 = vsel %vm452_vm2, %v2709_v3, %v2660_v49  ;;  %v2680_v60 = vperm.slane %v2674_v16, %v5732_v43 }
 0x590   :  { %v2716_v54 = vperm.slane %v2710_v45, %v5732_v43 }
 0x591   :  { %v2712_v34 = vsel %vm452_vm2, %v2672_v6, %v2711_v47  ;;  %v2699_v26 = vrot.slane %v2656_v9, 4  ;;  %v2698_v1 = vsel %vm452_vm2, %v2697_v20, %v2656_v9 }
 0x592   :  { %v7296_v27 = vperm.slane %v2712_v34, %v5732_v43  ;;  %v2729_v18 = vrot.slane %v2716_v54, 4 }
 0x593   :  { %v2602_v11 = vpop.permute.xlu1 %2601  ;;  %v2700_v0 = vsel %vm452_vm2, %v2668_v33, %v2699_v26 }
 0x594   :  { %v2737_v25 = vrot.slane %v2602_v11, 4  ;;  %v2742_v19 = vperm.slane %v2602_v11, %v5644_v58  ;;  %v2736_v40 = vsel %vm452_vm2, %v7296_v27, %v2735_v30  ;;  %v2708_v2 = vperm.slane %v2700_v0, %v5732_v43 }
 0x595   :  { %v3323_v55 = vsel %vm1452_vm1, %v2736_v40, -inf }
 0x596   :  { %v2738_v23 = vsel %vm452_vm2, 0.0, %v2737_v25  ;;  %v7272_v44 = vsel %vm452_vm2, %v2757_v35, %v2742_v19  ;;  %v2759_v38 = vrot.slane %v2742_v19, 4  ;;  %v2686_v35 = vsel %vm452_vm2, %v2685_v42, %v7253_v15  ;;  %v2520_v15 = vpop.permute.xlu2 %2519 }
 0x597   :  { %v2746_v56 = vperm.slane %v2738_v23, %v5644_v58  ;;  %v2675_v25 = vrot.slane %v2632_v41, 4  ;;  %v2692_v47 = vperm.slane %v2686_v35, %v5732_v43  ;;  %v2725_v23 = vrot.slane %v2708_v2, 4 }
 0x598   :  { %v2760_v63 = vsel %vm452_vm2, %v2752_v14, %v2759_v38  ;;  %v2704_v14 = vperm.slane %v2698_v1, %v5732_v43  ;;  %v2803_v0 = vrot.slane %v2520_v15, 4 }
 0x599   :  { %v2771_v61 = vrot.slane %v2746_v56, 4  ;;  %v2768_v24 = vperm.slane %v2760_v63, %v5732_v43  ;;  %v2770_v62 = vsel %vm452_vm2, %v2769_v39, %v2746_v56  ;;  %v2676_v33 = vsel %vm452_vm2, %v7256_v31, %v2675_v25  ;;  %v7331_v56 = vpop.permute.xlu0 %2581 }
 0x59a   :  { %v7284_v53 = vperm.slane %v2770_v62, %v5732_v43  ;;  %v2721_v7 = vrot.slane %v2704_v14, 4  ;;  %v2730_v38 = vsel %vm452_vm2, %v2729_v18, %v2692_v47  ;;  %v2684_v6 = vperm.slane %v2676_v33, %v5732_v43 }
 0x59b   :  { %v7290_v22 = vpop.permute.xlu1 %2531  ;;  %v3296_v12 = vsel %vm1465_vm3, %v2768_v24, -inf  ;;  %v2783_v57 = vrot.slane %v2768_v24, 4  ;;  %v2772_v51 = vsel %vm452_vm2, %v2756_v48, %v2771_v61  ;;  %v2723_v48 = vrot.slane %v2680_v60, 4 }
 0x59c   :  { %3297 = vmax.xlane.f32.xlu0 %v3296_v12  ;;  %v3308_v8 = vsel %vm1465_vm3, %v7284_v53, -inf  ;;  %v7310_v49 = vperm.slane %v2772_v51, %v5732_v43  ;;  %v2722_v39 = vsel %vm452_vm2, %v2721_v7, %v2680_v60  ;;  %v3305_v41 = vsel %vm1452_vm1, %v2730_v38, -inf }
 0x59d   :  { %3309 = vmax.xlane.f32.xlu2 %v3308_v8  ;;  %v2784_v13 = vsel %vm452_vm2, 0.0, %v2783_v57  ;;  %v2724_v11 = vsel %vm452_vm2, %v2704_v14, %v2723_v48  ;;  %v2726_v9 = vsel %vm452_vm2, %v2725_v23, %v2684_v6  ;;  %v3281_v31 = vsel %vm1452_vm1, %v2722_v39, -inf }
 0x59e   :  { %v3302_v59 = vsel %vm1465_vm3, %v2784_v13, -inf  ;;  %v3320_v19 = vsel %vm1465_vm3, %v7310_v49, -inf  ;;  %v3287_v4 = vsel %vm1452_vm1, %v2724_v11, -inf  ;;  %v3293_v63 = vsel %vm1452_vm1, %v2726_v9, -inf  ;;  %v2568_v20 = vpop.permute.xlu2 %2567 }
 0x59f   :  { %3303 = vmax.xlane.f32.xlu1 %v3302_v59  ;;  %v2731_v61 = vrot.slane %v2692_v47, 4  ;;  %v2727_v24 = vrot.slane %v2684_v6, 4  ;;  %v2733_v57 = vrot.slane %v7296_v27, 4  ;;  %v2785_v8 = vrot.slane %v7284_v53, 4 }
 0x5a0   :  { %v2787_v53 = vrot.slane %v7310_v49, 4 }
 0x5a1   :  { %v2732_v62 = vsel %vm452_vm2, %v2716_v54, %v2731_v61  ;;  %v2728_v34 = vsel %vm452_vm2, %v2708_v2, %v2727_v24  ;;  %v7344_v26 = vpop.permute.xlu0 %2569  ;;  %v2734_v45 = vsel %vm452_vm2, %v2733_v57, %v7287_v50  ;;  %v2786_v13 = vsel %vm452_vm2, 0.0, %v2785_v8 }
 0x5a2   :  { %v3311_v3 = vsel %vm1452_vm1, %v2732_v62, -inf  ;;  %v3299_v12 = vsel %vm1452_vm1, %v2728_v34, -inf  ;;  %v3317_v59 = vsel %vm1452_vm1, %v2734_v45, -inf  ;;  %v3314_v14 = vsel %vm1465_vm3, %v2786_v13, -inf }
 0x5a3   :  { %v7315_v10 = vpop.permute.xlu1 %2543  ;;  %v2791_v54 = vrot.slane %v7189_v46, 4  ;;  %v2789_v50 = vrot.slane %v7290_v22, 4 }
 0x5a4   :  { %3324 = vmax.xlane.f32.xlu0 %v3323_v55  ;;  %v2801_v1 = vrot.slane %v7315_v10, 4 }
 0x5a5   :  { %3321 = vmax.xlane.f32.xlu2 %v3320_v19  ;;  %v2792_v55 = vsel %vm452_vm2, %v7290_v22, %v2791_v54  ;;  %v2788_v19 = vsel %vm452_vm2, 0.0, %v2787_v53  ;;  %v2790_v7 = vsel %vm452_vm2, %v2789_v50, %v7189_v46  ;;  %v2804_v22 = vsel %vm452_vm2, %v7315_v10, %v2803_v0 }
 0x5a6   :  { %v2802_v51 = vsel %vm452_vm2, %v2801_v1, %v2520_v15  ;;  %v2556_v30 = vpop.permute.xlu2 %2555  ;;  %v3326_v39 = vsel %vm1465_vm3, %v2788_v19, -inf  ;;  %v2796_v10 = vperm.slane %v2790_v7, %v5644_v58 }
 0x5a7   :  { %3288 = vmax.xlane.f32.xlu1 %v3287_v4  ;;  %v7359_v40 = vperm.slane %v2802_v51, %v5644_v58  ;;  %v2815_v48 = vrot.slane %v2556_v30, 4  ;;  %v7373_v4 = vperm.slane %v2792_v55, %v5644_v58 }
 0x5a9   :  { %v7363_v11 = vpop.permute.xlu0 %2557  ;;  %v2837_v47 = vrot.slane %v7359_v40, 4 }
 0x5ab   :  { %v7333_v36 = vpop.permute.xlu1 %2591  ;;  %v2838_v45 = vsel %vm452_vm2, %v2837_v47, %v2796_v10 }
 0x5ac   :  { %3306 = vmax.xlane.f32.xlu0 %v3305_v41  ;;  %v2825_v27 = vrot.slane %v7333_v36, 4  ;;  %v2844_v50 = vperm.slane %v2838_v45, %v5732_v43 }
 0x5ad   :  { %3282 = vmax.xlane.f32.xlu2 %v3281_v31  ;;  %v2827_v31 = vrot.slane %v2568_v20, 4 }
 0x5ae   :  { %v2826_v2 = vsel %vm452_vm2, %v2825_v27, %v2568_v20 }
 0x5af   :  { %3294 = vmax.xlane.f32.xlu1 %v3293_v63  ;;  %v2832_v33 = vperm.slane %v2826_v2, %v5644_v58  ;;  %v7388_v63 = vperm.slane %v2804_v22, %v5644_v58  ;;  %v2887_v22 = vrot.slane %v2844_v50, 4 }
 0x5b1   :  { %v2861_v57 = vrot.slane %v2832_v33, 4  ;;  %v7402_v13 = vpop.permute.xlu0 %2617 }
 0x5b3   :  { %v2580_v16 = vpop.permute.xlu1 %2579 }
 0x5b4   :  { %3312 = vmax.xlane.f32.xlu0 %v3311_v3  ;;  %v2813_v35 = vrot.slane %v2580_v16, 4  ;;  %v2816_v18 = vsel %vm452_vm2, %v2580_v16, %v2815_v48  ;;  %v2851_v16 = vrot.slane %v7373_v4, 4  ;;  %v2828_v3 = vsel %vm452_vm2, %v7333_v36, %v2827_v31 }
 0x5b5   :  { %3300 = vmax.xlane.f32.xlu2 %v3299_v12  ;;  %v7383_v6 = vperm.slane %v2816_v18, %v5644_v58 }
 0x5b6   :  { %v2814_v23 = vsel %vm452_vm2, %v2813_v35, %v2556_v30  ;;  %v2852_v36 = vsel %vm452_vm2, %v7388_v63, %v2851_v16  ;;  %v2836_v30 = vperm.slane %v2828_v3, %v5644_v58 }
 0x5b7   :  { %v2820_v61 = vperm.slane %v2814_v23, %v5644_v58  ;;  %v2875_v8 = vrot.slane %v7383_v6, 4  ;;  %v2860_v35 = vperm.slane %v2852_v36, %v5732_v43  ;;  %v3080_v36 = vperm.slane %v7402_v13, %v5644_v58 }
 0x5b8   :  { %v2873_v45 = vrot.slane %v2836_v30, 4 }
 0x5b9   :  { %v2876_v55 = vsel %vm452_vm2, %v2836_v30, %v2875_v8  ;;  %v2863_v19 = vrot.slane %v2820_v61, 4 }
 0x5ba   :  { %v2884_v47 = vperm.slane %v2876_v55, %v5732_v43 }
 0x5bb   :  { %v2616_v60 = vpop.permute.xlu1 %2615 }
 0x5bc   :  { %v2911_v42 = vrot.slane %v2616_v60, 4  ;;  %3318 = vmax.xlane.f32.xlu0 %v3317_v59  ;;  %v2916_v25 = vperm.slane %v2616_v60, %v5644_v58 }
 0x5bd   :  { %3315 = vmax.xlane.f32.xlu2 %v3314_v14 }
 0x5be   :  { %v2912_v49 = vsel %vm452_vm2, 0.0, %v2911_v42  ;;  %v2921_v46 = vrot.slane %v2916_v25, 4  ;;  %v2862_v42 = vsel %vm452_vm2, %v2861_v57, %v2820_v61 }
 0x5bf   :  { %v2920_v15 = vperm.slane %v2912_v49, %v5644_v58  ;;  %v2868_v49 = vperm.slane %v2862_v42, %v5732_v43 }
 0x5c1   :  { %v2933_v20 = vrot.slane %v2920_v15, 4 }
 0x5c3   :  { %v2604_v38 = vpop.permute.xlu1 %2603 }
 0x5c4   :  { %v2901_v41 = vrot.slane %v2604_v38, 4  ;;  %v2906_v9 = vperm.slane %v2604_v38, %v5644_v58  ;;  %v2899_v38 = vrot.slane %v2860_v35, 4 }
 0x5c5   :  { %3327 = vmax.xlane.f32.xlu2 %v3326_v39  ;;  %v2864_v39 = vsel %vm452_vm2, %v2832_v33, %v2863_v19 }
 0x5c6   :  { %v2902_v24 = vsel %vm452_vm2, 0.0, %v2901_v41  ;;  %v7393_v62 = vsel %vm452_vm2, %v2921_v46, %v2906_v9  ;;  %v2923_v34 = vrot.slane %v2906_v9, 4  ;;  %v7433_v46 = vpop.permute.xlu0 %2605  ;;  %v2900_v9 = vsel %vm452_vm2, %v2884_v47, %v2899_v38 }
 0x5c7   :  { %v2910_v12 = vperm.slane %v2902_v24, %v5644_v58  ;;  %v2872_v24 = vperm.slane %v2864_v39, %v5732_v43  ;;  %v3070_v33 = vperm.slane %v7433_v46, %v5644_v58  ;;  %v3065_v39 = vrot.slane %v7433_v46, 4 }
 0x5c8   :  { %v2924_v1 = vsel %vm452_vm2, %v2916_v25, %v2923_v34  ;;  %v2839_v25 = vrot.slane %v2796_v10, 4  ;;  %v3371_v34 = vsel %vm1452_vm1, %v2900_v9, -inf }
 0x5c9   :  { %v2935_v51 = vrot.slane %v2910_v12, 4  ;;  %v2932_v60 = vperm.slane %v2924_v1, %v5732_v43  ;;  %v2934_v59 = vsel %vm452_vm2, %v2933_v20, %v2910_v12  ;;  %v2897_v20 = vrot.slane %v2884_v47, 4  ;;  %v7449_v1 = vpop.permute.xlu2 %2593 }
 0x5ca   :  { %v7410_v27 = vperm.slane %v2934_v59, %v5732_v43  ;;  %v2840_v23 = vsel %vm452_vm2, %v7359_v40, %v2839_v25  ;;  %v2885_v40 = vrot.slane %v2868_v49, 4  ;;  %v3087_v8 = vrot.slane %v3070_v33, 4 }
 0x5cb   :  { %v7413_v14 = vpop.permute.xlu1 %2521  ;;  %v3344_v53 = vsel %vm1465_vm3, %v2932_v60, -inf  ;;  %v2947_v54 = vrot.slane %v2932_v60, 4  ;;  %v2936_v48 = vsel %vm452_vm2, %v2920_v15, %v2935_v51  ;;  %v2888_v15 = vsel %vm452_vm2, %v2868_v49, %v2887_v22 }
 0x5cc   :  { %3345 = vmax.xlane.f32.xlu0 %v3344_v53  ;;  %v3356_v0 = vsel %vm1465_vm3, %v7410_v27, -inf  ;;  %v7426_v7 = vperm.slane %v2936_v48, %v5732_v43  ;;  %v2848_v31 = vperm.slane %v2840_v23, %v5732_v43  ;;  %v3335_v61 = vsel %vm1452_vm1, %v2888_v15, -inf }
 0x5cd   :  { %3357 = vmax.xlane.f32.xlu2 %v3356_v0  ;;  %v2948_v2 = vsel %vm452_vm2, 0.0, %v2947_v54  ;;  %v2886_v12 = vsel %vm452_vm2, %v2885_v40, %v2844_v50  ;;  %v2898_v59 = vsel %vm452_vm2, %v2897_v20, %v2860_v35  ;;  %v2889_v53 = vrot.slane %v2872_v24, 4 }
 0x5ce   :  { %v3350_v18 = vsel %vm1465_vm3, %v2948_v2, -inf  ;;  %v3368_v41 = vsel %vm1465_vm3, %v7426_v7, -inf  ;;  %v2891_v3 = vrot.slane %v2848_v31, 4  ;;  %v3329_v60 = vsel %vm1452_vm1, %v2886_v12, -inf }
 0x5cf   :  { %3351 = vmax.xlane.f32.xlu1 %v3350_v18  ;;  %v2953_v54 = vrot.slane %v7313_v29, 4  ;;  %v2874_v50 = vsel %vm452_vm2, %v2873_v45, %v7383_v6  ;;  %v2949_v30 = vrot.slane %v7410_v27, 4  ;;  %v2989_v0 = vrot.slane %v7449_v1, 4 }
 0x5d0   :  { %v2892_v57 = vsel %vm452_vm2, %v2872_v24, %v2891_v3  ;;  %v3365_v55 = vsel %vm1452_vm1, %v2898_v59, -inf  ;;  %v3088_v35 = vsel %vm452_vm2, %v3080_v36, %v3087_v8  ;;  %v2849_v2 = vrot.slane %v7388_v63, 4 }
 0x5d1   :  { %v3347_v42 = vsel %vm1452_vm1, %v2892_v57, -inf  ;;  %v2880_v49 = vperm.slane %v2874_v50, %v5732_v43  ;;  %v2890_v25 = vsel %vm452_vm2, %v2889_v53, %v2848_v31  ;;  %v2954_v6 = vsel %vm452_vm2, %v2953_v54, %v7173_v32  ;;  %v7506_v59 = vpop.permute.xlu2 %2535 }
 0x5d2   :  { %v2950_v27 = vsel %vm452_vm2, 0.0, %v2949_v30  ;;  %v3096_v19 = vperm.slane %v3088_v35, %v5732_v43  ;;  %v2990_v18 = vsel %vm452_vm2, %v2989_v0, %v7344_v26  ;;  %v3075_v22 = vrot.slane %v7402_v13, 4 }
 0x5d3   :  { %v7439_v10 = vpop.permute.xlu1 %2545  ;;  %v2977_v63 = vrot.slane %v7331_v56, 4  ;;  %v3341_v23 = vsel %vm1452_vm1, %v2890_v25, -inf  ;;  %v2850_v15 = vsel %vm452_vm2, %v2849_v2, %v7373_v4  ;;  %v2960_v38 = vperm.slane %v2954_v6, %v5644_v58 }
 0x5d4   :  { %3369 = vmax.xlane.f32.xlu0 %v3368_v41  ;;  %v2965_v16 = vrot.slane %v7439_v10, 4  ;;  %v3362_v41 = vsel %vm1465_vm3, %v2950_v27, -inf  ;;  %v2893_v9 = vrot.slane %v2880_v49, 4  ;;  %v2996_v31 = vperm.slane %v2990_v18, %v5644_v58 }
 0x5d5   :  { %3336 = vmax.xlane.f32.xlu2 %v3335_v61  ;;  %v2978_v13 = vsel %vm452_vm2, %v2977_v63, %v7363_v11  ;;  %v3085_v61 = vrot.slane %v3080_v36, 4  ;;  %v3111_v40 = vrot.slane %v3096_v19, 4  ;;  %v3076_v24 = vsel %vm452_vm2, 0.0, %v3075_v22 }
 0x5d6   :  { %v2966_v51 = vsel %vm452_vm2, %v2965_v16, %v7413_v14  ;;  %v3392_v4 = vsel %vm1465_vm3, %v3096_v19, -inf  ;;  %v2856_v46 = vperm.slane %v2850_v15, %v5732_v43  ;;  %v2984_v20 = vperm.slane %v2978_v13, %v5644_v58 }
 0x5d7   :  { %3372 = vmax.xlane.f32.xlu1 %v3371_v34  ;;  %v7464_v48 = vperm.slane %v2966_v51, %v5644_v58  ;;  %v7490_v34 = vpop.permute.xlu0 %2523  ;;  %v3086_v3 = vsel %vm452_vm2, %v3085_v61, %v3070_v33  ;;  %v3066_v12 = vsel %vm452_vm2, 0.0, %v3065_v39  ;;  %v7500_v8 = vperm.slane %v3076_v24, %v5644_v58 }
 0x5d8   :  { %v2894_v57 = vsel %vm452_vm2, %v2893_v9, %v2856_v46  ;;  %v3112_v45 = vsel %vm452_vm2, 0.0, %v3111_v40  ;;  %v3092_v36 = vperm.slane %v3086_v3, %v5732_v43  ;;  %v2991_v33 = vrot.slane %v7344_v26, 4 }
 0x5d9   :  { %v3001_v47 = vrot.slane %v7464_v48, 4  ;;  %v3353_v53 = vsel %vm1452_vm1, %v2894_v57, -inf  ;;  %v2955_v54 = vrot.slane %v7173_v32, 4  ;;  %v3027_v30 = vrot.slane %v2984_v20, 4 }
 0x5da   :  { %v3398_v0 = vsel %vm1465_vm3, %v3112_v45, -inf  ;;  %v3097_v35 = vrot.slane %v7500_v8, 4  ;;  %v2967_v2 = vrot.slane %v7413_v14, 4  ;;  %v3380_v32 = vsel %vm1465_vm3, %v3092_v36, -inf }
 0x5db   :  { %v3002_v16 = vsel %vm452_vm2, %v3001_v47, %v2960_v38  ;;  %v2956_v25 = vsel %vm452_vm2, %v7313_v29, %v2955_v54  ;;  %v2895_v6 = vrot.slane %v2856_v46, 4  ;;  %v2992_v27 = vsel %vm452_vm2, %v7449_v1, %v2991_v33 }
 0x5dc   :  { %3330 = vmax.xlane.f32.xlu0 %v3329_v60  ;;  %v7504_v51 = vperm.slane %v3002_v16, %v5732_v43  ;;  %v3025_v60 = vrot.slane %v2996_v31, 4  ;;  %v2968_v19 = vsel %vm452_vm2, %v7439_v10, %v2967_v2  ;;  %v3003_v18 = vrot.slane %v2960_v38, 4 }
 0x5dd   :  { %3348 = vmax.xlane.f32.xlu2 %v3347_v42  ;;  %v7511_v42 = vperm.slane %v3066_v12, %v5644_v58  ;;  %v3028_v22 = vsel %vm452_vm2, %v2996_v31, %v3027_v30  ;;  %v2896_v47 = vsel %vm452_vm2, %v2880_v49, %v2895_v6  ;;  %v2964_v63 = vperm.slane %v2956_v25, %v5644_v58 }
 0x5de   :  { %v3026_v50 = vsel %vm452_vm2, %v3025_v60, %v2984_v20  ;;  %v3051_v26 = vrot.slane %v7504_v51, 4  ;;  %v2976_v15 = vperm.slane %v2968_v19, %v5644_v58  ;;  %v3004_v39 = vsel %vm452_vm2, %v7464_v48, %v3003_v18 }
 0x5df   :  { %3366 = vmax.xlane.f32.xlu1 %v3365_v55  ;;  %v2979_v55 = vrot.slane %v7363_v11, 4  ;;  %v7529_v11 = vperm.slane %v3026_v50, %v5732_v43  ;;  %v3098_v14 = vsel %vm452_vm2, %v3097_v35, %v7511_v42  ;;  %v7534_v29 = vpop.permute.xlu0 %2547  ;;  %v7549_v49 = vperm.slane %v3028_v22, %v5732_v43 }
 0x5e0   :  { %v3104_v38 = vperm.slane %v3098_v14, %v5732_v43  ;;  %v2951_v13 = vrot.slane %v7426_v7, 4  ;;  %v7557_v61 = vperm.slane %v3004_v39, %v5732_v43  ;;  %v3015_v40 = vrot.slane %v2964_v63, 4 }
 0x5e1   :  { %v2980_v1 = vsel %vm452_vm2, %v7331_v56, %v2979_v55  ;;  %v3052_v10 = vsel %vm452_vm2, %v7529_v11, %v3051_v26  ;;  %v7552_v56 = vpop.permute.xlu2 %2583  ;;  %v3013_v24 = vrot.slane %v2976_v15, 4  ;;  %v3053_v46 = vrot.slane %v7549_v49, 4 }
 0x5e2   :  { %v2988_v9 = vperm.slane %v2980_v1, %v5644_v58  ;;  %v3383_v31 = vsel %vm1452_vm1, %v3052_v10, -inf  ;;  %v3109_v16 = vrot.slane %v3092_v36, 4  ;;  %v3099_v3 = vrot.slane %v7511_v42, 4 }
 0x5e3   :  { %v3016_v20 = vsel %vm452_vm2, %v2976_v15, %v3015_v40  ;;  %v2952_v12 = vsel %vm452_vm2, 0.0, %v2951_v13  ;;  %v3054_v57 = vsel %vm452_vm2, %v3053_v46, %v7557_v61  ;;  %v3014_v33 = vsel %vm452_vm2, %v3013_v24, %v2964_v63 }
 0x5e4   :  { %3342 = vmax.xlane.f32.xlu0 %v3341_v23  ;;  %v3000_v23 = vperm.slane %v2992_v27, %v5644_v58  ;;  %v3039_v45 = vrot.slane %v2988_v9, 4  ;;  %v3374_v54 = vsel %vm1465_vm3, %v2952_v12, -inf  ;;  %v3110_v36 = vsel %vm452_vm2, 0.0, %v3109_v16 }
 0x5e5   :  { %3363 = vmax.xlane.f32.xlu2 %v3362_v41  ;;  %v3359_v41 = vsel %vm1452_vm1, %v2896_v47, -inf  ;;  %v3389_v50 = vsel %vm1452_vm1, %v3054_v57, -inf  ;;  %v3100_v30 = vsel %vm452_vm2, %v7500_v8, %v3099_v3  ;;  %v3386_v35 = vsel %vm1465_vm3, %v3110_v36, -inf }
 0x5e6   :  { %v3037_v48 = vrot.slane %v3000_v23, 4  ;;  %v3040_v2 = vsel %vm452_vm2, %v3000_v23, %v3039_v45  ;;  %v7585_v26 = vperm.slane %v3100_v30, %v5732_v43  ;;  %v3113_v22 = vrot.slane %v3104_v38, 4 }
 0x5e7   :  { %3393 = vmax.xlane.f32.xlu1 %v3392_v4  ;;  %v3404_v4 = vsel %vm1465_vm3, %v3104_v38, -inf  ;;  %v2620_v60 = vpop.permute.xlu0 %2619  ;;  %v3048_v6 = vperm.slane %v3040_v2, %v5732_v43  ;;  %v3049_v63 = vrot.slane %v7529_v11, 4  ;;  %v2596_v38 = vpop.permute.xlu1 %2595  ;;  %v3055_v16 = vrot.slane %v7557_v61, 4 }
 0x5e8   :  { %v3038_v7 = vsel %vm452_vm2, %v3037_v48, %v2988_v9  ;;  %v3416_v27 = vsel %vm1465_vm3, %v7585_v26, -inf  ;;  %v3244_v1 = vperm.slane %v2620_v60, %v5644_v58  ;;  %v3239_v15 = vrot.slane %v2620_v60, 4 }
 0x5e9   :  { %v7572_v42 = vperm.slane %v3038_v7, %v5732_v43  ;;  %v7580_v55 = vpop.permute.xlu2 %2571  ;;  %v3114_v9 = vsel %vm452_vm2, 0.0, %v3113_v22  ;;  %v3119_v3 = vrot.slane %v7217_v17, 4 }
 0x5ea   :  { %v3249_v13 = vrot.slane %v3244_v1, 4  ;;  %v3240_v24 = vsel %vm452_vm2, 0.0, %v3239_v15  ;;  %v3410_v46 = vsel %vm1465_vm3, %v3114_v9, -inf  ;;  %v3155_v30 = vrot.slane %v7580_v55, 4 }
 0x5eb   :  { %v3057_v25 = vrot.slane %v7572_v42, 4  ;;  %v3248_v7 = vperm.slane %v3240_v24, %v5644_v58  ;;  %v3120_v60 = vsel %vm452_vm2, %v7506_v59, %v3119_v3  ;;  %v3129_v15 = vrot.slane %v7534_v29, 4 }
 0x5ec   :  { %3354 = vmax.xlane.f32.xlu0 %v3353_v53  ;;  %v3024_v53 = vperm.slane %v3016_v20, %v5732_v43  ;;  %v3115_v24 = vrot.slane %v7585_v26, 4 }
 0x5ed   :  { %3399 = vmax.xlane.f32.xlu2 %v3398_v0  ;;  %v7578_v0 = vperm.slane %v3014_v33, %v5732_v43  ;;  %v3131_v33 = vrot.slane %v7490_v34, 4 }
 0x5ef   :  { %3381 = vmax.xlane.f32.xlu1 %v3380_v32  ;;  %v3063_v32 = vrot.slane %v3024_v53, 4  ;;  %v3058_v8 = vsel %vm452_vm2, %v3057_v25, %v7578_v0  ;;  %v2608_v14 = vpop.permute.xlu0 %2607  ;;  %v3132_v2 = vsel %vm452_vm2, %v7534_v29, %v3131_v33  ;;  %v7707_v33 = vadd.s32 4294967286, %v6607_v37 }
 0x5f0   :  { %v3401_v18 = vsel %vm1452_vm1, %v3058_v8, -inf  ;;  %v3234_v10 = vperm.slane %v2608_v14, %v5644_v58  ;;  %v3229_v39 = vrot.slane %v2608_v14, 4  ;;  %v3261_v8 = vrot.slane %v3248_v7, 4 }
 0x5f1   :  { %v3064_v19 = vsel %vm452_vm2, %v3048_v6, %v3063_v32  ;;  %v7599_v23 = vpop.permute.xlu2 %2559  ;;  %v3128_v32 = vperm.slane %v3120_v60, %v5644_v58 }
 0x5f2   :  { %v3419_v47 = vsel %vm1452_vm1, %v3064_v19, -inf  ;;  %v3251_v40 = vrot.slane %v3234_v10, 4  ;;  %v3143_v20 = vrot.slane %v7599_v23, 4  ;;  %v3156_v19 = vsel %vm452_vm2, %v2596_v38, %v3155_v30 }
 0x5f3   :  { %v3164_v9 = vperm.slane %v3156_v19, %v5644_v58 }
 0x5f4   :  { %3360 = vmax.xlane.f32.xlu0 %v3359_v41  ;;  %v3050_v41 = vsel %vm452_vm2, %v3049_v63, %v7504_v51  ;;  %v3250_v51 = vsel %vm452_vm2, %v3249_v13, %v3234_v10  ;;  %v3252_v61 = vsel %vm452_vm2, %v3244_v1, %v3251_v40  ;;  %v3141_v10 = vrot.slane %v7552_v56, 4 }
 0x5f5   :  { %3384 = vmax.xlane.f32.xlu2 %v3383_v31  ;;  %v3061_v31 = vrot.slane %v3048_v6, 4  ;;  %v3377_v11 = vsel %vm1452_vm1, %v3050_v41, -inf  ;;  %v7631_v36 = vperm.slane %v3250_v51, %v5732_v43  ;;  %v3117_v41 = vrot.slane %v7506_v59, 4 }
 0x5f6   :  { %v3201_v60 = vrot.slane %v3164_v9, 4 }
 0x5f7   :  { %3405 = vmax.xlane.f32.xlu1 %v3404_v4  ;;  %v3062_v48 = vsel %vm452_vm2, %v3061_v31, %v3024_v53  ;;  %v3230_v4 = vsel %vm452_vm2, 0.0, %v3229_v39  ;;  %v3428_v14 = vsel %vm1465_vm3, %v7631_v36, -inf }
 0x5f8   :  { %v3413_v12 = vsel %vm1452_vm1, %v3062_v48, -inf  ;;  %v3238_v57 = vperm.slane %v3230_v4, %v5644_v58 }
 0x5fa   :  { %v3263_v6 = vrot.slane %v3238_v57, 4  ;;  %v3262_v1 = vsel %vm452_vm2, %v3261_v8, %v3238_v57  ;;  %v3116_v57 = vsel %vm452_vm2, 0.0, %v3115_v24 }
 0x5fb   :  { %v7677_v59 = vperm.slane %v3262_v1, %v5732_v43 }
 0x5fc   :  { %3375 = vmax.xlane.f32.xlu0 %v3374_v54  ;;  %v3056_v54 = vsel %vm452_vm2, %v7549_v49, %v3055_v16  ;;  %v7645_v49 = vperm.slane %v3252_v61, %v5732_v43  ;;  %v3273_v61 = vrot.slane %v7631_v36, 4 }
 0x5fd   :  { %3390 = vmax.xlane.f32.xlu2 %v3389_v50  ;;  %v3153_v50 = vrot.slane %v2596_v38, 4  ;;  %v3142_v38 = vsel %vm452_vm2, %v3141_v10, %v7599_v23  ;;  %v3130_v23 = vsel %vm452_vm2, %v3129_v15, %v7490_v34  ;;  %v7698_v34 = vadd.s32 4294967278, %v6607_v37 }
 0x5fe   :  { %v3440_v39 = vsel %vm1465_vm3, %v7645_v49, -inf  ;;  %v3148_v16 = vperm.slane %v3142_v38, %v5644_v58  ;;  %v3274_v19 = vsel %vm452_vm2, 0.0, %v3273_v61 }
 0x5ff   :  { %3387 = vmax.xlane.f32.xlu1 %v3386_v35  ;;  %v3144_v35 = vsel %vm452_vm2, %v7552_v56, %v3143_v20  ;;  %v3154_v63 = vsel %vm452_vm2, %v3153_v50, %v7580_v55  ;;  %v3264_v55 = vsel %vm452_vm2, %v3248_v7, %v3263_v6 }
 0x600   :  { %v3152_v22 = vperm.slane %v3144_v35, %v5644_v58  ;;  %v7670_v56 = vperm.slane %v3154_v63, %v5644_v58 }
 0x602   :  { %v3203_v40 = vrot.slane %v3152_v22, 4  ;;  %v3189_v26 = vrot.slane %v7670_v56, 4  ;;  %v3202_v63 = vsel %vm452_vm2, %v3201_v60, %v3152_v22  ;;  %v3277_v60 = vrot.slane %v7677_v59, 4 }
 0x603   :  { %v7743_v22 = vperm.slane %v3202_v63, %v5732_v43 }
 0x604   :  { %3417 = vmax.xlane.f32.xlu0 %v3416_v27  ;;  %v3395_v27 = vsel %vm1452_vm1, %v3056_v54, -inf  ;;  %v3204_v51 = vsel %vm452_vm2, %v3164_v9, %v3203_v40  ;;  %v3190_v8 = vsel %vm452_vm2, %v3189_v26, %v3148_v16  ;;  %v3191_v9 = vrot.slane %v3148_v16, 4 }
 0x605   :  { %3402 = vmax.xlane.f32.xlu2 %v3401_v18  ;;  %v3059_v18 = vrot.slane %v7578_v0, 4  ;;  %v3179_v0 = vrot.slane %v3128_v32, 4  ;;  %v7712_v50 = vperm.slane %v3204_v51, %v5732_v43 }
 0x606   :  { %v3192_v16 = vsel %vm452_vm2, %v7670_v56, %v3191_v9 }
 0x607   :  { %3420 = vmax.xlane.f32.xlu1 %v3419_v47  ;;  %v3140_v47 = vperm.slane %v3132_v2, %v5644_v58  ;;  %v3060_v13 = vsel %vm452_vm2, %v7572_v42, %v3059_v18  ;;  %v3118_v42 = vsel %vm452_vm2, %v3117_v41, %v7217_v17  ;;  %v3136_v17 = vperm.slane %v3130_v23, %v5644_v58 }
 0x608   :  { %v3407_v3 = vsel %vm1452_vm1, %v3060_v13, -inf  ;;  %v3124_v30 = vperm.slane %v3118_v42, %v5644_v58  ;;  %v3434_v41 = vsel %vm1465_vm3, %v3274_v19, -inf }
 0x609   :  { %v3180_v48 = vsel %vm452_vm2, %v3140_v47, %v3179_v0  ;;  %v3165_v6 = vrot.slane %v3136_v17, 4 }
 0x60a   :  { %v7694_v20 = vperm.slane %v3180_v48, %v5732_v43  ;;  %v3167_v23 = vrot.slane %v3124_v30, 4 }
 0x60c   :  { %3378 = vmax.xlane.f32.xlu0 %v3377_v11  ;;  %v3177_v11 = vrot.slane %v3140_v47, 4  ;;  %v3227_v37 = vrot.slane %v7694_v20, 4  ;;  %v3275_v47 = vrot.slane %v7645_v49, 4 }
 0x60d   :  { %3411 = vmax.xlane.f32.xlu2 %v3410_v46  ;;  %v7686_v46 = vperm.slane %v3264_v55, %v5732_v43 }
 0x60e   :  { %v3178_v7 = vsel %vm452_vm2, %v3177_v11, %v3128_v32  ;;  %v3276_v11 = vsel %vm452_vm2, 0.0, %v3275_v47  ;;  %v3278_v47 = vsel %vm452_vm2, 0.0, %v3277_v60 }
 0x60f   :  { %3414 = vmax.xlane.f32.xlu1 %v3413_v12  ;;  %v7618_v45 = vpop.xlane.xlu0 %3297  ;;  %v3452_v12 = vsel %vm1465_vm3, %v7677_v59, -inf  ;;  %v3464_v54 = vsel %vm1465_vm3, %v7686_v46, -inf  ;;  %v7725_v58 = vperm.slane %v3178_v7, %v5732_v43  ;;  %v3446_v61 = vsel %vm1465_vm3, %v3276_v11, -inf }
 0x610   :  { %v7626_v53 = vpop.xlane.xlu2 %3309  ;;  %v3634_v1 = vperm.slane %v7618_v45, %v7698_v34  ;;  %v3166_v45 = vsel %vm452_vm2, %v3165_v6, %v3124_v30  ;;  %v3458_v11 = vsel %vm1465_vm3, %v3278_v47, -inf }
 0x611   :  { %v3640_v2 = vperm.slane %v7626_v53, %v7698_v34  ;;  %v3228_v53 = vsel %vm452_vm2, %v7712_v50, %v3227_v37  ;;  %v3223_v48 = vrot.slane %v7725_v58, 4  ;;  %v3172_v51 = vperm.slane %v3166_v45, %v5732_v43 }
 0x612   :  { %v7642_v25 = vpop.xlane.xlu1 %3303  ;;  %v3467_v38 = vsel %vm1452_vm1, %v3228_v53, -inf }
 0x613   :  { %v3224_v7 = vsel %vm452_vm2, %v7743_v22, %v3223_v48  ;;  %v3215_v6 = vrot.slane %v3172_v51, 4  ;;  %v3221_v48 = vrot.slane %v7743_v22, 4 }
 0x614   :  { %3396 = vmax.xlane.f32.xlu0 %v3395_v27  ;;  %v3422_v27 = vsel %vm1465_vm3, %v3116_v57, -inf }
 0x615   :  { %3429 = vmax.xlane.f32.xlu2 %v3428_v14 }
 0x617   :  { %3441 = vmax.xlane.f32.xlu1 %v3440_v39  ;;  %v7664_v31 = vpop.xlane.xlu0 %3324  ;;  %v3196_v39 = vperm.slane %v3190_v8, %v5732_v43  ;;  %v3455_v8 = vsel %vm1452_vm1, %v3224_v7, -inf }
 0x618   :  { %v7672_v29 = vpop.xlane.xlu2 %3321  ;;  %v3648_v22 = vperm.slane %v7664_v31, %v7707_v33 }
 0x619   :  { %v3213_v24 = vrot.slane %v3196_v39, 4  ;;  %v3216_v19 = vsel %vm452_vm2, %v3196_v39, %v3215_v6 }
 0x61a   :  { %v7683_v4 = vpop.xlane.xlu1 %3288 }
 0x61b   :  { %v3515_v0 = vperm.slane %v7683_v4, %v6622_v52 }
 0x61c   :  { %3408 = vmax.xlane.f32.xlu0 %v3407_v3  ;;  %v3637_v3 = vperm.slane %v7642_v25, %v7698_v34  ;;  %v3214_v25 = vsel %vm452_vm2, %v3213_v24, %v3172_v51 }
 0x61d   :  { %3453 = vmax.xlane.f32.xlu2 %v3452_v12 }
 0x61f   :  { %3465 = vmax.xlane.f32.xlu1 %v3464_v54  ;;  %v3307_v35 = vpop.xlane.xlu0 %3306  ;;  %v3168_v54 = vsel %vm452_vm2, %v3136_v17, %v3167_v23 }
 0x620   :  { %v3639_v36 = vperm.slane %v3307_v35, %v7707_v33  ;;  %v7718_v32 = vpop.xlane.xlu2 %3282 }
 0x621   :  { %v3514_v10 = vperm.slane %v7718_v32, %v6622_v52 }
 0x622   :  { %v3641_v14 = vsel %vm3628_vm13, %v3640_v2, %v3639_v36  ;;  %v3295_v18 = vpop.xlane.xlu1 %3294  ;;  %v3200_v2 = vperm.slane %v3192_v16, %v5732_v43  ;;  %v3518_v36 = vperm.slane %v3307_v35, %v6622_v52  ;;  %v3222_v16 = vsel %vm452_vm2, %v3221_v48, %v7725_v58 }
 0x623   :  { %v3633_v15 = vperm.slane %v3295_v18, %v7707_v33  ;;  %v3516_v55 = vperm.slane %v3295_v18, %v6622_v52  ;;  %v3546_v13 = vsel %vm1784_vm6, %v3515_v0, %v3514_v10  ;;  %v3176_v18 = vperm.slane %v3168_v54, %v5732_v43 }
 0x624   :  { %3423 = vmax.xlane.f32.xlu0 %v3422_v27  ;;  %v3425_v27 = vsel %vm1452_vm1, %v3214_v25, -inf  ;;  %v3217_v63 = vrot.slane %v3200_v2, 4  ;;  %v2764_v25 = vperm.slane %v7272_v44, %v5732_v43 }
 0x625   :  { %v3635_v49 = vsel %vm3628_vm13, %v3634_v1, %v3633_v15  ;;  %3435 = vmax.xlane.f32.xlu2 %v3434_v41  ;;  %v3547_v57 = vsel %vm1786_vm7, %v3516_v55, %v3546_v13  ;;  %v2928_v1 = vperm.slane %v7393_v62, %v5732_v43  ;;  %v3521_v41 = vperm.slane %v7664_v31, %v6622_v52 }
 0x626   :  { %v3218_v13 = vsel %vm452_vm2, %v3217_v63, %v3176_v18 }
 0x627   :  { %v3313_v40 = vpop.xlane.xlu0 %3312  ;;  %3468 = vmax.xlane.f32.xlu1 %v3467_v38  ;;  %v3431_v38 = vsel %vm1452_vm1, %v3216_v19, -inf  ;;  %v2945_v23 = vrot.slane %v2928_v1, 4 }
 0x628   :  { %v3301_v42 = vpop.xlane.xlu2 %3300  ;;  %v3519_v53 = vperm.slane %v3313_v40, %v6622_v52  ;;  %v3642_v0 = vperm.slane %v3313_v40, %v7707_v33 }
 0x629   :  { %v3517_v26 = vperm.slane %v3301_v42, %v6622_v52  ;;  %v3636_v12 = vperm.slane %v3301_v42, %v7707_v33  ;;  %v3437_v42 = vsel %vm1452_vm1, %v3218_v13, -inf }
 0x62b   :  { %v3548_v56 = vsel %vm1788_vm8, %v3517_v26, %v3547_v57  ;;  %v3638_v30 = vsel %vm3628_vm13, %v3637_v3, %v3636_v12  ;;  %v2946_v26 = vsel %vm452_vm2, 0.0, %v2945_v23  ;;  %v3219_v12 = vrot.slane %v3176_v18, 4 }
 0x62c   :  { %v3724_v37 = vsel %vm1784_vm6, %v3638_v30, %v3635_v49  ;;  %3447 = vmax.xlane.f32.xlu0 %v3446_v61  ;;  %v3549_v17 = vsel %vm1790_vm9, %v3518_v36, %v3548_v56  ;;  %v3449_v57 = vsel %vm1452_vm1, %v3222_v16, -inf  ;;  %v3338_v58 = vsel %vm1465_vm3, %v2946_v26, -inf }
 0x62d   :  { %3456 = vmax.xlane.f32.xlu2 %v3455_v8  ;;  %v3725_v59 = vsel %vm1786_vm7, %v3641_v14, %v3724_v37  ;;  %v3646_v14 = vperm.slane %v7672_v29, %v7698_v34  ;;  %v3550_v49 = vsel %vm1792_vm10, %v3519_v53, %v3549_v17  ;;  %v3220_v61 = vsel %vm452_vm2, %v3200_v2, %v3219_v12 }
 0x62e   :  { %v3443_v31 = vsel %vm1452_vm1, %v3220_v61, -inf  ;;  %v3225_v56 = vrot.slane %v7712_v50, 4  ;;  %v3332_v2 = vsel %vm1465_vm3, %v2928_v1, -inf  ;;  %v2781_v8 = vrot.slane %v2764_v25, 4 }
 0x62f   :  { %v3319_v35 = vpop.xlane.xlu0 %3318  ;;  %3426 = vmax.xlane.f32.xlu1 %v3425_v27  ;;  %v3279_v17 = vrot.slane %v7686_v46, 4 }
 0x630   :  { %v3520_v10 = vperm.slane %v3319_v35, %v6622_v52  ;;  %v3645_v15 = vperm.slane %v3319_v35, %v7707_v33  ;;  %v3316_v39 = vpop.xlane.xlu2 %3315  ;;  %v3226_v37 = vsel %vm452_vm2, %v3225_v56, %v7694_v20  ;;  %v2782_v50 = vsel %vm452_vm2, 0.0, %v2781_v8 }
 0x631   :  { %v3643_v45 = vperm.slane %v3316_v39, %v7698_v34  ;;  %v3461_v6 = vsel %vm1452_vm1, %v3226_v37, -inf  ;;  %v3290_v43 = vsel %vm1465_vm3, %v2782_v50, -inf  ;;  %v3280_v44 = vsel %vm452_vm2, 0.0, %v3279_v17 }
 0x632   :  { %v3551_v62 = vsel %vm1794_vm11, %v3520_v10, %v3550_v49  ;;  %v3647_v9 = vsel %vm3628_vm13, %v3646_v14, %v3645_v15  ;;  %v3470_v20 = vsel %vm1465_vm3, %v3280_v44, -inf  ;;  %v3284_v14 = vsel %vm1465_vm3, %v2764_v25, -inf }
 0x633   :  { %v3552_v29 = vsel %vm1796_vm12, %v3521_v41, %v3551_v62  ;;  %v3644_v55 = vsel %vm3628_vm13, %v3643_v45, %v3642_v0  ;;  %vm3757_vm2 = vcmask 162944   ;;  %vm3761_vm3 = vcmask 160896  }
 0x634   :  { %3579 = vst.msk [vmem:[#allocation4] sm:$0xff] %vm3578_vm14, %v3552_v29  ;;  %v3726_v40 = vsel %vm1788_vm8, %v3644_v55, %v3725_v59  ;;  %3432 = vmax.xlane.f32.xlu0 %v3431_v38 }
 0x635   :  { %3584 = vst.msk [vmem:[#allocation4] sm:$0xff] %vm3583_vm15, %v8601_v21  ;;  %3459 = vmax.xlane.f32.xlu2 %v3458_v11  ;;  %v3727_v24 = vsel %vm1790_vm9, %v3647_v9, %v3726_v40 }
 0x636   :  { %3588 = vst.msk [vmem:[#allocation4] sm:$0xff] %vm1696_vm4, %v8601_v21 }
 0x637   :  { %3438 = vmax.xlane.f32.xlu1 %v3437_v42 }
 0x638   :  { %v3328_v51 = vpop.xlane.xlu2 %3327 }
 0x639   :  { %v3649_v3 = vperm.slane %v3328_v51, %v7698_v34 }
 0x63b   :  { %v3650_v7 = vsel %vm3628_vm13, %v3649_v3, %v3648_v22 }
 0x63c   :  { %v7815_v60 = vsel %vm1792_vm10, %v3650_v7, %v3727_v24  ;;  %3450 = vmax.xlane.f32.xlu0 %v3449_v57 }
 0x63d   :  { %3339 = vmax.xlane.f32.xlu2 %v3338_v58 }
 0x63f   :  { %v3346_v54 = vpop.xlane.xlu0 %3345  ;;  %3444 = vmax.xlane.f32.xlu1 %v3443_v31 }
 0x640   :  { %v3358_v30 = vpop.xlane.xlu2 %3357  ;;  %v3658_v15 = vperm.slane %v3346_v54, %v7698_v34 }
 0x641   :  { %v3664_v55 = vperm.slane %v3358_v30, %v7698_v34 }
 0x642   :  { %v3352_v36 = vpop.xlane.xlu1 %3351 }
 0x643   :  { %v3661_v39 = vperm.slane %v3352_v36, %v7698_v34 }
 0x644   :  { %3333 = vmax.xlane.f32.xlu0 %v3332_v2 }
 0x647   :  { %v3370_v59 = vpop.xlane.xlu0 %3369  ;;  %3462 = vmax.xlane.f32.xlu1 %v3461_v6 }
 0x648   :  { %v7827_v27 = vpop.xlane.xlu2 %3336  ;;  %v3670_v46 = vperm.slane %v3370_v59, %v7698_v34 }
 0x649   :  { %v3523_v48 = vperm.slane %v7827_v27, %v6622_v52 }
 0x64a   :  { %v7830_v19 = vpop.xlane.xlu1 %3372 }
 0x64b   :  { %v3529_v56 = vperm.slane %v7830_v19, %v6622_v52  ;;  %v3672_v17 = vperm.slane %v7830_v19, %v7707_v33 }
 0x64c   :  { %3291 = vmax.xlane.f32.xlu0 %v3290_v43 }
 0x64f   :  { %v7835_v18 = vpop.xlane.xlu0 %3330  ;;  %3471 = vmax.xlane.f32.xlu1 %v3470_v20 }
 0x650   :  { %v3349_v53 = vpop.xlane.xlu2 %3348  ;;  %v3522_v38 = vperm.slane %v7835_v18, %v6622_v52 }
 0x651   :  { %v3660_v1 = vperm.slane %v3349_v53, %v7707_v33  ;;  %v3525_v3 = vperm.slane %v3349_v53, %v6622_v52 }
 0x652   :  { %v3367_v35 = vpop.xlane.xlu1 %3366  ;;  %v3553_v51 = vsel %vm1784_vm6, %v3523_v48, %v3522_v38 }
 0x653   :  { %v3669_v47 = vperm.slane %v3367_v35, %v7707_v33  ;;  %v3662_v49 = vsel %vm3628_vm13, %v3661_v39, %v3660_v1  ;;  %v3528_v31 = vperm.slane %v3367_v35, %v6622_v52 }
 0x655   :  { %v3671_v63 = vsel %vm3628_vm13, %v3670_v46, %v3669_v47 }
 0x657   :  { %v3343_v10 = vpop.xlane.xlu0 %3342  ;;  %3285 = vmax.xlane.f32.xlu1 %v3284_v14 }
 0x658   :  { %v3657_v41 = vperm.slane %v3343_v10, %v7707_v33  ;;  %v3364_v0 = vpop.xlane.xlu2 %3363  ;;  %v3524_v11 = vperm.slane %v3343_v10, %v6622_v52 }
 0x659   :  { %v3667_v12 = vperm.slane %v3364_v0, %v7698_v34 }
 0x65a   :  { %v3659_v45 = vsel %vm3628_vm13, %v3658_v15, %v3657_v41  ;;  %v3394_v62 = vpop.xlane.xlu1 %3393  ;;  %v3554_v16 = vsel %vm1786_vm7, %v3524_v11, %v3553_v51 }
 0x65b   :  { %v3731_v9 = vsel %vm1784_vm6, %v3662_v49, %v3659_v45  ;;  %v3555_v7 = vsel %vm1788_vm8, %v3525_v3, %v3554_v16  ;;  %v3682_v41 = vperm.slane %v3394_v62, %v7698_v34 }
 0x65f   :  { %v3355_v29 = vpop.xlane.xlu0 %3354 }
 0x660   :  { %v3663_v13 = vperm.slane %v3355_v29, %v7707_v33  ;;  %v3400_v40 = vpop.xlane.xlu2 %3399  ;;  %v3526_v22 = vperm.slane %v3355_v29, %v6622_v52 }
 0x661   :  { %v3685_v0 = vperm.slane %v3400_v40, %v7698_v34 }
 0x662   :  { %v3665_v24 = vsel %vm3628_vm13, %v3664_v55, %v3663_v13  ;;  %v7856_v23 = vpop.xlane.xlu1 %3381  ;;  %v3556_v54 = vsel %vm1790_vm9, %v3526_v22, %v3555_v7 }
 0x663   :  { %v3732_v42 = vsel %vm1786_vm7, %v3665_v24, %v3731_v9 }
 0x667   :  { %v3361_v26 = vpop.xlane.xlu0 %3360 }
 0x668   :  { %v3527_v57 = vperm.slane %v3361_v26, %v6622_v52  ;;  %v3666_v61 = vperm.slane %v3361_v26, %v7707_v33  ;;  %v7867_v58 = vpop.xlane.xlu2 %3384 }
 0x669   :  { %v3531_v49 = vperm.slane %v7867_v58, %v6622_v52 }
 0x66a   :  { %v3557_v30 = vsel %vm1792_vm10, %v3527_v57, %v3556_v54  ;;  %v3668_v25 = vsel %vm3628_vm13, %v3667_v12, %v3666_v61  ;;  %v3406_v36 = vpop.xlane.xlu1 %3405 }
 0x66b   :  { %v3558_v2 = vsel %vm1794_vm11, %v3528_v31, %v3557_v30  ;;  %v3733_v37 = vsel %vm1788_vm8, %v3668_v25, %v3732_v42  ;;  %v3688_v29 = vperm.slane %v3406_v36, %v7698_v34  ;;  %v3676_v25 = vperm.slane %v7856_v23, %v7698_v34 }
 0x66c   :  { %v3559_v8 = vsel %vm1796_vm12, %v3529_v56, %v3558_v2  ;;  %v3734_v6 = vsel %vm1790_vm9, %v3671_v63, %v3733_v37 }
 0x66d   :  { %3580 = vst.msk [vmem:[#allocation4 + $0x8] sm:$0xff] %vm3578_vm14, %v3559_v8 }
 0x66e   :  { %3585 = vst.msk [vmem:[#allocation4 + $0x8] sm:$0xff] %vm3583_vm15, %v8601_v21 }
 0x66f   :  { %3589 = vst.msk [vmem:[#allocation4 + $0x8] sm:$0xff] %vm1696_vm4, %v8601_v21  ;;  %v3376_v59 = vpop.xlane.xlu0 %3375 }
 0x670   :  { %v3673_v50 = vperm.slane %v3376_v59, %v7698_v34  ;;  %v3391_v43 = vpop.xlane.xlu2 %3390 }
 0x671   :  { %v3681_v10 = vperm.slane %v3391_v43, %v7707_v33  ;;  %v3532_v40 = vperm.slane %v3391_v43, %v6622_v52 }
 0x672   :  { %v3674_v44 = vsel %vm3628_vm13, %v3673_v50, %v3672_v17  ;;  %v7888_v20 = vpop.xlane.xlu1 %3387 }
 0x673   :  { %v3735_v53 = vsel %vm1792_vm10, %v3674_v44, %v3734_v6  ;;  %v3683_v55 = vsel %vm3628_vm13, %v3682_v41, %v3681_v10  ;;  %v3679_v44 = vperm.slane %v7888_v20, %v7698_v34 }
 0x677   :  { %v3418_v35 = vpop.xlane.xlu0 %3417 }
 0x678   :  { %v3403_v46 = vpop.xlane.xlu2 %3402  ;;  %v3694_v54 = vperm.slane %v3418_v35, %v7698_v34  ;;  %v3678_v35 = vperm.slane %v7867_v58, %v7707_v33 }
 0x679   :  { %v3687_v19 = vperm.slane %v3403_v46, %v7707_v33  ;;  %v3534_v22 = vperm.slane %v3403_v46, %v6622_v52 }
 0x67a   :  { %v3421_v47 = vpop.xlane.xlu1 %3420  ;;  %v3680_v20 = vsel %vm3628_vm13, %v3679_v44, %v3678_v35 }
 0x67b   :  { %v3689_v48 = vsel %vm3628_vm13, %v3688_v29, %v3687_v19  ;;  %v3537_v36 = vperm.slane %v3421_v47, %v6622_v52 }
 0x67f   :  { %v3379_v63 = vpop.xlane.xlu0 %3378 }
 0x680   :  { %v3412_v1 = vpop.xlane.xlu2 %3411  ;;  %v3530_v15 = vperm.slane %v3379_v63, %v6622_v52  ;;  %v3675_v12 = vperm.slane %v3379_v63, %v7707_v33 }
 0x681   :  { %v3691_v7 = vperm.slane %v3412_v1, %v7698_v34  ;;  %v3696_v1 = vperm.slane %v3421_v47, %v7707_v33 }
 0x682   :  { %v3415_v14 = vpop.xlane.xlu1 %3414  ;;  %v3560_v38 = vsel %vm1784_vm6, %v3531_v49, %v3530_v15  ;;  %v3677_v50 = vsel %vm3628_vm13, %v3676_v25, %v3675_v12 }
 0x683   :  { %v3561_v51 = vsel %vm1786_vm7, %v3532_v40, %v3560_v38  ;;  %v3693_v3 = vperm.slane %v3415_v14, %v7707_v33  ;;  %v3536_v56 = vperm.slane %v3415_v14, %v6622_v52  ;;  %v3736_v46 = vsel %vm1794_vm11, %v3677_v50, %v3735_v53 }
 0x684   :  { %v3737_v15 = vsel %vm1796_vm12, %v3680_v20, %v3736_v46 }
 0x685   :  { %v3695_v6 = vsel %vm3628_vm13, %v3694_v54, %v3693_v3 }
 0x687   :  { %v3397_v39 = vpop.xlane.xlu0 %3396 }
 0x688   :  { %v3684_v45 = vperm.slane %v3397_v39, %v7707_v33  ;;  %v7899_v9 = vpop.xlane.xlu2 %3429  ;;  %v3533_v13 = vperm.slane %v3397_v39, %v6622_v52 }
 0x68a   :  { %v3686_v11 = vsel %vm3628_vm13, %v3685_v0, %v3684_v45  ;;  %v7906_v62 = vpop.xlane.xlu1 %3441  ;;  %v3562_v16 = vsel %vm1788_vm8, %v3533_v13, %v3561_v51 }
 0x68b   :  { %v3738_v24 = vsel %vm1784_vm6, %v3686_v11, %v3683_v55  ;;  %v3563_v30 = vsel %vm1790_vm9, %v3534_v22, %v3562_v16  ;;  %v3654_v16 = vperm.slane %v7827_v27, %v7707_v33 }
 0x68c   :  { %v3739_v42 = vsel %vm1786_vm7, %v3689_v48, %v3738_v24 }
 0x68f   :  { %v3409_v26 = vpop.xlane.xlu0 %3408 }
 0x690   :  { %v3535_v57 = vperm.slane %v3409_v26, %v6622_v52  ;;  %v3690_v61 = vperm.slane %v3409_v26, %v7707_v33  ;;  %v7920_v31 = vpop.xlane.xlu2 %3453 }
 0x691   :  { %v3712_v35 = vperm.slane %v7920_v31, %v7698_v34 }
 0x692   :  { %v3564_v2 = vsel %vm1792_vm10, %v3535_v57, %v3563_v30  ;;  %v3692_v37 = vsel %vm3628_vm13, %v3691_v7, %v3690_v61  ;;  %v7930_v8 = vpop.xlane.xlu1 %3465  ;;  %v3651_v7 = vperm.slane %v7835_v18, %v7707_v33  ;;  %v3700_v57 = vperm.slane %v7899_v9, %v7698_v34 }
 0x693   :  { %v3565_v59 = vsel %vm1794_vm11, %v3536_v56, %v3564_v2  ;;  %v3740_v17 = vsel %vm1788_vm8, %v3692_v37, %v3739_v42  ;;  %v3706_v61 = vperm.slane %v7906_v62, %v7698_v34  ;;  %v3718_v31 = vperm.slane %v7930_v8, %v7698_v34 }
 0x694   :  { %v3566_v43 = vsel %vm1796_vm12, %v3537_v36, %v3565_v59  ;;  %v3741_v23 = vsel %vm1790_vm9, %v3695_v6, %v3740_v17 }
 0x695   :  { %3581 = vst.msk [vmem:[#allocation4 + $0x10] sm:$0xff] %vm3578_vm14, %v3566_v43 }
 0x696   :  { %3586 = vst.msk [vmem:[#allocation4 + $0x10] sm:$0xff] %vm3583_vm15, %v8601_v21 }
 0x697   :  { %3590 = vst.msk [vmem:[#allocation4 + $0x10] sm:$0xff] %vm1696_vm4, %v8601_v21  ;;  %v3424_v63 = vpop.xlane.xlu0 %3423 }
 0x698   :  { %v3697_v14 = vperm.slane %v3424_v63, %v7698_v34  ;;  %v3436_v10 = vpop.xlane.xlu2 %3435  ;;  %3759 = vst.msk [vmem:[#allocation4 + $0xa] sm:$0xff] %vm3757_vm2, %v3737_v15 }
 0x699   :  { %v3703_v36 = vperm.slane %v3436_v10, %v7698_v34 }
 0x69a   :  { %v3698_v19 = vsel %vm3628_vm13, %v3697_v14, %v3696_v1  ;;  %v7953_v39 = vpop.xlane.xlu1 %3468 }
 0x69b   :  { %v3742_v58 = vsel %vm1792_vm10, %v3698_v19, %v3741_v23  ;;  %v3545_v50 = vperm.slane %v7953_v39, %v6622_v52 }
 0x69f   :  { %v3448_v53 = vpop.xlane.xlu0 %3447 }
 0x6a0   :  { %v7957_v41 = vpop.xlane.xlu2 %3456  ;;  %v3709_v27 = vperm.slane %v3448_v53, %v7698_v34 }
 0x6a1   :  { %v3543_v18 = vperm.slane %v7957_v41, %v6622_v52  ;;  %v3714_v53 = vperm.slane %v7957_v41, %v7707_v33 }
 0x6a2   :  { %v3427_v47 = vpop.xlane.xlu1 %3426 }
 0x6a3   :  { %v3538_v13 = vperm.slane %v3427_v47, %v6622_v52  ;;  %v3699_v56 = vperm.slane %v3427_v47, %v7707_v33 }
 0x6a5   :  { %v3701_v46 = vsel %vm3628_vm13, %v3700_v57, %v3699_v56  ;;  %v3764_v56 = vld [vmem:[%s8539_s3 + $0x8] sm:$0xff] }
 0x6a6   :  { %v3743_v15 = vsel %vm1794_vm11, %v3701_v46, %v3742_v58  ;;  %v3720_v58 = vperm.slane %v7953_v39, %v7707_v33  ;;  %v3630_v39 = vperm.slane %v7683_v4, %v7707_v33 }
 0x6a7   :  { %v3433_v0 = vpop.xlane.xlu0 %3432 }
 0x6a8   :  { %v7959_v49 = vpop.xlane.xlu2 %3459  ;;  %v3539_v55 = vperm.slane %v3433_v0, %v6622_v52  ;;  %v3702_v9 = vperm.slane %v3433_v0, %v7707_v33 }
 0x6a9   :  { %v3715_v20 = vperm.slane %v7959_v49, %v7698_v34 }
 0x6aa   :  { %v3439_v45 = vpop.xlane.xlu1 %3438  ;;  %v3567_v48 = vsel %vm1784_vm6, %v3539_v55, %v3538_v13  ;;  %v3704_v1 = vsel %vm3628_vm13, %v3703_v36, %v3702_v9 }
 0x6ab   :  { %v3540_v38 = vperm.slane %v3439_v45, %v6622_v52  ;;  %v3705_v30 = vperm.slane %v3439_v45, %v7707_v33  ;;  %v3744_v47 = vsel %vm1796_vm12, %v3704_v1, %v3743_v15  ;;  %v3716_v45 = vsel %vm3628_vm13, %v3715_v20, %v3714_v53  ;;  %v4901_v15 = vld [vmem:[%s8539_s3 + $0x48] sm:$0xff]  ;;  %v4924_v53 = vld [vmem:[%s8539_s3 + $0x80] sm:$0xff] }
 0x6ad   :  { %v3568_v42 = vsel %vm1786_vm7, %v3540_v38, %v3567_v48  ;;  %v3707_v63 = vsel %vm3628_vm13, %v3706_v61, %v3705_v30  ;;  %v3625_v48 = vperm.slane %v7718_v32, %v7707_v33  ;;  %v31_v32 = vld [vmem:[%s8540_s4 + $0x38] sm:$0xff] }
 0x6af   :  { %v3451_v29 = vpop.xlane.xlu0 %3450 }
 0x6b0   :  { %v3340_v24 = vpop.xlane.xlu2 %3339  ;;  %v3542_v22 = vperm.slane %v3451_v29, %v6622_v52  ;;  %v3711_v43 = vperm.slane %v3451_v29, %v7707_v33 }
 0x6b1   :  { %v3655_v3 = vperm.slane %v3340_v24, %v7698_v34 }
 0x6b2   :  { %v3445_v11 = vpop.xlane.xlu1 %3444  ;;  %v3713_v19 = vsel %vm3628_vm13, %v3712_v35, %v3711_v43  ;;  %v3766_v35 = vld [vmem:[%s8539_s3 + $0x18] sm:$0xff] }
 0x6b3   :  { %v3541_v40 = vperm.slane %v3445_v11, %v6622_v52  ;;  %v3708_v26 = vperm.slane %v3445_v11, %v7707_v33  ;;  %v3656_v37 = vsel %vm3628_vm13, %v3655_v3, %v3654_v16 }
 0x6b5   :  { %v3569_v51 = vsel %vm1788_vm8, %v3541_v40, %v3568_v42  ;;  %v3710_v6 = vsel %vm3628_vm13, %v3709_v27, %v3708_v26 }
 0x6b6   :  { %v3570_v25 = vsel %vm1790_vm9, %v3542_v22, %v3569_v51 }
 0x6b7   :  { %v3334_v12 = vpop.xlane.xlu0 %3333  ;;  %v3571_v44 = vsel %vm1792_vm10, %v3543_v18, %v3570_v25  ;;  %v3765_v18 = vld [vmem:[%s8539_s3 + $0x10] sm:$0xff] }
 0x6b8   :  { %v3652_v54 = vperm.slane %v3334_v12, %v7698_v34 }
 0x6ba   :  { %v3653_v2 = vsel %vm3628_vm13, %v3652_v54, %v3651_v7  ;;  %v3463_v62 = vpop.xlane.xlu1 %3462  ;;  %v3763_v54 = vld [vmem:[%s8539_s3] sm:$0xff] }
 0x6bb   :  { %v3729_v59 = vsel %vm1794_vm11, %v3653_v2, %v7815_v60  ;;  %v3544_v17 = vperm.slane %v3463_v62, %v6622_v52  ;;  %v3745_v52 = vsel %vm1784_vm6, %v3710_v6, %v3707_v63  ;;  %v3717_v10 = vperm.slane %v3463_v62, %v7707_v33 }
 0x6bc   :  { %v3730_v23 = vsel %vm1796_vm12, %v3656_v37, %v3729_v59  ;;  %v3746_v0 = vsel %vm1786_vm7, %v3713_v19, %v3745_v52  ;;  %vm3800_vm6 = vcmask 261120   ;;  %v4940_v19 = vld [vmem:[%s8539_s3 + $0xc0] sm:$0xff]  ;;  %vm4749_vm7 = vcmask 32768  }
 0x6bd   :  { %v3572_v60 = vsel %vm1794_vm11, %v3544_v17, %v3571_v44  ;;  %3758 = vst.msk [vmem:[#allocation4 + $0x2] sm:$0xff] %vm3757_vm2, %v3730_v23  ;;  %v3719_v49 = vsel %vm3628_vm13, %v3718_v31, %v3717_v10  ;;  %v3747_v41 = vsel %vm1788_vm8, %v3716_v45, %v3746_v0  ;;  %v4900_v23 = vld [vmem:[%s8539_s3 + $0x40] sm:$0xff] }
 0x6be   :  { %v3573_v14 = vsel %vm1796_vm12, %v3545_v50, %v3572_v60  ;;  %v3748_v55 = vsel %vm1790_vm9, %v3719_v49, %v3747_v41  ;;  %v4902_v41 = vld [vmem:[%s8539_s3 + $0x50] sm:$0xff] }
 0x6bf   :  { %3582 = vst.msk [vmem:[#allocation4 + $0x18] sm:$0xff] %vm3578_vm14, %v3573_v14 }
 0x6c0   :  { %3587 = vst.msk [vmem:[#allocation4 + $0x18] sm:$0xff] %vm3583_vm15, %v8601_v21 }
 0x6c1   :  { %3591 = vst.msk [vmem:[#allocation4 + $0x18] sm:$0xff] %vm1696_vm4, %v8601_v21  ;;  %v3292_v21 = vpop.xlane.xlu0 %3291  ;;  %vm3755_vm4 = vcmask 162950  }
 0x6c2   :  { %v3472_v8 = vpop.xlane.xlu1 %3471  ;;  %3760 = vst.msk [vmem:[#allocation4 + $0x12] sm:$0xff] %vm3757_vm2, %v3744_v47  ;;  %v3631_v11 = vperm.slane %v3292_v21, %v7698_v34  ;;  %v3767_v47 = vld [vmem:[%s8539_s3 + $0x20] sm:$0xff] }
 0x6c3   :  { %v3721_v29 = vperm.slane %v3472_v8, %v7698_v34 }
 0x6c4   :  { %v3632_v42 = vsel %vm3628_vm13, %v3631_v11, %v3630_v39  ;;  %v3772_v4 = vld [vmem:[#allocation4 + $0x8] sm:$0xff] }
 0x6c5   :  { %v3722_v38 = vsel %vm3628_vm13, %v3721_v29, %v3720_v58 }
 0x6c6   :  { %v3749_v13 = vsel %vm1792_vm10, %v3722_v38, %v3748_v55  ;;  %v4941_v55 = vld [vmem:[%s8539_s3 + $0xc8] sm:$0xff] }
 0x6c7   :  { %3762 = vst.msk [vmem:[#allocation4 + $0x1a] sm:$0x3f] %vm3761_vm3, %v3749_v13  ;;  %v4925_v38 = vld [vmem:[%s8539_s3 + $0x88] sm:$0xff] }
 0x6c8   :  { %v3768_v13 = vld [vmem:[%s8539_s3 + $0x28] sm:$0xff] }
 0x6c9   :  { %v3773_v3 = vld [vmem:[#allocation4 + $0x10] sm:$0xff] }
 0x6ca   :  { %v3286_v40 = vpop.xlane.xlu1 %3285 }
 0x6cb   :  { %v3627_v24 = vperm.slane %v3286_v40, %v7698_v34 }
 0x6cd   :  { %v3629_v51 = vsel %vm3628_vm13, %v3627_v24, %v3625_v48 }
 0x6ce   :  { %v3723_v16 = vsel %vm1796_vm12, %v3632_v42, %v3629_v51  ;;  %v3774_v22 = vld [vmem:[#allocation4 + $0x18] sm:$0xff] }
 0x6cf   :  { %3756 = vst.msk [vmem:[#allocation4 - $0x6] sm:$0xc0] %vm3755_vm4, %v3723_v16  ;;  %3902 = vmatpush.msrb.mxu0 %v3774_v22  ;;  %v5179_v26 = vpack.i.bf16 %v3773_v3, %v3774_v22  ;;  %v4903_v22 = vld [vmem:[%s8539_s3 + $0x58] sm:$0xff] }
 0x6d1   :  { %5180 = vrot.lane.b32.xlu0 %v5179_v26, %s8609_s16  ;;  %5165 = vrot.lane.b32.xlu2 %v5179_v26, %s8607_s0 }
 0x6d2   :  { %3903 = vmatpush.msrb.mxu0 %v3773_v3  ;;  %v4942_v3 = vld [vmem:[%s8539_s3 + $0xd0] sm:$0xff] }
 0x6d4   :  { %3904 = vmatpush.msrb.mxu0 %v3772_v4 }
 0x6d6   :  { %v3771_v34 = vld [vmem:[#allocation4] sm:$0xff] }
 0x6d7   :  { %3905 = vmatpush.msrb.mxu0 %v3771_v34  ;;  %v5169_v33 = vpack.i.bf16 %v3771_v34, %v3772_v4  ;;  %v4926_v4 = vld [vmem:[%s8539_s3 + $0x90] sm:$0xff] }
 0x6d8   :  { %4916 = vmatmul.msk.f32.vlgmr.msrb.gmra.mxu0 %vm3800_vm6, %v3763_v54  ;;  %v3769_v34 = vld [vmem:[%s8539_s3 + $0x30] sm:$0xff]  ;;  %v4927_v54 = vld [vmem:[%s8539_s3 + $0x98] sm:$0xff] }
 0x6d9   :  { %5195 = vrot.lane.b32.xlu0 %v5179_v26, %s8606_s28  ;;  %5185 = vrot.lane.b32.xlu2 %v5179_v26, %s5286_s11 }
 0x6da   :  { %5170 = vrot.lane.b32.xlu1 %v5169_v33, %s8607_s0 }
 0x6e0   :  { %4917 = vmatmul.msk.f32.gmra.mxu0 %vm3800_vm6, %v3764_v56  ;;  %v4905_v56 = vld [vmem:[%s8539_s3 + $0x68] sm:$0xff] }
 0x6e1   :  { %5200 = vrot.lane.b32.xlu0 %v5169_v33, %s8606_s28  ;;  %5190 = vrot.lane.b32.xlu2 %v5169_v33, %s5286_s11 }
 0x6e2   :  { %5175 = vrot.lane.b32.xlu1 %v5169_v33, %s8609_s16 }
 0x6e8   :  { %4918 = vmatmul.msk.f32.gmra.mxu0 %vm3800_vm6, %v3765_v18  ;;  %v4945_v18 = vld [vmem:[%s8539_s3 + $0xe8] sm:$0xff] }
 0x6e9   :  { %5220 = vrot.lane.b32.xlu0 %v5179_v26, %s5284_s9  ;;  %5205 = vrot.lane.b32.xlu2 %v5169_v33, %s8612_s27 }
 0x6ea   :  { %5210 = vrot.lane.b32.xlu1 %v5179_v26, %s8612_s27 }
 0x6f0   :  { %4919 = vmatmul.msk.f32.gmra.mxu0 %vm3800_vm6, %v3766_v35  ;;  %v5004_v35 = vld [vmem:[%s8539_s3 + $0x1c0] sm:$0xff] }
 0x6f1   :  { %5225 = vrot.lane.b32.xlu0 %v5169_v33, %s8608_s15  ;;  %5215 = vrot.lane.b32.xlu2 %v5179_v26, %s8608_s15 }
 0x6f2   :  { %5230 = vrot.lane.b32.xlu1 %v5179_v26, %s8611_s25 }
 0x6f8   :  { %4920 = vmatmul.msk.f32.gmra.mxu0 %vm3800_vm6, %v3767_v47  ;;  %v4991_v47 = vld [vmem:[%s8539_s3 + $0x198] sm:$0xff] }
 0x6f9   :  { %4642 = vperm.xlu0 %5143, %v31_v32   ;;  %5240 = vrot.lane.b32.xlu2 %v5169_v33, %s8611_s25 }
 0x6fa   :  { %5235 = vrot.lane.b32.xlu1 %v5169_v33, %s5284_s9 }
 0x700   :  { %4921 = vmatmul.msk.f32.gmra.mxu0 %vm3800_vm6, %v3768_v13  ;;  %v5010_v13 = vld [vmem:[%s8539_s3 + $0x1f0] sm:$0xff] }
 0x701   :  { %5247 = vset.pattern.permute.xlu0 %v8610_v28 }
 0x702   :  { %4596 = vperm.xlu1 %5244, %v31_v32  }
 0x708   :  { %4922 = vmatmul.msk.f32.gmra.mxu0 %vm3800_vm6, %v3769_v34  ;;  %v37_v34 = vld [vmem:[%s8540_s4 + $0x68] sm:$0xff] }
 0x72b   :  { %v5166_v12 = vpop.permute.xlu2 %5165 }
 0x72c   :  { %v5167_v7 = vunpack.i.l.bf16 %v5166_v12  ;;  %v5168_v57 = vunpack.i.h.bf16 %v5166_v12 }
 0x72e   :  { %3837 = vmatpush.msrb.mxu3 %v5167_v7 }
 0x730   :  { %3838 = vmatpush.msrb.mxu3 %v5168_v57  ;;  %v4904_v57 = vld [vmem:[%s8539_s3 + $0x60] sm:$0xff] }
 0x733   :  { %v5186_v61 = vpop.permute.xlu2 %5185 }
 0x734   :  { %v5187_v44 = vunpack.i.l.bf16 %v5186_v61  ;;  %v5188_v46 = vunpack.i.h.bf16 %v5186_v61  ;;  %v4943_v61 = vld [vmem:[%s8539_s3 + $0xd8] sm:$0xff] }
 0x73b   :  { %v5191_v27 = vpop.permute.xlu2 %5190 }
 0x73c   :  { %v5192_v52 = vunpack.i.l.bf16 %v5191_v27  ;;  %v5193_v20 = vunpack.i.h.bf16 %v5191_v27  ;;  %v3770_v27 = vld [vmem:[%s8539_s3 + $0x38] sm:$0xff] }
 0x73d   :  { %4923 = vmatmul.msk.f32.gmra.mxu0 %vm3800_vm6, %v3770_v27 }
 0x743   :  { %v8070_v28 = vpop.permute.xlu2 %5205  ;;  %v5181_v30 = vpop.permute.xlu0 %5180 }
 0x744   :  { %v5182_v25 = vunpack.i.l.bf16 %v5181_v30  ;;  %v5183_v36 = vunpack.i.h.bf16 %v5181_v30  ;;  %v5207_v21 = vunpack.i.l.bf16 %v8070_v28  ;;  %v5208_v11 = vunpack.i.h.bf16 %v8070_v28  ;;  %v4944_v28 = vld [vmem:[%s8539_s3 + $0xe0] sm:$0xff] }
 0x745   :  { %v4928_v30 = vld [vmem:[%s8539_s3 + $0xa0] sm:$0xff] }
 0x746   :  { %4082 = vmatpush.msrb.mxu2 %v5182_v25  ;;  %v4972_v25 = vld [vmem:[%s8539_s3 + $0x140] sm:$0xff] }
 0x748   :  { %4083 = vmatpush.msrb.mxu2 %v5183_v36  ;;  %v4906_v36 = vld [vmem:[%s8539_s3 + $0x70] sm:$0xff] }
 0x74b   :  { %v5216_v9 = vpop.permute.xlu2 %5215  ;;  %v5196_v2 = vpop.permute.xlu0 %5195 }
 0x74c   :  { %v5217_v62 = vunpack.i.l.bf16 %v5216_v9  ;;  %v5171_v37 = vpop.permute.xlu1 %5170  ;;  %v5197_v6 = vunpack.i.l.bf16 %v5196_v2  ;;  %v5218_v17 = vunpack.i.h.bf16 %v5216_v9  ;;  %v5198_v50 = vunpack.i.h.bf16 %v5196_v2  ;;  %v4929_v9 = vld [vmem:[%s8539_s3 + $0xa8] sm:$0xff] }
 0x74d   :  { %v5172_v59 = vunpack.i.l.bf16 %v5171_v37  ;;  %v5173_v43 = vunpack.i.h.bf16 %v5171_v37  ;;  %v4973_v2 = vld [vmem:[%s8539_s3 + $0x148] sm:$0xff]  ;;  %v4946_v37 = vld [vmem:[%s8539_s3 + $0xf0] sm:$0xff] }
 0x74e   :  { %3988 = vmatpush.msra.mxu1 %v5197_v6  ;;  %4270 = vmatpush.msra.mxu0 %v5217_v62  ;;  %v4907_v62 = vld [vmem:[%s8539_s3 + $0x78] sm:$0xff]  ;;  %v4930_v6 = vld [vmem:[%s8539_s3 + $0xb0] sm:$0xff] }
 0x74f   :  { %3839 = vmatpush.msrb.mxu3 %v5172_v59  ;;  %v4974_v59 = vld [vmem:[%s8539_s3 + $0x150] sm:$0xff] }
 0x750   :  { %3989 = vmatpush.msra.mxu1 %v5198_v50  ;;  %4271 = vmatpush.msra.mxu0 %v5218_v17  ;;  %v4947_v17 = vld [vmem:[%s8539_s3 + $0xf8] sm:$0xff]  ;;  %v4956_v50 = vld [vmem:[%s8539_s3 + $0x100] sm:$0xff] }
 0x751   :  { %3840 = vmatpush.msrb.mxu3 %v5173_v43  ;;  %v4931_v43 = vld [vmem:[%s8539_s3 + $0xb8] sm:$0xff] }
 0x752   :  { %4908 = vmatmul.msk.f32.vlgmr.msrb.gmra.mxu3 %vm3800_vm6, %v4900_v23  ;;  %v4975_v23 = vld [vmem:[%s8539_s3 + $0x158] sm:$0xff] }
 0x753   :  { %4176 = vmatpush.msra.mxu3 %v5187_v44  ;;  %v5201_v63 = vpop.permute.xlu0 %5200  ;;  %v5241_v42 = vpop.permute.xlu2 %5240  ;;  %v4957_v44 = vld [vmem:[%s8539_s3 + $0x108] sm:$0xff] }
 0x754   :  { %v5176_v60 = vpop.permute.xlu1 %5175  ;;  %v5202_v1 = vunpack.i.l.bf16 %v5201_v63  ;;  %v5203_v10 = vunpack.i.h.bf16 %v5201_v63  ;;  %v5242_v26 = vunpack.i.l.bf16 %v5241_v42  ;;  %v5243_v33 = vunpack.i.h.bf16 %v5241_v42  ;;  %v4976_v63 = vld [vmem:[%s8539_s3 + $0x160] sm:$0xff]  ;;  %v4995_v42 = vld [vmem:[%s8539_s3 + $0x1b8] sm:$0xff] }
 0x755   :  { %v5177_v14 = vunpack.i.l.bf16 %v5176_v60  ;;  %4177 = vmatpush.msra.mxu3 %v5188_v46  ;;  %v5178_v31 = vunpack.i.h.bf16 %v5176_v60  ;;  %v4988_v46 = vld [vmem:[%s8539_s3 + $0x180] sm:$0xff]  ;;  %v4958_v60 = vld [vmem:[%s8539_s3 + $0x110] sm:$0xff] }
 0x756   :  { %3990 = vmatpush.msra.mxu1 %v5202_v1  ;;  %v5005_v1 = vld [vmem:[%s8539_s3 + $0x1c8] sm:$0xff] }
 0x757   :  { %4178 = vmatpush.msra.mxu3 %v5192_v52  ;;  %4084 = vmatpush.msrb.mxu2 %v5177_v14  ;;  %v4989_v52 = vld [vmem:[%s8539_s3 + $0x188] sm:$0xff] }
 0x758   :  { %3991 = vmatpush.msra.mxu1 %v5203_v10  ;;  %v4977_v14 = vld [vmem:[%s8539_s3 + $0x168] sm:$0xff]  ;;  %v4959_v10 = vld [vmem:[%s8539_s3 + $0x118] sm:$0xff] }
 0x759   :  { %4179 = vmatpush.msra.mxu3 %v5193_v20  ;;  %4085 = vmatpush.msrb.mxu2 %v5178_v31  ;;  %v5006_v20 = vld [vmem:[%s8539_s3 + $0x1d0] sm:$0xff] }
 0x75a   :  { %4909 = vmatmul.msk.f32.gmra.mxu3 %vm3800_vm6, %v4901_v15  ;;  %4948 = vmatmul.msk.f32.vlgmr.msrb.gmra.mxu2 %vm3800_vm6, %v4940_v19  ;;  %v4990_v31 = vld [vmem:[%s8539_s3 + $0x190] sm:$0xff]  ;;  %v4960_v19 = vld [vmem:[%s8539_s3 + $0x120] sm:$0xff] }
 0x75b   :  { %v5221_v0 = vpop.permute.xlu0 %5220  ;;  %4932 = vmatmul.msk.f32.vlgmr.msra.gmra.mxu1 %vm3800_vm6, %v4924_v53  ;;  %v4978_v15 = vld [vmem:[%s8539_s3 + $0x170] sm:$0xff]  ;;  %v5007_v53 = vld [vmem:[%s8539_s3 + $0x1d8] sm:$0xff] }
 0x75c   :  { %v5211_v49 = vpop.permute.xlu1 %5210  ;;  %v5222_v8 = vunpack.i.l.bf16 %v5221_v0  ;;  %v5223_v45 = vunpack.i.h.bf16 %v5221_v0  ;;  %v4979_v0 = vld [vmem:[%s8539_s3 + $0x178] sm:$0xff] }
 0x75d   :  { %v5212_v58 = vunpack.i.l.bf16 %v5211_v49  ;;  %v5213_v29 = vunpack.i.h.bf16 %v5211_v49  ;;  %v4961_v49 = vld [vmem:[%s8539_s3 + $0x128] sm:$0xff] }
 0x75e   :  { %4552 = vmatpush.msrb.mxu3 %v5222_v8  ;;  %v5008_v8 = vld [vmem:[%s8539_s3 + $0x1e0] sm:$0xff] }
 0x75f   :  { %4458 = vmatpush.msra.mxu2 %v5212_v58  ;;  %v4992_v58 = vld [vmem:[%s8539_s3 + $0x1a0] sm:$0xff] }
 0x760   :  { %4553 = vmatpush.msrb.mxu3 %v5223_v45  ;;  %v4962_v45 = vld [vmem:[%s8539_s3 + $0x130] sm:$0xff] }
 0x761   :  { %4459 = vmatpush.msra.mxu2 %v5213_v29  ;;  %v5009_v29 = vld [vmem:[%s8539_s3 + $0x1e8] sm:$0xff] }
 0x762   :  { %4910 = vmatmul.msk.f32.gmra.mxu3 %vm3800_vm6, %v4902_v41  ;;  %4949 = vmatmul.msk.f32.gmra.mxu2 %vm3800_vm6, %v4941_v55  ;;  %v4993_v41 = vld [vmem:[%s8539_s3 + $0x1a8] sm:$0xff]  ;;  %v30_v55 = vld [vmem:[%s8540_s4 + $0x30] sm:$0xff] }
 0x763   :  { %4460 = vmatpush.msra.mxu2 %v5207_v21  ;;  %v5226_v40 = vpop.permute.xlu0 %5225  ;;  %4933 = vmatmul.msk.f32.gmra.mxu1 %vm3800_vm6, %v4925_v38  ;;  %v33_v38 = vld [vmem:[%s8540_s4 + $0x48] sm:$0xff]  ;;  %v4963_v21 = vld [vmem:[%s8539_s3 + $0x138] sm:$0xff] }
 0x764   :  { %v5231_v39 = vpop.permute.xlu1 %5230  ;;  %v5227_v48 = vunpack.i.l.bf16 %v5226_v40  ;;  %v5228_v51 = vunpack.i.h.bf16 %v5226_v40  ;;  %4591 = vperm.xlu0 %5247, %v30_v55   ;;  %4606 = vperm.xlu1 %5244, %v33_v38   ;;  %v32_v40 = vld [vmem:[%s8540_s4 + $0x40] sm:$0xff] }
 0x765   :  { %v5232_v24 = vunpack.i.l.bf16 %v5231_v39  ;;  %4461 = vmatpush.msra.mxu2 %v5208_v11  ;;  %v5233_v16 = vunpack.i.h.bf16 %v5231_v39  ;;  %v4994_v11 = vld [vmem:[%s8539_s3 + $0x1b0] sm:$0xff]  ;;  %v36_v39 = vld [vmem:[%s8540_s4 + $0x60] sm:$0xff]  ;;  %4601 = vperm.xlu2 %5245, %v32_v40  }
 0x766   :  { %4272 = vmatpush.msra.mxu0 %v5227_v48  ;;  %v5011_v48 = vld [vmem:[%s8539_s3 + $0x1f8] sm:$0xff] }
 0x767   :  { %4364 = vmatpush.msrb.mxu1 %v5232_v24  ;;  %v5020_v24 = vld [vmem:[%s8539_s3 + $0x200] sm:$0xff] }
 0x768   :  { %4273 = vmatpush.msra.mxu0 %v5228_v51 }
 0x769   :  { %4365 = vmatpush.msrb.mxu1 %v5233_v16  ;;  %4980 = vmatmul.msk.f32.vlgmr.msra.gmra.mxu0 %vm3800_vm6, %v4972_v25  ;;  %v34_v16 = vld [vmem:[%s8540_s4 + $0x50] sm:$0xff] }
 0x76a   :  { %4911 = vmatmul.msk.f32.gmra.mxu3 %vm3800_vm6, %v4903_v22  ;;  %4950 = vmatmul.msk.f32.gmra.mxu2 %vm3800_vm6, %v4942_v3  ;;  %v5021_v22 = vld [vmem:[%s8539_s3 + $0x208] sm:$0xff]  ;;  %v35_v3 = vld [vmem:[%s8540_s4 + $0x58] sm:$0xff]  ;;  %s4811_s4 = sshll.u32 %s5318_s26, 4  ;;  %s4812_s4 = int_to_ptr.vmem [resolvable:$true] %s4811_s4 }
 0x76b   :  { %4366 = vmatpush.msrb.mxu1 %v5242_v26 }
 0x76c   :  { %v5236_v32 = vpop.permute.xlu1 %5235  ;;  %4934 = vmatmul.msk.f32.gmra.mxu1 %vm3800_vm6, %v4926_v4  ;;  %4621 = vperm.xlu1 %5244, %v36_v39   ;;  %v5022_v4 = vld [vmem:[%s8539_s3 + $0x210] sm:$0xff] }
 0x76d   :  { %v5237_v12 = vunpack.i.l.bf16 %v5236_v32  ;;  %4367 = vmatpush.msrb.mxu1 %v5243_v33  ;;  %v5238_v7 = vunpack.i.h.bf16 %v5236_v32  ;;  %4611 = vperm.xlu2 %5245, %v34_v16   ;;  %v5023_v32 = vld [vmem:[%s8539_s3 + $0x218] sm:$0xff] }
 0x76e   :  { %4616 = vperm.xlu0 %5247, %v35_v3  }
 0x76f   :  { %4554 = vmatpush.msrb.mxu3 %v5237_v12 }
 0x771   :  { %4555 = vmatpush.msrb.mxu3 %v5238_v7  ;;  %4981 = vmatmul.msk.f32.gmra.mxu0 %vm3800_vm6, %v4973_v2  ;;  %v3907_v7 = vpop.f32.mrf.mxu0 }
 0x772   :  { %4912 = vmatmul.msk.f32.gmra.mxu3 %vm3800_vm6, %v4904_v57  ;;  %4951 = vmatmul.msk.f32.gmra.mxu2 %vm3800_vm6, %v4943_v61  ;;  %v5024_v57 = vld [vmem:[%s8539_s3 + $0x220] sm:$0xff] }
 0x774   :  { %4935 = vmatmul.msk.f32.gmra.mxu1 %vm3800_vm6, %v4927_v54  ;;  %5248 = vset.pattern.permute.xlu1 %v8605_v5 }
 0x775   :  { %4646 = vperm.xlu1 %5248, %v32_v40   ;;  %5246 = vset.pattern.permute.xlu2 %v8605_v5 }
 0x776   :  { %4638 = vperm.xlu2 %5246, %v30_v55   ;;  %4626 = vperm.xlu0 %5247, %v37_v34  }
 0x779   :  { %4982 = vmatmul.msk.f32.gmra.mxu0 %vm3800_vm6, %v4974_v59 }
 0x77a   :  { %4913 = vmatmul.msk.f32.gmra.mxu3 %vm3800_vm6, %v4905_v56  ;;  %4952 = vmatmul.msk.f32.gmra.mxu2 %vm3800_vm6, %v4944_v28  ;;  %v5025_v56 = vld [vmem:[%s8539_s3 + $0x228] sm:$0xff] }
 0x77c   :  { %4936 = vmatmul.msk.f32.gmra.mxu1 %vm3800_vm6, %v4928_v30 }
 0x77d   :  { %4654 = vperm.xlu1 %5248, %v34_v16  }
 0x77e   :  { %4650 = vperm.xlu2 %5246, %v33_v38   ;;  %5249 = vset.pattern.permute.xlu0 %v8605_v5  ;;  %v3910_v5 = vpop.f32.mrf.mxu0 }
 0x781   :  { %4983 = vmatmul.msk.f32.gmra.mxu0 %vm3800_vm6, %v4975_v23 }
 0x782   :  { %4914 = vmatmul.msk.f32.gmra.mxu3 %vm3800_vm6, %v4906_v36  ;;  %4953 = vmatmul.msk.f32.gmra.mxu2 %vm3800_vm6, %v4945_v18  ;;  %v5026_v36 = vld [vmem:[%s8539_s3 + $0x230] sm:$0xff] }
 0x784   :  { %4937 = vmatmul.msk.f32.gmra.mxu1 %vm3800_vm6, %v4929_v9 }
 0x785   :  { %4662 = vperm.xlu1 %5248, %v36_v39   ;;  %v4597_v39 = vpop.permute.xlu1 %4596 }
 0x786   :  { %4658 = vperm.xlu2 %5246, %v35_v3   ;;  %v3913_v18 = vpop.f32.mrf.mxu0 }
 0x789   :  { %4984 = vmatmul.msk.f32.gmra.mxu0 %vm3800_vm6, %v4976_v63 }
 0x78a   :  { %4915 = vmatmul.msk.f32.gmra.mxu3 %vm3800_vm6, %v4907_v62  ;;  %4954 = vmatmul.msk.f32.gmra.mxu2 %vm3800_vm6, %v4946_v37  ;;  %v5027_v37 = vld [vmem:[%s8539_s3 + $0x238] sm:$0xff] }
 0x78c   :  { %4938 = vmatmul.msk.f32.gmra.mxu1 %vm3800_vm6, %v4930_v6 }
 0x78e   :  { %4666 = vperm.xlu2 %5246, %v37_v34   ;;  %v3916_v6 = vpop.f32.mrf.mxu0 }
 0x791   :  { %4985 = vmatmul.msk.f32.gmra.mxu0 %vm3800_vm6, %v4977_v14 }
 0x792   :  { %4955 = vmatmul.msk.f32.gmra.mxu2 %vm3800_vm6, %v4947_v17  ;;  %4964 = vmatmul.msk.f32.vlgmr.msra.gmra.mxu3 %vm3800_vm6, %v4956_v50 }
 0x794   :  { %4939 = vmatmul.msk.f32.gmra.mxu1 %vm3800_vm6, %v4931_v43 }
 0x796   :  { %v8399_v23 = vpop.f32.mrf.mxu0 }
 0x799   :  { %4986 = vmatmul.msk.f32.gmra.mxu0 %vm3800_vm6, %v4978_v15 }
 0x79a   :  { %4965 = vmatmul.msk.f32.gmra.mxu3 %vm3800_vm6, %v4957_v44  ;;  %5012 = vmatmul.msk.f32.vlgmr.msra.gmra.mxu2 %vm3800_vm6, %v5004_v35 }
 0x79c   :  { %4996 = vmatmul.msk.f32.vlgmr.msrb.gmra.mxu1 %vm3800_vm6, %v4988_v46 }
 0x79e   :  { %v8405_v63 = vpop.f32.mrf.mxu0 }
 0x7a1   :  { %4987 = vmatmul.msk.f32.gmra.mxu0 %vm3800_vm6, %v4979_v0 }
 0x7a2   :  { %4966 = vmatmul.msk.f32.gmra.mxu3 %vm3800_vm6, %v4958_v60  ;;  %5013 = vmatmul.msk.f32.gmra.mxu2 %vm3800_vm6, %v5005_v1 }
 0x7a4   :  { %4997 = vmatmul.msk.f32.gmra.mxu1 %vm3800_vm6, %v4989_v52 }
 0x7a6   :  { %v8411_v14 = vpop.f32.mrf.mxu0 }
 0x7aa   :  { %4967 = vmatmul.msk.f32.gmra.mxu3 %vm3800_vm6, %v4959_v10  ;;  %5014 = vmatmul.msk.f32.gmra.mxu2 %vm3800_vm6, %v5006_v20 }
 0x7ac   :  { %4998 = vmatmul.msk.f32.gmra.mxu1 %vm3800_vm6, %v4990_v31 }
 0x7b2   :  { %4968 = vmatmul.msk.f32.gmra.mxu3 %vm3800_vm6, %v4960_v19  ;;  %5015 = vmatmul.msk.f32.gmra.mxu2 %vm3800_vm6, %v5007_v53 }
 0x7b4   :  { %4999 = vmatmul.msk.f32.gmra.mxu1 %vm3800_vm6, %v4991_v47 }
 0x7ba   :  { %4969 = vmatmul.msk.f32.gmra.mxu3 %vm3800_vm6, %v4961_v49  ;;  %5016 = vmatmul.msk.f32.gmra.mxu2 %vm3800_vm6, %v5008_v8  ;;  %v8419_v15 = vpop.f32.mrf.mxu0 }
 0x7bc   :  { %5000 = vmatmul.msk.f32.gmra.mxu1 %vm3800_vm6, %v4992_v58 }
 0x7c2   :  { %4970 = vmatmul.msk.f32.gmra.mxu3 %vm3800_vm6, %v4962_v45  ;;  %5017 = vmatmul.msk.f32.gmra.mxu2 %vm3800_vm6, %v5009_v29 }
 0x7c4   :  { %5001 = vmatmul.msk.f32.gmra.mxu1 %vm3800_vm6, %v4993_v41  ;;  %v8432_v41 = vpop.permute.xlu2 %4601 }
 0x7ca   :  { %4971 = vmatmul.msk.f32.gmra.mxu3 %vm3800_vm6, %v4963_v21  ;;  %5018 = vmatmul.msk.f32.gmra.mxu2 %vm3800_vm6, %v5010_v13 }
 0x7cc   :  { %5002 = vmatmul.msk.f32.gmra.mxu1 %vm3800_vm6, %v4994_v11 }
 0x7d2   :  { %5019 = vmatmul.msk.f32.gmra.mxu2 %vm3800_vm6, %v5011_v48  ;;  %5028 = vmatmul.msk.f32.vlgmr.msrb.gmra.mxu3 %vm3800_vm6, %v5020_v24  ;;  %v4643_v48 = vpop.permute.xlu0 %4642 }
 0x7d4   :  { %5003 = vmatmul.msk.f32.gmra.mxu1 %vm3800_vm6, %v4995_v42 }
 0x7d5   :  { %v8339_v51 = vpop.f32.mrf.mxu3 }
 0x7d6   :  { %v3908_v58 = vadd.f32 %v3907_v7, %v8339_v51  ;;  %v8437_v51 = vpop.permute.xlu2 %4611 }
 0x7d8   :  { %v3993_v61 = vpop.f32.mrf.mxu1 }
 0x7d9   :  { %v4017_v55 = vadd.f32 %v3993_v61, %v3908_v58 }
 0x7da   :  { %5029 = vmatmul.msk.f32.gmra.mxu3 %vm3800_vm6, %v5021_v22 }
 0x7dd   :  { %v8352_v26 = vpop.f32.mrf.mxu3  ;;  %v4087_v54 = vpop.f32.mrf.mxu2 }
 0x7de   :  { %v4111_v21 = vadd.f32 %v4087_v54, %v4017_v55  ;;  %v3911_v13 = vadd.f32 %v3910_v5, %v8352_v26  ;;  %v4592_v26 = vpop.permute.xlu0 %4591 }
 0x7e0   :  { %v3996_v28 = vpop.f32.mrf.mxu1 }
 0x7e1   :  { %v4018_v16 = vadd.f32 %v3996_v28, %v3911_v13 }
 0x7e2   :  { %5030 = vmatmul.msk.f32.gmra.mxu3 %vm3800_vm6, %v5022_v4 }
 0x7e5   :  { %v8362_v33 = vpop.f32.mrf.mxu3  ;;  %v4090_v30 = vpop.f32.mrf.mxu2 }
 0x7e6   :  { %v4275_v0 = vpop.f32.mrf.mxu0  ;;  %v4112_v3 = vadd.f32 %v4090_v30, %v4018_v16  ;;  %v3914_v34 = vadd.f32 %v3913_v18, %v8362_v33  ;;  %v4639_v30 = vpop.permute.xlu2 %4638 }
 0x7e9   :  { %v3999_v2 = vpop.f32.mrf.mxu1 }
 0x7ea   :  { %5031 = vmatmul.msk.f32.gmra.mxu3 %vm3800_vm6, %v5023_v32  ;;  %v4019_v5 = vadd.f32 %v3999_v2, %v3914_v34 }
 0x7ed   :  { %v8369_v12 = vpop.f32.mrf.mxu3  ;;  %v4093_v62 = vpop.f32.mrf.mxu2 }
 0x7ee   :  { %v4278_v38 = vpop.f32.mrf.mxu0  ;;  %v4113_v28 = vadd.f32 %v4093_v62, %v4019_v5  ;;  %v3917_v58 = vadd.f32 %v3916_v6, %v8369_v12 }
 0x7f1   :  { %v8395_v17 = vpop.f32.mrf.mxu1 }
 0x7f2   :  { %5032 = vmatmul.msk.f32.gmra.mxu3 %vm3800_vm6, %v5024_v57 }
 0x7f5   :  { %v8375_v27 = vpop.f32.mrf.mxu3  ;;  %v8397_v50 = vpop.f32.mrf.mxu2 }
 0x7f6   :  { %v4281_v4 = vpop.f32.mrf.mxu0 }
 0x7f9   :  { %v8401_v44 = vpop.f32.mrf.mxu1 }
 0x7fa   :  { %5033 = vmatmul.msk.f32.gmra.mxu3 %vm3800_vm6, %v5025_v56  ;;  %v8440_v56 = vpop.permute.xlu1 %4606 }
 0x7fd   :  { %v8381_v25 = vpop.f32.mrf.mxu3  ;;  %v8403_v35 = vpop.f32.mrf.mxu2 }
 0x7fe   :  { %v4284_v18 = vpop.f32.mrf.mxu0 }
 0x801   :  { %v8407_v60 = vpop.f32.mrf.mxu1 }
 0x802   :  { %5034 = vmatmul.msk.f32.gmra.mxu3 %vm3800_vm6, %v5026_v36  ;;  %v8446_v12 = vpop.permute.xlu1 %4621 }
 0x805   :  { %v8387_v9 = vpop.f32.mrf.mxu3  ;;  %v8409_v1 = vpop.f32.mrf.mxu2 }
 0x809   :  { %v8415_v20 = vpop.f32.mrf.mxu1 }
 0x80a   :  { %5035 = vmatmul.msk.f32.gmra.mxu3 %vm3800_vm6, %v5027_v37 }
 0x80d   :  { %v8393_v59 = vpop.f32.mrf.mxu3  ;;  %v8417_v31 = vpop.f32.mrf.mxu2 }
 0x811   :  { %v8423_v53 = vpop.f32.mrf.mxu1 }
 0x815   :  { %v4181_v43 = vpop.f32.mrf.mxu3  ;;  %v8425_v47 = vpop.f32.mrf.mxu2 }
 0x816   :  { %v4205_v11 = vadd.f32 %v4181_v43, %v4111_v21 }
 0x818   :  { %v4299_v22 = vadd.f32 %v4275_v0, %v4205_v11 }
 0x819   :  { %v4369_v8 = vpop.f32.mrf.mxu1 }
 0x81a   :  { %v4393_v32 = vadd.f32 %v4369_v8, %v4299_v22 }
 0x81d   :  { %v4184_v46 = vpop.f32.mrf.mxu3  ;;  %v4463_v45 = vpop.f32.mrf.mxu2 }
 0x81e   :  { %v4206_v7 = vadd.f32 %v4184_v46, %v4112_v3  ;;  %v4487_v57 = vadd.f32 %v4463_v45, %v4393_v32  ;;  %v4020_v45 = vadd.f32 %v8395_v17, %v3917_v58 }
 0x820   :  { %v4300_v36 = vadd.f32 %v4278_v38, %v4206_v7  ;;  %v4114_v6 = vadd.f32 %v8397_v50, %v4020_v45  ;;  %v4287_v7 = vpop.f32.mrf.mxu0 }
 0x821   :  { %v4372_v40 = vpop.f32.mrf.mxu1 }
 0x822   :  { %v4394_v55 = vadd.f32 %v4372_v40, %v4300_v36  ;;  %v3920_v40 = vadd.f32 %v8399_v23, %v8375_v27 }
 0x824   :  { %v4021_v32 = vadd.f32 %v8401_v44, %v3920_v40 }
 0x825   :  { %v4187_v52 = vpop.f32.mrf.mxu3  ;;  %v4466_v24 = vpop.f32.mrf.mxu2 }
 0x826   :  { %v4207_v21 = vadd.f32 %v4187_v52, %v4113_v28  ;;  %v4488_v46 = vadd.f32 %v4466_v24, %v4394_v55  ;;  %v4115_v27 = vadd.f32 %v8403_v35, %v4021_v32 }
 0x828   :  { %v4301_v11 = vadd.f32 %v4281_v4, %v4207_v21  ;;  %v4290_v21 = vpop.f32.mrf.mxu0 }
 0x829   :  { %v4375_v61 = vpop.f32.mrf.mxu1 }
 0x82a   :  { %v4395_v17 = vadd.f32 %v4375_v61, %v4301_v11 }
 0x82d   :  { %v8413_v10 = vpop.f32.mrf.mxu3  ;;  %v4469_v43 = vpop.f32.mrf.mxu2 }
 0x82e   :  { %v4208_v22 = vadd.f32 %v8413_v10, %v4114_v6  ;;  %v4489_v4 = vadd.f32 %v4469_v43, %v4395_v17  ;;  %v3923_v10 = vadd.f32 %v8405_v63, %v8381_v25 }
 0x830   :  { %v4293_v6 = vpop.f32.mrf.mxu0 }
 0x831   :  { %v4378_v62 = vpop.f32.mrf.mxu1 }
 0x835   :  { %v8421_v19 = vpop.f32.mrf.mxu3  ;;  %v4472_v24 = vpop.f32.mrf.mxu2 }
 0x836   :  { %v4209_v61 = vadd.f32 %v8421_v19, %v4115_v27  ;;  %v3926_v19 = vadd.f32 %v8411_v14, %v8387_v9 }
 0x838   :  { %v4023_v11 = vadd.f32 %v8415_v20, %v3926_v19 }
 0x83a   :  { %v4117_v9 = vadd.f32 %v8417_v31, %v4023_v11 }
 0x83d   :  { %v8427_v49 = vpop.f32.mrf.mxu3 }
 0x845   :  { %v8430_v29 = vpop.f32.mrf.mxu3 }
 0x846   :  { %v4211_v40 = vadd.f32 %v8430_v29, %v4117_v9 }
 0x848   :  { %v4305_v32 = vadd.f32 %v4293_v6, %v4211_v40  ;;  %v4688_v40 = vld [vmem:[%s8541_s5 + $0x18] sm:$0xff] }
 0x84d   :  { %v8435_v42 = vpop.f32.mrf.mxu3 }
 0x855   :  { %v4557_v54 = vpop.f32.mrf.mxu3 }
 0x856   :  { %v4581_v37 = vadd.f32 %v4557_v54, %v4487_v57 }
 0x858   :  { %v4629_v0 = vmul.f32 %v4592_v26, %v4581_v37  ;;  %v4302_v26 = vadd.f32 %v4284_v18, %v4208_v22  ;;  %v4475_v37 = vpop.f32.mrf.mxu2 }
 0x85a   :  { %v4669_v33 = vadd.f32 %v4639_v30, %v4629_v0  ;;  %v4396_v44 = vadd.f32 %v4378_v62, %v4302_v26  ;;  %v4022_v0 = vadd.f32 %v8407_v60, %v3923_v10  ;;  %v4303_v30 = vadd.f32 %v4287_v7, %v4209_v61 }
 0x85c   :  { %v4677_v8 = vmax.f32 %v4669_v33, 0.0  ;;  %v4490_v43 = vadd.f32 %v4472_v24, %v4396_v44  ;;  %v4116_v25 = vadd.f32 %v8409_v1, %v4022_v0  ;;  %v4651_v33 = vpop.permute.xlu2 %4650 }
 0x85d   :  { %v4560_v13 = vpop.f32.mrf.mxu3 }
 0x85e   :  { %v4582_v16 = vadd.f32 %v4560_v13, %v4488_v46  ;;  %v4751_v2 = vsel %vm3583_vm15, %v4677_v8, -inf  ;;  %v4694_v38 = vsel %vm1452_vm1, %v4677_v8, -inf  ;;  %v4210_v60 = vadd.f32 %v8427_v49, %v4116_v25 }
 0x85f   :  { %4752 = vmax.xlane.f32.xlu0 %v4751_v2  ;;  %4695 = vmax.xlane.f32.xlu1 %v4694_v38  ;;  %v3929_v49 = vadd.f32 %v8419_v15, %v8393_v59  ;;  %v4617_v59 = vpop.permute.xlu0 %4616 }
 0x860   :  { %v4630_v52 = vmul.f32 %v4597_v39, %v4582_v16  ;;  %v4381_v39 = vpop.f32.mrf.mxu1  ;;  %v4478_v16 = vpop.f32.mrf.mxu2  ;;  %v4304_v38 = vadd.f32 %v4290_v21, %v4210_v60 }
 0x861   :  { %v4397_v18 = vadd.f32 %v4381_v39, %v4303_v30 }
 0x862   :  { %v4670_v3 = vadd.f32 %v4643_v48, %v4630_v52  ;;  %v4647_v48 = vpop.permute.xlu1 %4646 }
 0x863   :  { %v4491_v45 = vadd.f32 %v4475_v37, %v4397_v18 }
 0x864   :  { %v4678_v34 = vmax.f32 %v4670_v3, 0.0  ;;  %v4024_v3 = vadd.f32 %v8423_v53, %v3929_v49  ;;  %v4659_v26 = vpop.permute.xlu2 %4658 }
 0x865   :  { %v4563_v57 = vpop.f32.mrf.mxu3 }
 0x866   :  { %v4583_v54 = vadd.f32 %v4563_v57, %v4489_v4  ;;  %v4754_v5 = vsel %vm3583_vm15, %v4678_v34, -inf  ;;  %v4697_v50 = vsel %vm1452_vm1, %v4678_v34, -inf  ;;  %v4118_v15 = vadd.f32 %v8425_v47, %v4024_v3 }
 0x867   :  { %4755 = vmax.xlane.f32.xlu1 %v4754_v5  ;;  %4698 = vmax.xlane.f32.xlu2 %v4697_v50  ;;  %v4296_v50 = vpop.f32.mrf.mxu0  ;;  %v4627_v21 = vpop.permute.xlu0 %4626 }
 0x868   :  { %v4631_v23 = vmul.f32 %v8432_v41, %v4583_v54  ;;  %v4384_v8 = vpop.f32.mrf.mxu1  ;;  %v4481_v57 = vpop.f32.mrf.mxu2  ;;  %v4212_v5 = vadd.f32 %v8435_v42, %v4118_v15 }
 0x869   :  { %v4398_v20 = vadd.f32 %v4384_v8, %v4304_v38 }
 0x86a   :  { %v4671_v36 = vadd.f32 %v4647_v48, %v4631_v23  ;;  %v4655_v52 = vpop.permute.xlu1 %4654  ;;  %v4306_v39 = vadd.f32 %v4296_v50, %v4212_v5 }
 0x86b   :  { %v4492_v17 = vadd.f32 %v4478_v16, %v4398_v20 }
 0x86c   :  { %v4679_v28 = vmax.f32 %v4671_v36, 0.0 }
 0x86d   :  { %v4566_v58 = vpop.f32.mrf.mxu3 }
 0x86e   :  { %v4584_v55 = vadd.f32 %v4566_v58, %v4490_v43  ;;  %v4757_v35 = vsel %vm3583_vm15, %v4679_v28, -inf  ;;  %v4700_v41 = vsel %vm1452_vm1, %v4679_v28, -inf }
 0x86f   :  { %4758 = vmax.xlane.f32.xlu0 %v4757_v35  ;;  %4701 = vmax.xlane.f32.xlu2 %v4700_v41 }
 0x870   :  { %v4632_v63 = vmul.f32 %v8440_v56, %v4584_v55  ;;  %v4387_v4 = vpop.f32.mrf.mxu1  ;;  %v4484_v37 = vpop.f32.mrf.mxu2 }
 0x871   :  { %v4399_v54 = vadd.f32 %v4387_v4, %v4305_v32 }
 0x872   :  { %v4672_v46 = vadd.f32 %v4651_v33, %v4632_v63  ;;  %v4663_v43 = vpop.permute.xlu1 %4662  ;;  %v4667_v63 = vpop.permute.xlu2 %4666 }
 0x873   :  { %v4493_v27 = vadd.f32 %v4481_v57, %v4399_v54 }
 0x874   :  { %v4680_v13 = vmax.f32 %v4672_v46, 0.0 }
 0x875   :  { %v4569_v2 = vpop.f32.mrf.mxu3 }
 0x876   :  { %v4585_v62 = vadd.f32 %v4569_v2, %v4491_v45  ;;  %v4760_v1 = vsel %vm3583_vm15, %v4680_v13, -inf  ;;  %v4703_v56 = vsel %vm1452_vm1, %v4680_v13, -inf }
 0x877   :  { %4761 = vmax.xlane.f32.xlu2 %v4760_v1  ;;  %4704 = vmax.xlane.f32.xlu1 %v4703_v56  ;;  %v4685_v1 = vld [vmem:[%s8541_s5] sm:$0xff]  ;;  %v4687_v56 = vld [vmem:[%s8541_s5 + $0x10] sm:$0xff] }
 0x878   :  { %v4633_v14 = vmul.f32 %v8437_v51, %v4585_v62  ;;  %v4390_v36 = vpop.f32.mrf.mxu1  ;;  %v4686_v62 = vld [vmem:[%s8541_s5 + $0x8] sm:$0xff] }
 0x879   :  { %v4400_v28 = vadd.f32 %v4390_v36, %v4306_v39 }
 0x87a   :  { %v4673_v24 = vadd.f32 %v4655_v52, %v4633_v14 }
 0x87b   :  { %v4494_v0 = vadd.f32 %v4484_v37, %v4400_v28 }
 0x87c   :  { %v4681_v22 = vmax.f32 %v4673_v24, 0.0 }
 0x87d   :  { %v4572_v34 = vpop.f32.mrf.mxu3 }
 0x87e   :  { %v4586_v7 = vadd.f32 %v4572_v34, %v4492_v17  ;;  %v4763_v31 = vsel %vm3583_vm15, %v4681_v22, -inf  ;;  %v4706_v51 = vsel %vm1452_vm1, %v4681_v22, -inf  ;;  %v4689_v22 = vld [vmem:[%s8541_s5 + $0x20] sm:$0xff] }
 0x87f   :  { %4764 = vmax.xlane.f32.xlu1 %v4763_v31  ;;  %4707 = vmax.xlane.f32.xlu0 %v4706_v51  ;;  %v4690_v51 = vld [vmem:[%s8541_s5 + $0x28] sm:$0xff] }
 0x880   :  { %v4634_v29 = vmul.f32 %v4617_v59, %v4586_v7 }
 0x882   :  { %v4674_v53 = vadd.f32 %v4659_v26, %v4634_v29 }
 0x884   :  { %v4682_v23 = vmax.f32 %v4674_v53, 0.0  ;;  %v4691_v53 = vld [vmem:[%s8541_s5 + $0x30] sm:$0xff] }
 0x885   :  { %v4575_v10 = vpop.f32.mrf.mxu3 }
 0x886   :  { %v4587_v48 = vadd.f32 %v4575_v10, %v4493_v27  ;;  %v4766_v44 = vsel %vm3583_vm15, %v4682_v23, -inf  ;;  %v4709_v61 = vsel %vm1452_vm1, %v4682_v23, -inf }
 0x887   :  { %4767 = vmax.xlane.f32.xlu0 %v4766_v44  ;;  %4710 = vmax.xlane.f32.xlu2 %v4709_v61 }
 0x888   :  { %v4635_v47 = vmul.f32 %v8446_v12, %v4587_v48 }
 0x88a   :  { %v4675_v42 = vadd.f32 %v4663_v43, %v4635_v47 }
 0x88c   :  { %v4683_v58 = vmax.f32 %v4675_v42, 0.0 }
 0x88d   :  { %v4578_v30 = vpop.f32.mrf.mxu3 }
 0x88e   :  { %v4588_v55 = vadd.f32 %v4578_v30, %v4494_v0  ;;  %v4769_v35 = vsel %vm3583_vm15, %v4683_v58, -inf  ;;  %v4712_v41 = vsel %vm1452_vm1, %v4683_v58, -inf }
 0x88f   :  { %4770 = vmax.xlane.f32.xlu2 %v4769_v35  ;;  %4713 = vmax.xlane.f32.xlu1 %v4712_v41  ;;  %v4692_v35 = vld [vmem:[%s8541_s5 + $0x38] sm:$0xff] }
 0x890   :  { %v4636_v25 = vmul.f32 %v4627_v21, %v4588_v55 }
 0x892   :  { %v4676_v19 = vadd.f32 %v4667_v63, %v4636_v25 }
 0x894   :  { %v4684_v33 = vmax.f32 %v4676_v19, 0.0 }
 0x896   :  { %v4772_v12 = vsel %vm3583_vm15, %v4684_v33, -inf  ;;  %v4715_v18 = vsel %vm1452_vm1, %v4684_v33, -inf  ;;  %vm4726_vm1 = vcmask 39936  }
 0x897   :  { %4773 = vmax.xlane.f32.xlu1 %v4772_v12  ;;  %4716 = vmax.xlane.f32.xlu0 %v4715_v18 }
 0x8d2   :  { %v4696_v60 = vpop.xlane.xlu1 %4695  ;;  %v4753_v8 = vpop.xlane.xlu0 %4752 }
 0x8d3   :  { %v4775_v52 = vmul.f32 %v4753_v8, %v4685_v1  ;;  %v4718_v20 = vmul.f32 %v4696_v60, %v4685_v1 }
 0x8d5   :  { %v4783_v7 = vsel %vm4726_vm1, %v4775_v52, 0.0  ;;  %v4727_v31 = vsel %vm4726_vm1, %v4718_v20, 0.0  ;;  %v4693_v52 = vld [vmem:[%s8541_s5 + $0x40] sm:$0x1] }
 0x8da   :  { %v4699_v46 = vpop.xlane.xlu2 %4698  ;;  %v4756_v45 = vpop.xlane.xlu1 %4755 }
 0x8db   :  { %v4776_v49 = vmul.f32 %v4756_v45, %v4686_v62  ;;  %v4719_v6 = vmul.f32 %v4699_v46, %v4686_v62 }
 0x8dd   :  { %v4784_v3 = vsel %vm4726_vm1, %v4776_v49, 0.0  ;;  %v4728_v4 = vsel %vm4726_vm1, %v4719_v6, 0.0 }
 0x8de   :  { %v4785_v54 = vadd.f32 %v4784_v3, %v4783_v7  ;;  %v4729_v5 = vadd.f32 %v4728_v4, %v4727_v31 }
 0x8e2   :  { %v4702_v13 = vpop.xlane.xlu2 %4701  ;;  %v4759_v11 = vpop.xlane.xlu0 %4758 }
 0x8e3   :  { %v4777_v24 = vmul.f32 %v4759_v11, %v4687_v56  ;;  %v4720_v17 = vmul.f32 %v4702_v13, %v4687_v56 }
 0x8e5   :  { %v4786_v59 = vsel %vm4726_vm1, %v4777_v24, 0.0  ;;  %v4730_v15 = vsel %vm4726_vm1, %v4720_v17, 0.0 }
 0x8e6   :  { %v4787_v44 = vadd.f32 %v4786_v59, %v4785_v54  ;;  %v4731_v61 = vadd.f32 %v4730_v15, %v4729_v5 }
 0x8ea   :  { %v4705_v16 = vpop.xlane.xlu1 %4704  ;;  %v4762_v2 = vpop.xlane.xlu2 %4761 }
 0x8eb   :  { %v4778_v34 = vmul.f32 %v4762_v2, %v4688_v40  ;;  %v4721_v32 = vmul.f32 %v4705_v16, %v4688_v40 }
 0x8ed   :  { %v4788_v23 = vsel %vm4726_vm1, %v4778_v34, 0.0  ;;  %v4732_v10 = vsel %vm4726_vm1, %v4721_v32, 0.0 }
 0x8ee   :  { %v4789_v28 = vadd.f32 %v4788_v23, %v4787_v44  ;;  %v4733_v42 = vadd.f32 %v4732_v10, %v4731_v61 }
 0x8f2   :  { %v4708_v38 = vpop.xlane.xlu0 %4707  ;;  %v4765_v9 = vpop.xlane.xlu1 %4764 }
 0x8f3   :  { %v4779_v29 = vmul.f32 %v4765_v9, %v4689_v22  ;;  %v4722_v26 = vmul.f32 %v4708_v38, %v4689_v22 }
 0x8f5   :  { %v4790_v36 = vsel %vm4726_vm1, %v4779_v29, 0.0  ;;  %v4734_v47 = vsel %vm4726_vm1, %v4722_v26, 0.0 }
 0x8f6   :  { %v4791_v30 = vadd.f32 %v4790_v36, %v4789_v28  ;;  %v4735_v55 = vadd.f32 %v4734_v47, %v4733_v42 }
 0x8fa   :  { %v4711_v14 = vpop.xlane.xlu2 %4710  ;;  %v4768_v57 = vpop.xlane.xlu0 %4767 }
 0x8fb   :  { %v4780_v39 = vmul.f32 %v4768_v57, %v4690_v51  ;;  %v4723_v48 = vmul.f32 %v4711_v14, %v4690_v51 }
 0x8fd   :  { %v4792_v0 = vsel %vm4726_vm1, %v4780_v39, 0.0  ;;  %v4736_v58 = vsel %vm4726_vm1, %v4723_v48, 0.0 }
 0x8fe   :  { %v4793_v25 = vadd.f32 %v4792_v0, %v4791_v30  ;;  %v4737_v63 = vadd.f32 %v4736_v58, %v4735_v55 }
 0x902   :  { %v4771_v50 = vpop.xlane.xlu2 %4770  ;;  %v4714_v27 = vpop.xlane.xlu1 %4713 }
 0x903   :  { %v4781_v37 = vmul.f32 %v4771_v50, %v4691_v53  ;;  %v4724_v43 = vmul.f32 %v4714_v27, %v4691_v53 }
 0x905   :  { %v4794_v41 = vsel %vm4726_vm1, %v4781_v37, 0.0  ;;  %v4738_v21 = vsel %vm4726_vm1, %v4724_v43, 0.0 }
 0x906   :  { %v4795_v60 = vadd.f32 %v4794_v41, %v4793_v25  ;;  %v4739_v46 = vadd.f32 %v4738_v21, %v4737_v63 }
 0x90a   :  { %v4774_v19 = vpop.xlane.xlu1 %4773  ;;  %v4717_v33 = vpop.xlane.xlu0 %4716 }
 0x90b   :  { %v4782_v12 = vmul.f32 %v4774_v19, %v4692_v35  ;;  %v4725_v18 = vmul.f32 %v4717_v33, %v4692_v35 }
 0x90d   :  { %v4796_v8 = vsel %vm4726_vm1, %v4782_v12, 0.0  ;;  %v4740_v45 = vsel %vm4726_vm1, %v4725_v18, 0.0 }
 0x90e   :  { %v4797_v13 = vadd.f32 %v4796_v8, %v4795_v60  ;;  %v4741_v11 = vadd.f32 %v4740_v45, %v4739_v46 }
 0x910   :  { %v4798_v16 = vrot.slane %v4797_v13, 4  ;;  %v4742_v2 = vrot.slane %v4741_v11, 4 }
 0x912   :  { %v4799_v38 = vadd.f32 %v4798_v16, %v4797_v13  ;;  %v4743_v62 = vadd.f32 %v4742_v2, %v4741_v11 }
 0x914   :  { %v4800_v1 = vrot.slane %v4799_v38, 2  ;;  %v4744_v56 = vrot.slane %v4743_v62, 2 }
 0x916   :  { %v4801_v9 = vadd.f32 %v4800_v1, %v4799_v38  ;;  %v4745_v14 = vadd.f32 %v4744_v56, %v4743_v62 }
 0x918   :  { %v4802_v49 = vrot.slane %v4801_v9, 1  ;;  %v4746_v6 = vrot.slane %v4745_v14, 1 }
 0x91a   :  { %v4803_v20 = vadd.f32 %v4802_v49, %v4801_v9  ;;  %v4747_v40 = vadd.f32 %v4746_v6, %v4745_v14 }
 0x91c   :  { %v4804_v24 = vadd.f32 %v4803_v20, %v4693_v52  ;;  %v4748_v17 = vadd.f32 %v4747_v40, %v4693_v52 }
 0x91e   :  { %4750 = vst.msk [vmem:[#allocation5] sm:$0x1] %vm4749_vm7, %v4748_v17 }
 0x91f   :  { %4806 = vst.msk [vmem:[#allocation5 + $0x1] sm:$0x1] %vm4749_vm7, %v4804_v24 }
 0x920   :  { %4819 = dma.vmem_to_hbm [thread:$0]  %s4812_s4, 32, %s4814_s17, [#allocation6], %s5315_s10, %s5315_s10, %s5319_s12  }
 0x921   :  { %5274 = dma.done.wait [#allocation6], 32  }
 0x922   :  { %5275 = vsyncadd [#allocation6], 4294967264 }
 0x923   :  { %4824 = vsyncpa [#allocation6], 1 }

</bundles_post_ra>
